<compile_context>
chip_gen: v7x
topology: tpu7x:2x2x1
jax: 0.10.0
libtpu: 0.0.40
codegen_flags: <defaults>
</compile_context>

<pallas_src>
import math

import jax
import jax.numpy as jnp
from jax import lax
from jax.experimental import pallas as pl

# ---------------- small, synthetic model hyper-parameters ----------------
B = 2               # batch
T = 16              # max_length (time frames)
F = 16              # num mel bins
PATCH = 8           # patch size == stride (non-overlapping patch "conv")
D = 32              # hidden_size
H = 4               # attention heads
DH = D // H         # 8 == f32 sublane tile -> sublane-aligned head slices
INTER = 64          # intermediate_size
NUM_LAYERS = 2      # num_hidden_layers
REDUCTION_RATE = 4
BNECK = round(D / REDUCTION_RATE)
NUM_CLASSES = 5
LN_EPS = 1e-12
NUM_PATCHES = (T // PATCH) * (F // PATCH)     # 4
SEQ = NUM_PATCHES + 2                         # 6: [CLS] + [DIST] + patches
SEQP = 8                                      # per-batch token block padded to one sublane tile
TOK = B * SEQP                                # 16 token lanes processed at once
PP = PATCH * PATCH                            # 64
UP = INTER + BNECK                            # 72 fused [FFN-intermediate | adapter-down]


# ----------------------------- in-kernel helpers -----------------------------
def _gelu(x):
    # TODO(synk): PyTorch nn.GELU / HF "gelu" is erf-exact; tanh approximation
    # used here for guaranteed Mosaic lowering (differs at ~1e-3 level).
    return jax.nn.gelu(x, approximate=True)


def _layernorm_cols(x, g, b):
    """LayerNorm over the feature (sublane) axis of a feature-major (D, TOK) slab."""
    mu = jnp.mean(x, axis=0, keepdims=True)
    xc = x - mu
    var = jnp.mean(xc * xc, axis=0, keepdims=True)
    return xc * lax.rsqrt(var + LN_EPS) * g + b


# ----------------------------- fused Pallas kernel -----------------------------
def ast_fused_kernel(patches_ref, patch_w_ref, addend_ref, mask_ref,
                     ln1_g_ref, ln1_b_ref, wqkv_ref, bqkv_ref, wo_ref, bo_ref,
                     ln2_g_ref, ln2_b_ref, wup_ref, bup_ref, wdn_ref, bdn_ref,
                     lnf_g_ref, lnf_b_ref, cls_w_ref, cls_b_ref, out_ref):
    """Whole batch, all layers, in one invocation; everything stays in VMEM/vregs."""
    f32 = jnp.float32
    mask = mask_ref[...]                                           # (TOK, TOK)

    # Patch-embedding "conv" as one matmul over both batch items (tokens = lanes).
    # CLS/DIST/padding columns of `patches` are zero; `addend` supplies
    # cls+pos0 / dist+pos1 / conv-bias+pos for every column.
    h = (jnp.dot(patch_w_ref[...], patches_ref[...],
                 preferred_element_type=f32) + addend_ref[...])    # (D, TOK)
    # (dropout layers are identity in eval mode)

    for l in range(NUM_LAYERS):                                    # static unroll
        # ---- MHSA branch ----
        ln1 = _layernorm_cols(h, ln1_g_ref[l], ln1_b_ref[l])       # (D, TOK)
        # fused QKV projection, feature-major: rows [Q | K | V], 8-row head blocks
        qkv = (jnp.dot(wqkv_ref[l], ln1,
                       preferred_element_type=f32) + bqkv_ref[l])  # (3D, TOK)

        # scores for all heads; 1/sqrt(DH) already folded into the Q weights.
        s_parts = []
        for hh in range(H):
            qh = qkv[hh * DH:(hh + 1) * DH, :]                     # (DH, TOK) aligned
            kh = qkv[D + hh * DH:D + (hh + 1) * DH, :]
            s = lax.dot_general(qh, kh, (((0,), (0,)), ((), ())),
                                preferred_element_type=f32)        # (TOK, TOK) = q^T k
            s_parts.append(s + mask)                               # batch-block / pad mask
        s_all = jnp.concatenate(s_parts, axis=0)                   # (H*TOK, TOK)

        # one batched softmax chain for all heads + both batch items
        p_all = jnp.exp(s_all - jnp.max(s_all, axis=-1, keepdims=True))
        p_all = p_all * pl.reciprocal(jnp.sum(p_all, axis=-1, keepdims=True),
                                      approx=True)

        # per-head context directly in feature-major orientation, then one merged
        # (D,D)@(D,TOK) output projection for all heads.
        ctx_parts = []
        for hh in range(H):
            ph = p_all[hh * TOK:(hh + 1) * TOK, :]                 # (TOK, TOK) aligned
            vh = qkv[2 * D + hh * DH:2 * D + (hh + 1) * DH, :]     # (DH, TOK) aligned
            ctx_parts.append(lax.dot_general(vh, ph, (((1,), (1,)), ((), ())),
                                             preferred_element_type=f32))  # (DH, TOK)
        ctx = jnp.concatenate(ctx_parts, axis=0)                   # (D, TOK)
        h = jnp.dot(wo_ref[l], ctx, preferred_element_type=f32) + bo_ref[l] + h

        # ---- FFN branch with parallel 'before' bottleneck adapter ----
        ln2 = _layernorm_cols(h, ln2_g_ref[l], ln2_b_ref[l])
        # fused [FFN intermediate | adapter down-proj] -> GELU (both use GELU)
        up = _gelu(jnp.dot(wup_ref[l], ln2,
                           preferred_element_type=f32) + bup_ref[l])       # (UP, TOK)
        # fused [FFN output ; adapter up-proj], biases pre-summed:
        #   == output(intermediate(ln2)) + adapter(ln2)
        h = jnp.dot(wdn_ref[l], up, preferred_element_type=f32) + bdn_ref[l] + h

    # ---- final LayerNorm + classification head on every token column ----
    hN = _layernorm_cols(h, lnf_g_ref[...], lnf_b_ref[...])
    out_ref[...] = (jnp.dot(cls_w_ref[...], hN, preferred_element_type=f32)
                    + cls_b_ref[...]).astype(out_ref.dtype)        # (NUM_CLASSES, TOK)


# ----------------------------- wrapper -----------------------------
def ast_adapter_forward(x, pk):
    # XLA glue: im2col patchify (Conv2d kernel==stride==PATCH, 1 channel) and
    # column layout for the kernel (CLS/DIST/padding columns are zero).
    # TODO(synk): at real AST sizes move this im2col into the kernel.
    xt = jnp.transpose(x, (0, 2, 1))                               # (B, F, T)
    fb, tb = F // PATCH, T // PATCH
    patches = (xt.reshape(B, fb, PATCH, tb, PATCH)
                 .transpose(0, 1, 3, 2, 4)
                 .reshape(B, NUM_PATCHES, PP))
    pat_t = jnp.transpose(patches, (0, 2, 1))                      # (B, PP, NUM_PATCHES)
    blk = jnp.concatenate(
        [jnp.zeros((B, PP, 2), patches.dtype), pat_t,
         jnp.zeros((B, PP, SEQP - SEQ), patches.dtype)], axis=2)   # (B, PP, SEQP)
    patches_T = jnp.transpose(blk, (1, 0, 2)).reshape(PP, TOK)     # (PP, TOK)

    out = pl.pallas_call(
        ast_fused_kernel,
        out_shape=jax.ShapeDtypeStruct((NUM_CLASSES, TOK), jnp.float32),
    )(patches_T, pk["patch_w_T"], pk["addend_T"], pk["attn_mask"],
      pk["ln1_g"], pk["ln1_b"], pk["wqkv_T"], pk["bqkv_T"], pk["wo_T"], pk["bo_T"],
      pk["ln2_g"], pk["ln2_b"], pk["wup_T"], pk["bup_T"], pk["wdn_T"], pk["bdn_T"],
      pk["lnf_g"], pk["lnf_b"], pk["cls_w_T"], pk["cls_b_T"])

    # final_output == 'CLS': CLS token sits in lane 0 of each batch block.
    return out[:, ::SEQP].T                                        # (B, NUM_CLASSES)


# ----------------------------- parameter init & packing -----------------------------
def init_params(key):
    keys = iter(jax.random.split(key, 256))

    def nrm(shape, scale=0.02):
        return (scale * jax.random.normal(next(keys), shape)).astype(jnp.float32)

    zeros = lambda shape: jnp.zeros(shape, jnp.float32)
    ones = lambda shape: jnp.ones(shape, jnp.float32)

    params = {
        "patch_w": nrm((PP, D)),
        "patch_b": zeros((1, D)),
        "cls_token": nrm((1, D)),
        "dist_token": nrm((1, D)),
        "pos_embed": nrm((SEQ, D)),
        "layers": [],
        "lnf_g": ones((1, D)), "lnf_b": zeros((1, D)),
        "cls_w": nrm((D, NUM_CLASSES)), "cls_b": zeros((1, NUM_CLASSES)),
    }
    for _ in range(NUM_LAYERS):
        lp = {
            "ln1_g": ones((1, D)), "ln1_b": zeros((1, D)),
            "wq": nrm((D, D)), "bq": zeros((1, D)),
            "wk": nrm((D, D)), "bk": zeros((1, D)),
            "wv": nrm((D, D)), "bv": zeros((1, D)),
            "wo": nrm((D, D)), "bo": zeros((1, D)),
            "ln2_g": ones((1, D)), "ln2_b": zeros((1, D)),
            "wi": nrm((D, INTER)), "bi": zeros((1, INTER)),
            "wd": nrm((INTER, D)), "bd": zeros((1, D)),
            # Bottleneck adapter: zero-init exactly as nn.init.zeros_ in the module
            "a_dw": zeros((D, BNECK)), "a_db": zeros((1, BNECK)),
            "a_uw": zeros((BNECK, D)), "a_ub": zeros((1, D)),
        }
        params["layers"].append(lp)
    return params


def pack_params(p):
    """One-time packing: transpose to the feature-major kernel layout, stack over
    NUM_LAYERS, fuse QKV / [FFN-up | adapter-down] / [FFN-down ; adapter-up],
    fold the attention scale into Q, and precompute the addend + attention mask."""
    L = p["layers"]
    scale = 1.0 / math.sqrt(DH)
    stk = lambda f: jnp.stack([f(lp) for lp in L], axis=0)

    addend = p["pos_embed"] + jnp.concatenate(
        [p["cls_token"], p["dist_token"],
         jnp.broadcast_to(p["patch_b"], (NUM_PATCHES, D))], axis=0)      # (SEQ, D)
    addend = jnp.concatenate(
        [addend, jnp.zeros((SEQP - SEQ, D), jnp.float32)], axis=0)       # (SEQP, D)
    addend_T = jnp.tile(addend.T, (1, B))                                # (D, TOK)

    tok = jnp.arange(TOK)
    same_batch = (tok[:, None] // SEQP) == (tok[None, :] // SEQP)
    key_valid = (tok[None, :] % SEQP) < SEQ
    attn_mask = jnp.where(same_batch & key_valid, 0.0, -1e30).astype(jnp.float32)

    return {
        "patch_w_T": p["patch_w"].T,                                     # (D, PP)
        "addend_T": addend_T,                                            # (D, TOK)
        "attn_mask": attn_mask,                                          # (TOK, TOK)
        "ln1_g": stk(lambda lp: lp["ln1_g"].T),                          # (L, D, 1)
        "ln1_b": stk(lambda lp: lp["ln1_b"].T),
        "wqkv_T": stk(lambda lp: jnp.concatenate(
            [lp["wq"].T * scale, lp["wk"].T, lp["wv"].T], axis=0)),      # (L, 3D, D)
        "bqkv_T": stk(lambda lp: jnp.concatenate(
            [lp["bq"].T * scale, lp["bk"].T, lp["bv"].T], axis=0)),      # (L, 3D, 1)
        "wo_T": stk(lambda lp: lp["wo"].T),                              # (L, D, D)
        "bo_T": stk(lambda lp: lp["bo"].T),                              # (L, D, 1)
        "ln2_g": stk(lambda lp: lp["ln2_g"].T),
        "ln2_b": stk(lambda lp: lp["ln2_b"].T),
        "wup_T": stk(lambda lp: jnp.concatenate(
            [lp["wi"], lp["a_dw"]], axis=1).T),                          # (L, UP, D)
        "bup_T": stk(lambda lp: jnp.concatenate(
            [lp["bi"], lp["a_db"]], axis=1).T),                          # (L, UP, 1)
        "wdn_T": stk(lambda lp: jnp.concatenate(
            [lp["wd"], lp["a_uw"]], axis=0).T),                          # (L, D, UP)
        "bdn_T": stk(lambda lp: (lp["bd"] + lp["a_ub"]).T),              # (L, D, 1)
        "lnf_g": p["lnf_g"].T, "lnf_b": p["lnf_b"].T,                    # (D, 1)
        "cls_w_T": p["cls_w"].T,                                         # (C, D)
        "cls_b_T": p["cls_b"].T,                                         # (C, 1)
    }


# ----------------------------- main -----------------------------
if __name__ == "__main__":
    key = jax.random.PRNGKey(0)
    pkey, xkey = jax.random.split(key)
    params = init_params(pkey)
    packed = pack_params(params)                       # one-time weight packing
    x = jax.random.normal(xkey, (B, T, F), dtype=jnp.float32)   # spectrogram (B, T, F)

    fwd = jax.jit(ast_adapter_forward)
    logits = fwd(x, packed)
    jax.block_until_ready(logits)
    assert logits.shape == (B, NUM_CLASSES)
    assert bool(jnp.all(jnp.isfinite(logits)))
    print("KERNEL_OK")
</pallas_src>

<mosaic_0001>
module attributes {stable_mosaic.version = 11 : i64} {
  func.func @ast_fused_kernel(%arg0: memref<64x16xf32, #tpu.memory_space<vmem>>, %arg1: memref<32x64xf32, #tpu.memory_space<vmem>>, %arg2: memref<32x16xf32, #tpu.memory_space<vmem>>, %arg3: memref<16x16xf32, #tpu.memory_space<vmem>>, %arg4: memref<2x32x1xf32, #tpu.memory_space<vmem>>, %arg5: memref<2x32x1xf32, #tpu.memory_space<vmem>>, %arg6: memref<2x96x32xf32, #tpu.memory_space<vmem>>, %arg7: memref<2x96x1xf32, #tpu.memory_space<vmem>>, %arg8: memref<2x32x32xf32, #tpu.memory_space<vmem>>, %arg9: memref<2x32x1xf32, #tpu.memory_space<vmem>>, %arg10: memref<2x32x1xf32, #tpu.memory_space<vmem>>, %arg11: memref<2x32x1xf32, #tpu.memory_space<vmem>>, %arg12: memref<2x72x32xf32, #tpu.memory_space<vmem>>, %arg13: memref<2x72x1xf32, #tpu.memory_space<vmem>>, %arg14: memref<2x32x72xf32, #tpu.memory_space<vmem>>, %arg15: memref<2x32x1xf32, #tpu.memory_space<vmem>>, %arg16: memref<32x1xf32, #tpu.memory_space<vmem>>, %arg17: memref<32x1xf32, #tpu.memory_space<vmem>>, %arg18: memref<5x32xf32, #tpu.memory_space<vmem>>, %arg19: memref<5x1xf32, #tpu.memory_space<vmem>>, %arg20: memref<5x16xf32, #tpu.memory_space<vmem>>) attributes {dimension_semantics = [], scalar_prefetch = 0 : i64, scratch_operands = 0 : i64, tpu.core_type = #tpu.core_type<tc>} {
    %c0 = arith.constant 0 : index
    %c0_0 = arith.constant 0 : index
    %0 = vector.load %arg3[%c0, %c0_0] : memref<16x16xf32, #tpu.memory_space<vmem>>, vector<16x16xf32>
    %c0_1 = arith.constant 0 : index
    %c0_2 = arith.constant 0 : index
    %1 = vector.load %arg1[%c0_1, %c0_2] : memref<32x64xf32, #tpu.memory_space<vmem>>, vector<32x64xf32>
    %c0_3 = arith.constant 0 : index
    %c0_4 = arith.constant 0 : index
    %2 = vector.load %arg0[%c0_3, %c0_4] : memref<64x16xf32, #tpu.memory_space<vmem>>, vector<64x16xf32>
    %cst = arith.constant dense<0.000000e+00> : vector<32x16xf32>
    %3 = tpu.matmul %1, %2, %cst {dimension_numbers = #tpu.dot_dimension_numbers<[1], [0], [0], [1], [0, 0, 1, 1], [], []>} : vector<32x64xf32>, vector<64x16xf32>, vector<32x16xf32> -> vector<32x16xf32>
    %c0_5 = arith.constant 0 : index
    %c0_6 = arith.constant 0 : index
    %4 = vector.load %arg2[%c0_5, %c0_6] : memref<32x16xf32, #tpu.memory_space<vmem>>, vector<32x16xf32>
    %5 = arith.addf %3, %4 : vector<32x16xf32>
    %c0_7 = arith.constant 0 : index
    %c0_8 = arith.constant 0 : index
    %c0_9 = arith.constant 0 : index
    %6 = vector.load %arg4[%c0_7, %c0_8, %c0_9] : memref<2x32x1xf32, #tpu.memory_space<vmem>>, vector<1x32x1xf32>
    %7 = vector.shape_cast %6 : vector<1x32x1xf32> to vector<32x1xf32>
    %c0_10 = arith.constant 0 : index
    %c0_11 = arith.constant 0 : index
    %c0_12 = arith.constant 0 : index
    %8 = vector.load %arg5[%c0_10, %c0_11, %c0_12] : memref<2x32x1xf32, #tpu.memory_space<vmem>>, vector<1x32x1xf32>
    %9 = vector.shape_cast %8 : vector<1x32x1xf32> to vector<32x1xf32>
    %cst_13 = arith.constant dense<0.000000e+00> : vector<16xf32>
    %10 = vector.multi_reduction <add>, %5, %cst_13 [0] : vector<32x16xf32> to vector<16xf32>
    %11 = vector.shape_cast %10 : vector<16xf32> to vector<1x16xf32>
    %cst_14 = arith.constant 3.200000e+01 : f32
    %12 = vector.broadcast %cst_14 : f32 to vector<1x16xf32>
    %13 = arith.divf %11, %12 : vector<1x16xf32>
    %14 = vector.broadcast %13 : vector<1x16xf32> to vector<32x16xf32>
    %15 = arith.subf %5, %14 : vector<32x16xf32>
    %16 = arith.mulf %15, %15 : vector<32x16xf32>
    %cst_15 = arith.constant dense<0.000000e+00> : vector<16xf32>
    %17 = vector.multi_reduction <add>, %16, %cst_15 [0] : vector<32x16xf32> to vector<16xf32>
    %18 = vector.shape_cast %17 : vector<16xf32> to vector<1x16xf32>
    %cst_16 = arith.constant 3.200000e+01 : f32
    %19 = vector.broadcast %cst_16 : f32 to vector<1x16xf32>
    %20 = arith.divf %18, %19 : vector<1x16xf32>
    %cst_17 = arith.constant 9.99999996E-13 : f32
    %21 = vector.broadcast %cst_17 : f32 to vector<1x16xf32>
    %22 = arith.addf %20, %21 : vector<1x16xf32>
    %23 = math.rsqrt %22 : vector<1x16xf32>
    %24 = vector.broadcast %23 : vector<1x16xf32> to vector<32x16xf32>
    %25 = arith.mulf %15, %24 : vector<32x16xf32>
    %26 = vector.broadcast %7 : vector<32x1xf32> to vector<32x16xf32>
    %27 = arith.mulf %25, %26 : vector<32x16xf32>
    %28 = vector.broadcast %9 : vector<32x1xf32> to vector<32x16xf32>
    %29 = arith.addf %27, %28 : vector<32x16xf32>
    %c0_18 = arith.constant 0 : index
    %c0_19 = arith.constant 0 : index
    %c0_20 = arith.constant 0 : index
    %30 = vector.load %arg6[%c0_18, %c0_19, %c0_20] : memref<2x96x32xf32, #tpu.memory_space<vmem>>, vector<1x96x32xf32>
    %31 = vector.shape_cast %30 : vector<1x96x32xf32> to vector<96x32xf32>
    %cst_21 = arith.constant dense<0.000000e+00> : vector<96x16xf32>
    %32 = tpu.matmul %31, %29, %cst_21 {dimension_numbers = #tpu.dot_dimension_numbers<[1], [0], [0], [1], [0, 0, 1, 1], [], []>} : vector<96x32xf32>, vector<32x16xf32>, vector<96x16xf32> -> vector<96x16xf32>
    %c0_22 = arith.constant 0 : index
    %c0_23 = arith.constant 0 : index
    %c0_24 = arith.constant 0 : index
    %33 = vector.load %arg7[%c0_22, %c0_23, %c0_24] : memref<2x96x1xf32, #tpu.memory_space<vmem>>, vector<1x96x1xf32>
    %34 = vector.shape_cast %33 : vector<1x96x1xf32> to vector<96x1xf32>
    %35 = vector.broadcast %34 : vector<96x1xf32> to vector<96x16xf32>
    %36 = arith.addf %32, %35 : vector<96x16xf32>
    %37 = vector.extract_strided_slice %36 {offsets = [0, 0], sizes = [8, 16], strides = [1, 1]} : vector<96x16xf32> to vector<8x16xf32>
    %38 = vector.extract_strided_slice %36 {offsets = [32, 0], sizes = [8, 16], strides = [1, 1]} : vector<96x16xf32> to vector<8x16xf32>
    %cst_25 = arith.constant dense<0.000000e+00> : vector<16x16xf32>
    %39 = tpu.matmul %37, %38, %cst_25 {dimension_numbers = #tpu.dot_dimension_numbers<[0], [0], [1], [1], [0, 1, 1, 1], [], []>} : vector<8x16xf32>, vector<8x16xf32>, vector<16x16xf32> -> vector<16x16xf32>
    %40 = arith.addf %39, %0 : vector<16x16xf32>
    %41 = vector.extract_strided_slice %36 {offsets = [8, 0], sizes = [8, 16], strides = [1, 1]} : vector<96x16xf32> to vector<8x16xf32>
    %42 = vector.extract_strided_slice %36 {offsets = [40, 0], sizes = [8, 16], strides = [1, 1]} : vector<96x16xf32> to vector<8x16xf32>
    %cst_26 = arith.constant dense<0.000000e+00> : vector<16x16xf32>
    %43 = tpu.matmul %41, %42, %cst_26 {dimension_numbers = #tpu.dot_dimension_numbers<[0], [0], [1], [1], [0, 1, 1, 1], [], []>} : vector<8x16xf32>, vector<8x16xf32>, vector<16x16xf32> -> vector<16x16xf32>
    %44 = arith.addf %43, %0 : vector<16x16xf32>
    %45 = vector.extract_strided_slice %36 {offsets = [16, 0], sizes = [8, 16], strides = [1, 1]} : vector<96x16xf32> to vector<8x16xf32>
    %46 = vector.extract_strided_slice %36 {offsets = [48, 0], sizes = [8, 16], strides = [1, 1]} : vector<96x16xf32> to vector<8x16xf32>
    %cst_27 = arith.constant dense<0.000000e+00> : vector<16x16xf32>
    %47 = tpu.matmul %45, %46, %cst_27 {dimension_numbers = #tpu.dot_dimension_numbers<[0], [0], [1], [1], [0, 1, 1, 1], [], []>} : vector<8x16xf32>, vector<8x16xf32>, vector<16x16xf32> -> vector<16x16xf32>
    %48 = arith.addf %47, %0 : vector<16x16xf32>
    %49 = vector.extract_strided_slice %36 {offsets = [24, 0], sizes = [8, 16], strides = [1, 1]} : vector<96x16xf32> to vector<8x16xf32>
    %50 = vector.extract_strided_slice %36 {offsets = [56, 0], sizes = [8, 16], strides = [1, 1]} : vector<96x16xf32> to vector<8x16xf32>
    %cst_28 = arith.constant dense<0.000000e+00> : vector<16x16xf32>
    %51 = tpu.matmul %49, %50, %cst_28 {dimension_numbers = #tpu.dot_dimension_numbers<[0], [0], [1], [1], [0, 1, 1, 1], [], []>} : vector<8x16xf32>, vector<8x16xf32>, vector<16x16xf32> -> vector<16x16xf32>
    %52 = arith.addf %51, %0 : vector<16x16xf32>
    %53 = tpu.concatenate %40, %44, %48, %52 in 0 : vector<16x16xf32>, vector<16x16xf32>, vector<16x16xf32>, vector<16x16xf32> -> vector<64x16xf32>
    %cst_29 = arith.constant dense<0xFF800000> : vector<64xf32>
    %54 = vector.multi_reduction <maximumf>, %53, %cst_29 [1] : vector<64x16xf32> to vector<64xf32>
    %55 = vector.shape_cast %54 : vector<64xf32> to vector<64x1xf32>
    %56 = vector.broadcast %55 : vector<64x1xf32> to vector<64x16xf32>
    %57 = arith.subf %53, %56 : vector<64x16xf32>
    %58 = math.exp %57 : vector<64x16xf32>
    %cst_30 = arith.constant dense<0.000000e+00> : vector<64xf32>
    %59 = vector.multi_reduction <add>, %58, %cst_30 [1] : vector<64x16xf32> to vector<64xf32>
    %60 = vector.shape_cast %59 : vector<64xf32> to vector<64x1xf32>
    %61 = tpu.reciprocal %60 {approx = true} : vector<64x1xf32> -> vector<64x1xf32>
    %62 = vector.broadcast %61 : vector<64x1xf32> to vector<64x16xf32>
    %63 = arith.mulf %58, %62 : vector<64x16xf32>
    %64 = vector.extract_strided_slice %63 {offsets = [0, 0], sizes = [16, 16], strides = [1, 1]} : vector<64x16xf32> to vector<16x16xf32>
    %65 = vector.extract_strided_slice %36 {offsets = [64, 0], sizes = [8, 16], strides = [1, 1]} : vector<96x16xf32> to vector<8x16xf32>
    %cst_31 = arith.constant dense<0.000000e+00> : vector<8x16xf32>
    %66 = tpu.matmul %65, %64, %cst_31 {dimension_numbers = #tpu.dot_dimension_numbers<[1], [1], [0], [0], [0, 0, 1, 0], [], []>} : vector<8x16xf32>, vector<16x16xf32>, vector<8x16xf32> -> vector<8x16xf32>
    %67 = vector.extract_strided_slice %63 {offsets = [16, 0], sizes = [16, 16], strides = [1, 1]} : vector<64x16xf32> to vector<16x16xf32>
    %68 = vector.extract_strided_slice %36 {offsets = [72, 0], sizes = [8, 16], strides = [1, 1]} : vector<96x16xf32> to vector<8x16xf32>
    %cst_32 = arith.constant dense<0.000000e+00> : vector<8x16xf32>
    %69 = tpu.matmul %68, %67, %cst_32 {dimension_numbers = #tpu.dot_dimension_numbers<[1], [1], [0], [0], [0, 0, 1, 0], [], []>} : vector<8x16xf32>, vector<16x16xf32>, vector<8x16xf32> -> vector<8x16xf32>
    %70 = vector.extract_strided_slice %63 {offsets = [32, 0], sizes = [16, 16], strides = [1, 1]} : vector<64x16xf32> to vector<16x16xf32>
    %71 = vector.extract_strided_slice %36 {offsets = [80, 0], sizes = [8, 16], strides = [1, 1]} : vector<96x16xf32> to vector<8x16xf32>
    %cst_33 = arith.constant dense<0.000000e+00> : vector<8x16xf32>
    %72 = tpu.matmul %71, %70, %cst_33 {dimension_numbers = #tpu.dot_dimension_numbers<[1], [1], [0], [0], [0, 0, 1, 0], [], []>} : vector<8x16xf32>, vector<16x16xf32>, vector<8x16xf32> -> vector<8x16xf32>
    %73 = vector.extract_strided_slice %63 {offsets = [48, 0], sizes = [16, 16], strides = [1, 1]} : vector<64x16xf32> to vector<16x16xf32>
    %74 = vector.extract_strided_slice %36 {offsets = [88, 0], sizes = [8, 16], strides = [1, 1]} : vector<96x16xf32> to vector<8x16xf32>
    %cst_34 = arith.constant dense<0.000000e+00> : vector<8x16xf32>
    %75 = tpu.matmul %74, %73, %cst_34 {dimension_numbers = #tpu.dot_dimension_numbers<[1], [1], [0], [0], [0, 0, 1, 0], [], []>} : vector<8x16xf32>, vector<16x16xf32>, vector<8x16xf32> -> vector<8x16xf32>
    %76 = tpu.concatenate %66, %69, %72, %75 in 0 : vector<8x16xf32>, vector<8x16xf32>, vector<8x16xf32>, vector<8x16xf32> -> vector<32x16xf32>
    %c0_35 = arith.constant 0 : index
    %c0_36 = arith.constant 0 : index
    %c0_37 = arith.constant 0 : index
    %77 = vector.load %arg8[%c0_35, %c0_36, %c0_37] : memref<2x32x32xf32, #tpu.memory_space<vmem>>, vector<1x32x32xf32>
    %78 = vector.shape_cast %77 : vector<1x32x32xf32> to vector<32x32xf32>
    %cst_38 = arith.constant dense<0.000000e+00> : vector<32x16xf32>
    %79 = tpu.matmul %78, %76, %cst_38 {dimension_numbers = #tpu.dot_dimension_numbers<[1], [0], [0], [1], [0, 0, 1, 1], [], []>} : vector<32x32xf32>, vector<32x16xf32>, vector<32x16xf32> -> vector<32x16xf32>
    %c0_39 = arith.constant 0 : index
    %c0_40 = arith.constant 0 : index
    %c0_41 = arith.constant 0 : index
    %80 = vector.load %arg9[%c0_39, %c0_40, %c0_41] : memref<2x32x1xf32, #tpu.memory_space<vmem>>, vector<1x32x1xf32>
    %81 = vector.shape_cast %80 : vector<1x32x1xf32> to vector<32x1xf32>
    %82 = vector.broadcast %81 : vector<32x1xf32> to vector<32x16xf32>
    %83 = arith.addf %79, %82 : vector<32x16xf32>
    %84 = arith.addf %83, %5 : vector<32x16xf32>
    %c0_42 = arith.constant 0 : index
    %c0_43 = arith.constant 0 : index
    %c0_44 = arith.constant 0 : index
    %85 = vector.load %arg10[%c0_42, %c0_43, %c0_44] : memref<2x32x1xf32, #tpu.memory_space<vmem>>, vector<1x32x1xf32>
    %86 = vector.shape_cast %85 : vector<1x32x1xf32> to vector<32x1xf32>
    %c0_45 = arith.constant 0 : index
    %c0_46 = arith.constant 0 : index
    %c0_47 = arith.constant 0 : index
    %87 = vector.load %arg11[%c0_45, %c0_46, %c0_47] : memref<2x32x1xf32, #tpu.memory_space<vmem>>, vector<1x32x1xf32>
    %88 = vector.shape_cast %87 : vector<1x32x1xf32> to vector<32x1xf32>
    %cst_48 = arith.constant dense<0.000000e+00> : vector<16xf32>
    %89 = vector.multi_reduction <add>, %84, %cst_48 [0] : vector<32x16xf32> to vector<16xf32>
    %90 = vector.shape_cast %89 : vector<16xf32> to vector<1x16xf32>
    %cst_49 = arith.constant 3.200000e+01 : f32
    %91 = vector.broadcast %cst_49 : f32 to vector<1x16xf32>
    %92 = arith.divf %90, %91 : vector<1x16xf32>
    %93 = vector.broadcast %92 : vector<1x16xf32> to vector<32x16xf32>
    %94 = arith.subf %84, %93 : vector<32x16xf32>
    %95 = arith.mulf %94, %94 : vector<32x16xf32>
    %cst_50 = arith.constant dense<0.000000e+00> : vector<16xf32>
    %96 = vector.multi_reduction <add>, %95, %cst_50 [0] : vector<32x16xf32> to vector<16xf32>
    %97 = vector.shape_cast %96 : vector<16xf32> to vector<1x16xf32>
    %cst_51 = arith.constant 3.200000e+01 : f32
    %98 = vector.broadcast %cst_51 : f32 to vector<1x16xf32>
    %99 = arith.divf %97, %98 : vector<1x16xf32>
    %cst_52 = arith.constant 9.99999996E-13 : f32
    %100 = vector.broadcast %cst_52 : f32 to vector<1x16xf32>
    %101 = arith.addf %99, %100 : vector<1x16xf32>
    %102 = math.rsqrt %101 : vector<1x16xf32>
    %103 = vector.broadcast %102 : vector<1x16xf32> to vector<32x16xf32>
    %104 = arith.mulf %94, %103 : vector<32x16xf32>
    %105 = vector.broadcast %86 : vector<32x1xf32> to vector<32x16xf32>
    %106 = arith.mulf %104, %105 : vector<32x16xf32>
    %107 = vector.broadcast %88 : vector<32x1xf32> to vector<32x16xf32>
    %108 = arith.addf %106, %107 : vector<32x16xf32>
    %c0_53 = arith.constant 0 : index
    %c0_54 = arith.constant 0 : index
    %c0_55 = arith.constant 0 : index
    %109 = vector.load %arg12[%c0_53, %c0_54, %c0_55] : memref<2x72x32xf32, #tpu.memory_space<vmem>>, vector<1x72x32xf32>
    %110 = vector.shape_cast %109 : vector<1x72x32xf32> to vector<72x32xf32>
    %cst_56 = arith.constant dense<0.000000e+00> : vector<72x16xf32>
    %111 = tpu.matmul %110, %108, %cst_56 {dimension_numbers = #tpu.dot_dimension_numbers<[1], [0], [0], [1], [0, 0, 1, 1], [], []>} : vector<72x32xf32>, vector<32x16xf32>, vector<72x16xf32> -> vector<72x16xf32>
    %c0_57 = arith.constant 0 : index
    %c0_58 = arith.constant 0 : index
    %c0_59 = arith.constant 0 : index
    %112 = vector.load %arg13[%c0_57, %c0_58, %c0_59] : memref<2x72x1xf32, #tpu.memory_space<vmem>>, vector<1x72x1xf32>
    %113 = vector.shape_cast %112 : vector<1x72x1xf32> to vector<72x1xf32>
    %114 = vector.broadcast %113 : vector<72x1xf32> to vector<72x16xf32>
    %115 = arith.addf %111, %114 : vector<72x16xf32>
    %116 = arith.mulf %115, %115 : vector<72x16xf32>
    %117 = arith.mulf %115, %116 : vector<72x16xf32>
    %cst_60 = arith.constant 4.471500e-02 : f32
    %118 = vector.broadcast %cst_60 : f32 to vector<72x16xf32>
    %119 = arith.mulf %118, %117 : vector<72x16xf32>
    %120 = arith.addf %115, %119 : vector<72x16xf32>
    %cst_61 = arith.constant 0.797884583 : f32
    %121 = vector.broadcast %cst_61 : f32 to vector<72x16xf32>
    %122 = arith.mulf %121, %120 : vector<72x16xf32>
    %123 = math.tanh %122 : vector<72x16xf32>
    %cst_62 = arith.constant 1.000000e+00 : f32
    %124 = vector.broadcast %cst_62 : f32 to vector<72x16xf32>
    %125 = arith.addf %124, %123 : vector<72x16xf32>
    %cst_63 = arith.constant 5.000000e-01 : f32
    %126 = vector.broadcast %cst_63 : f32 to vector<72x16xf32>
    %127 = arith.mulf %126, %125 : vector<72x16xf32>
    %128 = arith.mulf %115, %127 : vector<72x16xf32>
    %c0_64 = arith.constant 0 : index
    %c0_65 = arith.constant 0 : index
    %c0_66 = arith.constant 0 : index
    %129 = vector.load %arg14[%c0_64, %c0_65, %c0_66] : memref<2x32x72xf32, #tpu.memory_space<vmem>>, vector<1x32x72xf32>
    %130 = vector.shape_cast %129 : vector<1x32x72xf32> to vector<32x72xf32>
    %cst_67 = arith.constant dense<0.000000e+00> : vector<32x16xf32>
    %131 = tpu.matmul %130, %128, %cst_67 {dimension_numbers = #tpu.dot_dimension_numbers<[1], [0], [0], [1], [0, 0, 1, 1], [], []>} : vector<32x72xf32>, vector<72x16xf32>, vector<32x16xf32> -> vector<32x16xf32>
    %c0_68 = arith.constant 0 : index
    %c0_69 = arith.constant 0 : index
    %c0_70 = arith.constant 0 : index
    %132 = vector.load %arg15[%c0_68, %c0_69, %c0_70] : memref<2x32x1xf32, #tpu.memory_space<vmem>>, vector<1x32x1xf32>
    %133 = vector.shape_cast %132 : vector<1x32x1xf32> to vector<32x1xf32>
    %134 = vector.broadcast %133 : vector<32x1xf32> to vector<32x16xf32>
    %135 = arith.addf %131, %134 : vector<32x16xf32>
    %136 = arith.addf %135, %84 : vector<32x16xf32>
    %c1 = arith.constant 1 : index
    %c0_71 = arith.constant 0 : index
    %c0_72 = arith.constant 0 : index
    %137 = vector.load %arg4[%c1, %c0_71, %c0_72] : memref<2x32x1xf32, #tpu.memory_space<vmem>>, vector<1x32x1xf32>
    %138 = vector.shape_cast %137 : vector<1x32x1xf32> to vector<32x1xf32>
    %c1_73 = arith.constant 1 : index
    %c0_74 = arith.constant 0 : index
    %c0_75 = arith.constant 0 : index
    %139 = vector.load %arg5[%c1_73, %c0_74, %c0_75] : memref<2x32x1xf32, #tpu.memory_space<vmem>>, vector<1x32x1xf32>
    %140 = vector.shape_cast %139 : vector<1x32x1xf32> to vector<32x1xf32>
    %cst_76 = arith.constant dense<0.000000e+00> : vector<16xf32>
    %141 = vector.multi_reduction <add>, %136, %cst_76 [0] : vector<32x16xf32> to vector<16xf32>
    %142 = vector.shape_cast %141 : vector<16xf32> to vector<1x16xf32>
    %cst_77 = arith.constant 3.200000e+01 : f32
    %143 = vector.broadcast %cst_77 : f32 to vector<1x16xf32>
    %144 = arith.divf %142, %143 : vector<1x16xf32>
    %145 = vector.broadcast %144 : vector<1x16xf32> to vector<32x16xf32>
    %146 = arith.subf %136, %145 : vector<32x16xf32>
    %147 = arith.mulf %146, %146 : vector<32x16xf32>
    %cst_78 = arith.constant dense<0.000000e+00> : vector<16xf32>
    %148 = vector.multi_reduction <add>, %147, %cst_78 [0] : vector<32x16xf32> to vector<16xf32>
    %149 = vector.shape_cast %148 : vector<16xf32> to vector<1x16xf32>
    %cst_79 = arith.constant 3.200000e+01 : f32
    %150 = vector.broadcast %cst_79 : f32 to vector<1x16xf32>
    %151 = arith.divf %149, %150 : vector<1x16xf32>
    %cst_80 = arith.constant 9.99999996E-13 : f32
    %152 = vector.broadcast %cst_80 : f32 to vector<1x16xf32>
    %153 = arith.addf %151, %152 : vector<1x16xf32>
    %154 = math.rsqrt %153 : vector<1x16xf32>
    %155 = vector.broadcast %154 : vector<1x16xf32> to vector<32x16xf32>
    %156 = arith.mulf %146, %155 : vector<32x16xf32>
    %157 = vector.broadcast %138 : vector<32x1xf32> to vector<32x16xf32>
    %158 = arith.mulf %156, %157 : vector<32x16xf32>
    %159 = vector.broadcast %140 : vector<32x1xf32> to vector<32x16xf32>
    %160 = arith.addf %158, %159 : vector<32x16xf32>
    %c1_81 = arith.constant 1 : index
    %c0_82 = arith.constant 0 : index
    %c0_83 = arith.constant 0 : index
    %161 = vector.load %arg6[%c1_81, %c0_82, %c0_83] : memref<2x96x32xf32, #tpu.memory_space<vmem>>, vector<1x96x32xf32>
    %162 = vector.shape_cast %161 : vector<1x96x32xf32> to vector<96x32xf32>
    %cst_84 = arith.constant dense<0.000000e+00> : vector<96x16xf32>
    %163 = tpu.matmul %162, %160, %cst_84 {dimension_numbers = #tpu.dot_dimension_numbers<[1], [0], [0], [1], [0, 0, 1, 1], [], []>} : vector<96x32xf32>, vector<32x16xf32>, vector<96x16xf32> -> vector<96x16xf32>
    %c1_85 = arith.constant 1 : index
    %c0_86 = arith.constant 0 : index
    %c0_87 = arith.constant 0 : index
    %164 = vector.load %arg7[%c1_85, %c0_86, %c0_87] : memref<2x96x1xf32, #tpu.memory_space<vmem>>, vector<1x96x1xf32>
    %165 = vector.shape_cast %164 : vector<1x96x1xf32> to vector<96x1xf32>
    %166 = vector.broadcast %165 : vector<96x1xf32> to vector<96x16xf32>
    %167 = arith.addf %163, %166 : vector<96x16xf32>
    %168 = vector.extract_strided_slice %167 {offsets = [0, 0], sizes = [8, 16], strides = [1, 1]} : vector<96x16xf32> to vector<8x16xf32>
    %169 = vector.extract_strided_slice %167 {offsets = [32, 0], sizes = [8, 16], strides = [1, 1]} : vector<96x16xf32> to vector<8x16xf32>
    %cst_88 = arith.constant dense<0.000000e+00> : vector<16x16xf32>
    %170 = tpu.matmul %168, %169, %cst_88 {dimension_numbers = #tpu.dot_dimension_numbers<[0], [0], [1], [1], [0, 1, 1, 1], [], []>} : vector<8x16xf32>, vector<8x16xf32>, vector<16x16xf32> -> vector<16x16xf32>
    %171 = arith.addf %170, %0 : vector<16x16xf32>
    %172 = vector.extract_strided_slice %167 {offsets = [8, 0], sizes = [8, 16], strides = [1, 1]} : vector<96x16xf32> to vector<8x16xf32>
    %173 = vector.extract_strided_slice %167 {offsets = [40, 0], sizes = [8, 16], strides = [1, 1]} : vector<96x16xf32> to vector<8x16xf32>
    %cst_89 = arith.constant dense<0.000000e+00> : vector<16x16xf32>
    %174 = tpu.matmul %172, %173, %cst_89 {dimension_numbers = #tpu.dot_dimension_numbers<[0], [0], [1], [1], [0, 1, 1, 1], [], []>} : vector<8x16xf32>, vector<8x16xf32>, vector<16x16xf32> -> vector<16x16xf32>
    %175 = arith.addf %174, %0 : vector<16x16xf32>
    %176 = vector.extract_strided_slice %167 {offsets = [16, 0], sizes = [8, 16], strides = [1, 1]} : vector<96x16xf32> to vector<8x16xf32>
    %177 = vector.extract_strided_slice %167 {offsets = [48, 0], sizes = [8, 16], strides = [1, 1]} : vector<96x16xf32> to vector<8x16xf32>
    %cst_90 = arith.constant dense<0.000000e+00> : vector<16x16xf32>
    %178 = tpu.matmul %176, %177, %cst_90 {dimension_numbers = #tpu.dot_dimension_numbers<[0], [0], [1], [1], [0, 1, 1, 1], [], []>} : vector<8x16xf32>, vector<8x16xf32>, vector<16x16xf32> -> vector<16x16xf32>
    %179 = arith.addf %178, %0 : vector<16x16xf32>
    %180 = vector.extract_strided_slice %167 {offsets = [24, 0], sizes = [8, 16], strides = [1, 1]} : vector<96x16xf32> to vector<8x16xf32>
    %181 = vector.extract_strided_slice %167 {offsets = [56, 0], sizes = [8, 16], strides = [1, 1]} : vector<96x16xf32> to vector<8x16xf32>
    %cst_91 = arith.constant dense<0.000000e+00> : vector<16x16xf32>
    %182 = tpu.matmul %180, %181, %cst_91 {dimension_numbers = #tpu.dot_dimension_numbers<[0], [0], [1], [1], [0, 1, 1, 1], [], []>} : vector<8x16xf32>, vector<8x16xf32>, vector<16x16xf32> -> vector<16x16xf32>
    %183 = arith.addf %182, %0 : vector<16x16xf32>
    %184 = tpu.concatenate %171, %175, %179, %183 in 0 : vector<16x16xf32>, vector<16x16xf32>, vector<16x16xf32>, vector<16x16xf32> -> vector<64x16xf32>
    %cst_92 = arith.constant dense<0xFF800000> : vector<64xf32>
    %185 = vector.multi_reduction <maximumf>, %184, %cst_92 [1] : vector<64x16xf32> to vector<64xf32>
    %186 = vector.shape_cast %185 : vector<64xf32> to vector<64x1xf32>
    %187 = vector.broadcast %186 : vector<64x1xf32> to vector<64x16xf32>
    %188 = arith.subf %184, %187 : vector<64x16xf32>
    %189 = math.exp %188 : vector<64x16xf32>
    %cst_93 = arith.constant dense<0.000000e+00> : vector<64xf32>
    %190 = vector.multi_reduction <add>, %189, %cst_93 [1] : vector<64x16xf32> to vector<64xf32>
    %191 = vector.shape_cast %190 : vector<64xf32> to vector<64x1xf32>
    %192 = tpu.reciprocal %191 {approx = true} : vector<64x1xf32> -> vector<64x1xf32>
    %193 = vector.broadcast %192 : vector<64x1xf32> to vector<64x16xf32>
    %194 = arith.mulf %189, %193 : vector<64x16xf32>
    %195 = vector.extract_strided_slice %194 {offsets = [0, 0], sizes = [16, 16], strides = [1, 1]} : vector<64x16xf32> to vector<16x16xf32>
    %196 = vector.extract_strided_slice %167 {offsets = [64, 0], sizes = [8, 16], strides = [1, 1]} : vector<96x16xf32> to vector<8x16xf32>
    %cst_94 = arith.constant dense<0.000000e+00> : vector<8x16xf32>
    %197 = tpu.matmul %196, %195, %cst_94 {dimension_numbers = #tpu.dot_dimension_numbers<[1], [1], [0], [0], [0, 0, 1, 0], [], []>} : vector<8x16xf32>, vector<16x16xf32>, vector<8x16xf32> -> vector<8x16xf32>
    %198 = vector.extract_strided_slice %194 {offsets = [16, 0], sizes = [16, 16], strides = [1, 1]} : vector<64x16xf32> to vector<16x16xf32>
    %199 = vector.extract_strided_slice %167 {offsets = [72, 0], sizes = [8, 16], strides = [1, 1]} : vector<96x16xf32> to vector<8x16xf32>
    %cst_95 = arith.constant dense<0.000000e+00> : vector<8x16xf32>
    %200 = tpu.matmul %199, %198, %cst_95 {dimension_numbers = #tpu.dot_dimension_numbers<[1], [1], [0], [0], [0, 0, 1, 0], [], []>} : vector<8x16xf32>, vector<16x16xf32>, vector<8x16xf32> -> vector<8x16xf32>
    %201 = vector.extract_strided_slice %194 {offsets = [32, 0], sizes = [16, 16], strides = [1, 1]} : vector<64x16xf32> to vector<16x16xf32>
    %202 = vector.extract_strided_slice %167 {offsets = [80, 0], sizes = [8, 16], strides = [1, 1]} : vector<96x16xf32> to vector<8x16xf32>
    %cst_96 = arith.constant dense<0.000000e+00> : vector<8x16xf32>
    %203 = tpu.matmul %202, %201, %cst_96 {dimension_numbers = #tpu.dot_dimension_numbers<[1], [1], [0], [0], [0, 0, 1, 0], [], []>} : vector<8x16xf32>, vector<16x16xf32>, vector<8x16xf32> -> vector<8x16xf32>
    %204 = vector.extract_strided_slice %194 {offsets = [48, 0], sizes = [16, 16], strides = [1, 1]} : vector<64x16xf32> to vector<16x16xf32>
    %205 = vector.extract_strided_slice %167 {offsets = [88, 0], sizes = [8, 16], strides = [1, 1]} : vector<96x16xf32> to vector<8x16xf32>
    %cst_97 = arith.constant dense<0.000000e+00> : vector<8x16xf32>
    %206 = tpu.matmul %205, %204, %cst_97 {dimension_numbers = #tpu.dot_dimension_numbers<[1], [1], [0], [0], [0, 0, 1, 0], [], []>} : vector<8x16xf32>, vector<16x16xf32>, vector<8x16xf32> -> vector<8x16xf32>
    %207 = tpu.concatenate %197, %200, %203, %206 in 0 : vector<8x16xf32>, vector<8x16xf32>, vector<8x16xf32>, vector<8x16xf32> -> vector<32x16xf32>
    %c1_98 = arith.constant 1 : index
    %c0_99 = arith.constant 0 : index
    %c0_100 = arith.constant 0 : index
    %208 = vector.load %arg8[%c1_98, %c0_99, %c0_100] : memref<2x32x32xf32, #tpu.memory_space<vmem>>, vector<1x32x32xf32>
    %209 = vector.shape_cast %208 : vector<1x32x32xf32> to vector<32x32xf32>
    %cst_101 = arith.constant dense<0.000000e+00> : vector<32x16xf32>
    %210 = tpu.matmul %209, %207, %cst_101 {dimension_numbers = #tpu.dot_dimension_numbers<[1], [0], [0], [1], [0, 0, 1, 1], [], []>} : vector<32x32xf32>, vector<32x16xf32>, vector<32x16xf32> -> vector<32x16xf32>
    %c1_102 = arith.constant 1 : index
    %c0_103 = arith.constant 0 : index
    %c0_104 = arith.constant 0 : index
    %211 = vector.load %arg9[%c1_102, %c0_103, %c0_104] : memref<2x32x1xf32, #tpu.memory_space<vmem>>, vector<1x32x1xf32>
    %212 = vector.shape_cast %211 : vector<1x32x1xf32> to vector<32x1xf32>
    %213 = vector.broadcast %212 : vector<32x1xf32> to vector<32x16xf32>
    %214 = arith.addf %210, %213 : vector<32x16xf32>
    %215 = arith.addf %214, %136 : vector<32x16xf32>
    %c1_105 = arith.constant 1 : index
    %c0_106 = arith.constant 0 : index
    %c0_107 = arith.constant 0 : index
    %216 = vector.load %arg10[%c1_105, %c0_106, %c0_107] : memref<2x32x1xf32, #tpu.memory_space<vmem>>, vector<1x32x1xf32>
    %217 = vector.shape_cast %216 : vector<1x32x1xf32> to vector<32x1xf32>
    %c1_108 = arith.constant 1 : index
    %c0_109 = arith.constant 0 : index
    %c0_110 = arith.constant 0 : index
    %218 = vector.load %arg11[%c1_108, %c0_109, %c0_110] : memref<2x32x1xf32, #tpu.memory_space<vmem>>, vector<1x32x1xf32>
    %219 = vector.shape_cast %218 : vector<1x32x1xf32> to vector<32x1xf32>
    %cst_111 = arith.constant dense<0.000000e+00> : vector<16xf32>
    %220 = vector.multi_reduction <add>, %215, %cst_111 [0] : vector<32x16xf32> to vector<16xf32>
    %221 = vector.shape_cast %220 : vector<16xf32> to vector<1x16xf32>
    %cst_112 = arith.constant 3.200000e+01 : f32
    %222 = vector.broadcast %cst_112 : f32 to vector<1x16xf32>
    %223 = arith.divf %221, %222 : vector<1x16xf32>
    %224 = vector.broadcast %223 : vector<1x16xf32> to vector<32x16xf32>
    %225 = arith.subf %215, %224 : vector<32x16xf32>
    %226 = arith.mulf %225, %225 : vector<32x16xf32>
    %cst_113 = arith.constant dense<0.000000e+00> : vector<16xf32>
    %227 = vector.multi_reduction <add>, %226, %cst_113 [0] : vector<32x16xf32> to vector<16xf32>
    %228 = vector.shape_cast %227 : vector<16xf32> to vector<1x16xf32>
    %cst_114 = arith.constant 3.200000e+01 : f32
    %229 = vector.broadcast %cst_114 : f32 to vector<1x16xf32>
    %230 = arith.divf %228, %229 : vector<1x16xf32>
    %cst_115 = arith.constant 9.99999996E-13 : f32
    %231 = vector.broadcast %cst_115 : f32 to vector<1x16xf32>
    %232 = arith.addf %230, %231 : vector<1x16xf32>
    %233 = math.rsqrt %232 : vector<1x16xf32>
    %234 = vector.broadcast %233 : vector<1x16xf32> to vector<32x16xf32>
    %235 = arith.mulf %225, %234 : vector<32x16xf32>
    %236 = vector.broadcast %217 : vector<32x1xf32> to vector<32x16xf32>
    %237 = arith.mulf %235, %236 : vector<32x16xf32>
    %238 = vector.broadcast %219 : vector<32x1xf32> to vector<32x16xf32>
    %239 = arith.addf %237, %238 : vector<32x16xf32>
    %c1_116 = arith.constant 1 : index
    %c0_117 = arith.constant 0 : index
    %c0_118 = arith.constant 0 : index
    %240 = vector.load %arg12[%c1_116, %c0_117, %c0_118] : memref<2x72x32xf32, #tpu.memory_space<vmem>>, vector<1x72x32xf32>
    %241 = vector.shape_cast %240 : vector<1x72x32xf32> to vector<72x32xf32>
    %cst_119 = arith.constant dense<0.000000e+00> : vector<72x16xf32>
    %242 = tpu.matmul %241, %239, %cst_119 {dimension_numbers = #tpu.dot_dimension_numbers<[1], [0], [0], [1], [0, 0, 1, 1], [], []>} : vector<72x32xf32>, vector<32x16xf32>, vector<72x16xf32> -> vector<72x16xf32>
    %c1_120 = arith.constant 1 : index
    %c0_121 = arith.constant 0 : index
    %c0_122 = arith.constant 0 : index
    %243 = vector.load %arg13[%c1_120, %c0_121, %c0_122] : memref<2x72x1xf32, #tpu.memory_space<vmem>>, vector<1x72x1xf32>
    %244 = vector.shape_cast %243 : vector<1x72x1xf32> to vector<72x1xf32>
    %245 = vector.broadcast %244 : vector<72x1xf32> to vector<72x16xf32>
    %246 = arith.addf %242, %245 : vector<72x16xf32>
    %247 = arith.mulf %246, %246 : vector<72x16xf32>
    %248 = arith.mulf %246, %247 : vector<72x16xf32>
    %cst_123 = arith.constant 4.471500e-02 : f32
    %249 = vector.broadcast %cst_123 : f32 to vector<72x16xf32>
    %250 = arith.mulf %249, %248 : vector<72x16xf32>
    %251 = arith.addf %246, %250 : vector<72x16xf32>
    %cst_124 = arith.constant 0.797884583 : f32
    %252 = vector.broadcast %cst_124 : f32 to vector<72x16xf32>
    %253 = arith.mulf %252, %251 : vector<72x16xf32>
    %254 = math.tanh %253 : vector<72x16xf32>
    %cst_125 = arith.constant 1.000000e+00 : f32
    %255 = vector.broadcast %cst_125 : f32 to vector<72x16xf32>
    %256 = arith.addf %255, %254 : vector<72x16xf32>
    %cst_126 = arith.constant 5.000000e-01 : f32
    %257 = vector.broadcast %cst_126 : f32 to vector<72x16xf32>
    %258 = arith.mulf %257, %256 : vector<72x16xf32>
    %259 = arith.mulf %246, %258 : vector<72x16xf32>
    %c1_127 = arith.constant 1 : index
    %c0_128 = arith.constant 0 : index
    %c0_129 = arith.constant 0 : index
    %260 = vector.load %arg14[%c1_127, %c0_128, %c0_129] : memref<2x32x72xf32, #tpu.memory_space<vmem>>, vector<1x32x72xf32>
    %261 = vector.shape_cast %260 : vector<1x32x72xf32> to vector<32x72xf32>
    %cst_130 = arith.constant dense<0.000000e+00> : vector<32x16xf32>
    %262 = tpu.matmul %261, %259, %cst_130 {dimension_numbers = #tpu.dot_dimension_numbers<[1], [0], [0], [1], [0, 0, 1, 1], [], []>} : vector<32x72xf32>, vector<72x16xf32>, vector<32x16xf32> -> vector<32x16xf32>
    %c1_131 = arith.constant 1 : index
    %c0_132 = arith.constant 0 : index
    %c0_133 = arith.constant 0 : index
    %263 = vector.load %arg15[%c1_131, %c0_132, %c0_133] : memref<2x32x1xf32, #tpu.memory_space<vmem>>, vector<1x32x1xf32>
    %264 = vector.shape_cast %263 : vector<1x32x1xf32> to vector<32x1xf32>
    %265 = vector.broadcast %264 : vector<32x1xf32> to vector<32x16xf32>
    %266 = arith.addf %262, %265 : vector<32x16xf32>
    %267 = arith.addf %266, %215 : vector<32x16xf32>
    %c0_134 = arith.constant 0 : index
    %c0_135 = arith.constant 0 : index
    %268 = vector.load %arg16[%c0_134, %c0_135] : memref<32x1xf32, #tpu.memory_space<vmem>>, vector<32x1xf32>
    %c0_136 = arith.constant 0 : index
    %c0_137 = arith.constant 0 : index
    %269 = vector.load %arg17[%c0_136, %c0_137] : memref<32x1xf32, #tpu.memory_space<vmem>>, vector<32x1xf32>
    %cst_138 = arith.constant dense<0.000000e+00> : vector<16xf32>
    %270 = vector.multi_reduction <add>, %267, %cst_138 [0] : vector<32x16xf32> to vector<16xf32>
    %271 = vector.shape_cast %270 : vector<16xf32> to vector<1x16xf32>
    %cst_139 = arith.constant 3.200000e+01 : f32
    %272 = vector.broadcast %cst_139 : f32 to vector<1x16xf32>
    %273 = arith.divf %271, %272 : vector<1x16xf32>
    %274 = vector.broadcast %273 : vector<1x16xf32> to vector<32x16xf32>
    %275 = arith.subf %267, %274 : vector<32x16xf32>
    %276 = arith.mulf %275, %275 : vector<32x16xf32>
    %cst_140 = arith.constant dense<0.000000e+00> : vector<16xf32>
    %277 = vector.multi_reduction <add>, %276, %cst_140 [0] : vector<32x16xf32> to vector<16xf32>
    %278 = vector.shape_cast %277 : vector<16xf32> to vector<1x16xf32>
    %cst_141 = arith.constant 3.200000e+01 : f32
    %279 = vector.broadcast %cst_141 : f32 to vector<1x16xf32>
    %280 = arith.divf %278, %279 : vector<1x16xf32>
    %cst_142 = arith.constant 9.99999996E-13 : f32
    %281 = vector.broadcast %cst_142 : f32 to vector<1x16xf32>
    %282 = arith.addf %280, %281 : vector<1x16xf32>
    %283 = math.rsqrt %282 : vector<1x16xf32>
    %284 = vector.broadcast %283 : vector<1x16xf32> to vector<32x16xf32>
    %285 = arith.mulf %275, %284 : vector<32x16xf32>
    %286 = vector.broadcast %268 : vector<32x1xf32> to vector<32x16xf32>
    %287 = arith.mulf %285, %286 : vector<32x16xf32>
    %288 = vector.broadcast %269 : vector<32x1xf32> to vector<32x16xf32>
    %289 = arith.addf %287, %288 : vector<32x16xf32>
    %c0_143 = arith.constant 0 : index
    %c0_144 = arith.constant 0 : index
    %290 = vector.load %arg18[%c0_143, %c0_144] : memref<5x32xf32, #tpu.memory_space<vmem>>, vector<5x32xf32>
    %cst_145 = arith.constant dense<0.000000e+00> : vector<5x16xf32>
    %291 = tpu.matmul %290, %289, %cst_145 {dimension_numbers = #tpu.dot_dimension_numbers<[1], [0], [0], [1], [0, 0, 1, 1], [], []>} : vector<5x32xf32>, vector<32x16xf32>, vector<5x16xf32> -> vector<5x16xf32>
    %c0_146 = arith.constant 0 : index
    %c0_147 = arith.constant 0 : index
    %292 = vector.load %arg19[%c0_146, %c0_147] : memref<5x1xf32, #tpu.memory_space<vmem>>, vector<5x1xf32>
    %293 = vector.broadcast %292 : vector<5x1xf32> to vector<5x16xf32>
    %294 = arith.addf %291, %293 : vector<5x16xf32>
    %c0_148 = arith.constant 0 : index
    %c0_149 = arith.constant 0 : index
    %295 = vector.load %arg20[%c0_148, %c0_149] : memref<5x16xf32, #tpu.memory_space<vmem>>, vector<5x16xf32>
    tpu.vector_store %arg20[%c0_148, %c0_149], %294 {strides = array<i32>} : memref<5x16xf32, #tpu.memory_space<vmem>>, vector<5x16xf32>,
    return
  }
}

</mosaic_0001>

<bundles_post_ra>
// kernel: ast_adapter_forward.1
= control target key start
LH: loop header
LB: loop body
LE: loop exit
PB: predicated region body
PF: predicated region fallthrough
CT: control target
= control target key end

     0   :  { %vm83_vm0 = vcmask 523264   ;;  %v4971_v3 = vmov 0   ;;  %vm365_vm1 = vcmask 261120   ;;  %vm189_vm2 = vcmask 130048   ;;  %s6136_s0 = inlined_call_operand.vmem [shape: f32[64,16], index: 0, kind: input, shape index: {}]   ;;  %s6137_s1 = inlined_call_operand.vmem [shape: f32[32,64], index: 1, kind: input, shape index: {}]   ;;  %s6138_s5 = inlined_call_operand.vmem [shape: f32[2,32,1], index: 5, kind: input, shape index: {}]   ;;  %s6139_s4 = inlined_call_operand.vmem [shape: f32[2,32,1], index: 4, kind: input, shape index: {}]   ;;  %s6140_s7 = inlined_call_operand.vmem [shape: f32[2,96,1], index: 7, kind: input, shape index: {}]   ;;  %s6141_s6 = inlined_call_operand.vmem [shape: f32[2,96,32], index: 6, kind: input, shape index: {}]   ;;  %s6142_s2 = inlined_call_operand.vmem [shape: f32[32,16], index: 2, kind: input, shape index: {}]   ;;  %s6143_s3 = inlined_call_operand.vmem [shape: f32[16,16], index: 3, kind: input, shape index: {}]   ;;  %s6144_s9 = inlined_call_operand.vmem [shape: f32[2,32,1], index: 9, kind: input, shape index: {}]   ;;  %s6145_s10 = inlined_call_operand.vmem [shape: f32[2,32,1], index: 10, kind: input, shape index: {}]   ;;  %s6146_s11 = inlined_call_operand.vmem [shape: f32[2,32,1], index: 11, kind: input, shape index: {}]   ;;  %s6147_s13 = inlined_call_operand.vmem [shape: f32[2,72,1], index: 13, kind: input, shape index: {}]   ;;  %s6148_s15 = inlined_call_operand.vmem [shape: f32[2,32,1], index: 15, kind: input, shape index: {}]   ;;  %s6149_s8 = inlined_call_operand.vmem [shape: f32[2,32,32], index: 8, kind: input, shape index: {}]   ;;  %s6150_s12 = inlined_call_operand.vmem [shape: f32[2,72,32], index: 12, kind: input, shape index: {}]   ;;  %s6151_s14 = inlined_call_operand.vmem [shape: f32[2,32,72], index: 14, kind: input, shape index: {}]   ;;  %s6152_s16 = inlined_call_operand.vmem [shape: f32[32,1], index: 16, kind: input, shape index: {}]   ;;  %s6153_s17 = inlined_call_operand.vmem [shape: f32[32,1], index: 17, kind: input, shape index: {}]   ;;  %s6154_s19 = inlined_call_operand.vmem [shape: f32[5,1], index: 19, kind: input, shape index: {}]   ;;  %s6155_s18 = inlined_call_operand.vmem [shape: f32[5,32], index: 18, kind: input, shape index: {}]   ;;  %s6156_s20 = inlined_call_operand.vmem [shape: f32[5,16], index: 20, kind: output, shape index: {}]  }
   0x1   :  { %6162 = sst [smem:[#allocation2_spill]] %s6136_s0  ;;  %4858 = vset.pattern.permute.xlu1 %v4971_v3  ;;  %4857 = vset.pattern.permute.xlu0 %v4971_v3  ;;  %v281_v33 = vld [vmem:[%s6141_s6] sm:$0xff]  ;;  %v80_v34 = vld [vmem:[%s6142_s2 + $0x8] sm:$0xff]  ;;  %v82_v40 = vld [vmem:[%s6142_s2 + $0x18] sm:$0xff]  ;;  %vm559_vm3 = vcmask 64512   ;;  %vm4973_vm4 = vmmov 0  }
   0x2   :  { %6163 = sst [smem:[#allocation3_spill]] %s6137_s1  ;;  %s6167_s23 = sld [smem:[#allocation2_spill]]  ;;  %4426 = vmatprep.mubr.msk.f32.mxu1 %vm365_vm1, %v281_v33  ;;  %v79_v35 = vld [vmem:[%s6142_s2] sm:$0xff]  ;;  %v81_v41 = vld [vmem:[%s6142_s2 + $0x10] sm:$0xff]  ;;  %vm5459_vm5 = vmpackc.low %vm189_vm2, %vm189_vm2  ;;  %vm1920_vm6 = vcmask 588800   ;;  %vm4048_vm7 = vcmask 126976  }
   0x3   :  { %6164 = sst [smem:[#allocation4_spill]] %s6138_s5  ;;  %s6168_s1 = sld [smem:[#allocation3_spill]] }
   0x4   :  { %6165 = sst [smem:[#allocation5_spill]] %s6139_s4  ;;  %s6169_s5 = sld [smem:[#allocation4_spill]] }
   0x5   :  { %6166 = sst [smem:[#allocation6_spill]] %s6140_s7  ;;  %s6170_s26 = sld [smem:[#allocation5_spill]] }
   0x6   :  { %s6171_s4 = sld [smem:[#allocation6_spill]] }
   0x8   :  { %v71_v0 = vld [vmem:[%s6167_s23] sm:$0xff]  ;;  %v72_v1 = vld [vmem:[%s6167_s23 + $0x8] sm:$0xff]  ;;  %v73_v2 = vld [vmem:[%s6167_s23 + $0x10] sm:$0xff] }
   0x9   :  { %v4723_v4 = vpack.c.bf16 %v72_v1, %v71_v0  ;;  %v74_v5 = vld [vmem:[%s6167_s23 + $0x18] sm:$0xff]  ;;  %v75_v7 = vld [vmem:[%s6167_s23 + $0x20] sm:$0xff]  ;;  %v76_v8 = vld [vmem:[%s6167_s23 + $0x28] sm:$0xff] }
   0xa   :  { %v4727_v6 = vpack.c.bf16 %v74_v5, %v73_v2  ;;  %v67_v9 = vld [vmem:[%s6168_s1] sm:$0xff]  ;;  %v4731_v12 = vpack.c.bf16 %v76_v8, %v75_v7  ;;  %v77_v13 = vld [vmem:[%s6167_s23 + $0x30] sm:$0xff]  ;;  %v78_v14 = vld [vmem:[%s6167_s23 + $0x38] sm:$0xff] }
   0xb   :  { %4724 = vmatprep.subr.bf16.mxu0 %v4723_v4  ;;  %4412 = vmatprep.mubr.msk.f32.mxu0 %vm83_vm0, %v67_v9  ;;  %v185_v10 = vld [vmem:[%s6169_s5] sm:$0xff]  ;;  %v186_v15 = vld [vmem:[%s6169_s5 + $0x8] sm:$0xff]  ;;  %v4735_v17 = vpack.c.bf16 %v78_v14, %v77_v13  ;;  %v184_v18 = vld [vmem:[%s6170_s26 + $0x18] sm:$0xff] }
   0xc   :  { %4726 = vmatpush3.bf16.msra.mxu0 %v4723_v4  ;;  %v181_v11 = vld [vmem:[%s6170_s26] sm:$0xff]  ;;  %259 = vperm.xlu1 %4858, %v185_v10   ;;  %v182_v16 = vld [vmem:[%s6170_s26 + $0x8] sm:$0xff]  ;;  %v183_v19 = vld [vmem:[%s6170_s26 + $0x10] sm:$0xff] }
   0xd   :  { %4728 = vmatprep.subr.bf16.mxu0 %v4727_v6  ;;  %235 = vperm.xlu0 %4857, %v181_v11   ;;  %v188_v20 = vld [vmem:[%s6169_s5 + $0x18] sm:$0xff]  ;;  %v187_v21 = vld [vmem:[%s6169_s5 + $0x10] sm:$0xff]  ;;  %v68_v22 = vld [vmem:[%s6168_s1 + $0x8] sm:$0xff] }
   0xe   :  { %v69_v23 = vld [vmem:[%s6168_s1 + $0x10] sm:$0xff]  ;;  %v294_v24 = vld [vmem:[%s6171_s4 + $0x8] sm:$0xff]  ;;  %v293_v25 = vld [vmem:[%s6171_s4] sm:$0xff] }
   0xf   :  { %v70_v26 = vld [vmem:[%s6168_s1 + $0x18] sm:$0xff]  ;;  %v295_v28 = vld [vmem:[%s6171_s4 + $0x10] sm:$0xff]  ;;  %v298_v29 = vld [vmem:[%s6171_s4 + $0x28] sm:$0xff] }
  0x10   :  { %4730 = vmatpush3.bf16.msra.mxu0 %v4727_v6  ;;  %264 = vperm.xlu1 %4858, %v186_v15   ;;  %v296_v27 = vld [vmem:[%s6171_s4 + $0x18] sm:$0xff]  ;;  %v297_v30 = vld [vmem:[%s6171_s4 + $0x20] sm:$0xff]  ;;  %v299_v32 = vld [vmem:[%s6171_s4 + $0x30] sm:$0xff] }
  0x11   :  { %4732 = vmatprep.subr.bf16.mxu0 %v4731_v12  ;;  %240 = vperm.xlu0 %4857, %v182_v16   ;;  %v300_v31 = vld [vmem:[%s6171_s4 + $0x38] sm:$0xff] }
  0x14   :  { %4734 = vmatpush3.bf16.msra.mxu0 %v4731_v12  ;;  %250 = vperm.xlu1 %4858, %v184_v18  }
  0x15   :  { %4736 = vmatprep.subr.bf16.mxu0 %v4735_v17  ;;  %245 = vperm.xlu0 %4857, %v183_v19  }
  0x18   :  { %4738 = vmatpush3.bf16.msra.mxu0 %v4735_v17  ;;  %274 = vperm.xlu1 %4858, %v188_v20  }
  0x19   :  { %269 = vperm.xlu0 %4857, %v187_v21  }
  0x1b   :  { %4413 = vmatmul.mubr.msk.f32.vlgmr.msra.gmra.mrb[0].mxu0 %vm83_vm0, %v68_v22 }
  0x1c   :  { %4415 = vmatprep.mubr.msk.f32.mxu0 %vm83_vm0, %v69_v23  ;;  %312 = vperm.xlu1 %4858, %v294_v24  }
  0x1d   :  { %307 = vperm.xlu0 %4857, %v293_v25  }
  0x1f   :  { %4416 = vmatmul.mubr.msk.f32.gmra.mrb[2].mxu0 %vm83_vm0, %v70_v26 }
  0x20   :  { %322 = vperm.xlu1 %4858, %v296_v27  }
  0x21   :  { %317 = vperm.xlu0 %4857, %v295_v28  }
  0x24   :  { %332 = vperm.xlu1 %4858, %v298_v29  }
  0x25   :  { %327 = vperm.xlu0 %4857, %v297_v30  }
  0x28   :  { %342 = vperm.xlu1 %4858, %v300_v31  }
  0x29   :  { %337 = vperm.xlu0 %4857, %v299_v32  }
  0x8b   :  { %v260_v17 = vpop.permute.xlu1 %259 }
  0x8c   :  { %v236_v18 = vpop.permute.xlu0 %235 }
  0x8f   :  { %v265_v21 = vpop.permute.xlu1 %264 }
  0x90   :  { %v241_v22 = vpop.permute.xlu0 %240 }
  0x93   :  { %v251_v23 = vpop.permute.xlu1 %250 }
  0x94   :  { %v246_v24 = vpop.permute.xlu0 %245 }
  0xee   :  { %v4414_v36 = vpop.f32.mrb[0].mxu0 }
  0xef   :  { %v5178_v37 = vadd.f32 %v4414_v36, %v80_v34  ;;  %v162_v38 = vpop.f32.mrb[1].mxu0  ;;  %v275_v34 = vpop.permute.xlu1 %274 }
  0xf0   :  { %v5180_v39 = vadd.f32 %v162_v38, %v79_v35  ;;  %v270_v35 = vpop.permute.xlu0 %269 }
  0xf1   :  { %v191_v42 = vsel %vm189_vm2, %v5178_v37, 0.0 }
  0xf2   :  { %v190_v43 = vsel %vm189_vm2, %v5180_v39, 0.0  ;;  %v4417_v44 = vpop.f32.mrb[2].mxu0 }
  0xf3   :  { %v172_v45 = vpop.f32.mrb[3].mxu0  ;;  %v5192_v46 = vadd.f32 %v4417_v44, %v82_v40  ;;  %v192_v48 = vadd.f32 %v191_v42, %v190_v43  ;;  %v282_v44 = vld [vmem:[%s6141_s6 + $0x8] sm:$0xff] }
  0xf4   :  { %v5194_v47 = vadd.f32 %v172_v45, %v81_v41  ;;  %v283_v45 = vld [vmem:[%s6141_s6 + $0x10] sm:$0xff] }
  0xf5   :  { %v195_v51 = vsel %vm189_vm2, %v5192_v46, 0.0 }
  0xf6   :  { %v193_v49 = vsel %vm189_vm2, %v5194_v47, 0.0 }
  0xf7   :  { %v194_v50 = vadd.f32 %v193_v49, %v192_v48  ;;  %v284_v48 = vld [vmem:[%s6141_s6 + $0x18] sm:$0xff]  ;;  %v285_v49 = vld [vmem:[%s6141_s6 + $0x20] sm:$0xff] }
  0xf9   :  { %v196_v52 = vadd.f32 %v195_v51, %v194_v50  ;;  %v286_v50 = vld [vmem:[%s6141_s6 + $0x28] sm:$0xff]  ;;  %v287_v51 = vld [vmem:[%s6141_s6 + $0x30] sm:$0xff] }
  0xfb   :  { %v197_v53 = vrot.slane %v196_v52, 4 }
  0xfd   :  { %v198_v54 = vadd.f32 %v197_v53, %v196_v52  ;;  %v288_v52 = vld [vmem:[%s6141_s6 + $0x38] sm:$0xff]  ;;  %v308_v53 = vpop.permute.xlu0 %307 }
  0xff   :  { %v199_v55 = vrot.slane %v198_v54, 2 }
 0x101   :  { %v200_v56 = vadd.f32 %v199_v55, %v198_v54  ;;  %v313_v54 = vpop.permute.xlu1 %312 }
 0x103   :  { %v201_v57 = vrot.slane %v200_v56, 1 }
 0x105   :  { %v202_v58 = vadd.f32 %v201_v57, %v200_v56 }
 0x107   :  { %v204_v59 = vmul.f32 0.03125, %v202_v58 }
 0x109   :  { %v206_v60 = vsub.f32 %v5178_v37, %v204_v59  ;;  %v207_v61 = vsub.f32 %v5194_v47, %v204_v59  ;;  %v208_v62 = vsub.f32 %v5192_v46, %v204_v59  ;;  %v205_v63 = vsub.f32 %v5180_v39, %v204_v59  ;;  %v318_v59 = vpop.permute.xlu0 %317 }
 0x10b   :  { %v211_v0 = vmul.f32 %v207_v61, %v207_v61  ;;  %v209_v1 = vmul.f32 %v205_v63, %v205_v63  ;;  %v210_v2 = vmul.f32 %v206_v60, %v206_v60  ;;  %v212_v3 = vmul.f32 %v208_v62, %v208_v62 }
 0x10d   :  { %v213_v4 = vsel %vm189_vm2, %v209_v1, 0.0  ;;  %v214_v5 = vsel %vm189_vm2, %v210_v2, 0.0  ;;  %v216_v7 = vsel %vm189_vm2, %v211_v0, 0.0  ;;  %v218_v9 = vsel %vm189_vm2, %v212_v3, 0.0  ;;  %v328_v1 = vpop.permute.xlu0 %327 }
 0x10e   :  { %v215_v6 = vadd.f32 %v214_v5, %v213_v4 }
 0x110   :  { %v217_v8 = vadd.f32 %v216_v7, %v215_v6 }
 0x112   :  { %v219_v10 = vadd.f32 %v218_v9, %v217_v8  ;;  %v289_v9 = vld [vmem:[%s6141_s6 + $0x40] sm:$0xff] }
 0x114   :  { %v220_v11 = vrot.slane %v219_v10, 4 }
 0x116   :  { %v221_v12 = vadd.f32 %v220_v11, %v219_v10  ;;  %v290_v10 = vld [vmem:[%s6141_s6 + $0x48] sm:$0xff] }
 0x118   :  { %v222_v13 = vrot.slane %v221_v12, 2 }
 0x11a   :  { %v223_v14 = vadd.f32 %v222_v13, %v221_v12  ;;  %v338_v12 = vpop.permute.xlu0 %337 }
 0x11c   :  { %v224_v15 = vrot.slane %v223_v14, 1 }
 0x11e   :  { %v225_v16 = vadd.f32 %v224_v15, %v223_v14 }
 0x120   :  { %v226_v19 = vmul.f32 0.03125, %v225_v16 }
 0x122   :  { %v227_v20 = vadd.f32 1e-12, %v226_v19 }
 0x124   :  { %4859 = vrsqrt.f32 %v227_v20 }
 0x12e   :  { %v4860_v25 = vpop.eup %4859 }
 0x12f   :  { %v229_v26 = vmul.f32 %v4860_v25, %v205_v63  ;;  %v230_v27 = vmul.f32 %v4860_v25, %v206_v60  ;;  %v232_v28 = vmul.f32 %v4860_v25, %v208_v62  ;;  %v231_v29 = vmul.f32 %v4860_v25, %v207_v61  ;;  %v323_v61 = vpop.permute.xlu1 %322  ;;  %v66_v25 = vld [vmem:[%s6143_s3 + $0x8] sm:$0xff] }
 0x131   :  { %v253_v30 = vmul.f32 %v236_v18, %v229_v26  ;;  %v254_v31 = vmul.f32 %v241_v22, %v230_v27  ;;  %v256_v32 = vmul.f32 %v251_v23, %v232_v28  ;;  %v255_v33 = vmul.f32 %v246_v24, %v231_v29  ;;  %v291_v23 = vld [vmem:[%s6141_s6 + $0x50] sm:$0xff]  ;;  %v292_v24 = vld [vmem:[%s6141_s6 + $0x58] sm:$0xff]  ;;  %v65_v26 = vld [vmem:[%s6143_s3] sm:$0xff] }
 0x133   :  { %v280_v36 = vadd.f32 %v275_v34, %v256_v32  ;;  %v279_v38 = vadd.f32 %v270_v35, %v255_v33  ;;  %v277_v40 = vadd.f32 %v260_v17, %v253_v30  ;;  %v278_v41 = vadd.f32 %v265_v21, %v254_v31  ;;  %v333_v4 = vpop.permute.xlu1 %332 }
 0x135   :  { %v4739_v42 = vpack.c.bf16 %v278_v41, %v277_v40  ;;  %v4743_v43 = vpack.c.bf16 %v280_v36, %v279_v38 }
 0x137   :  { %4740 = vmatprep.subr.bf16.mxu1 %v4739_v42  ;;  %v343_v11 = vpop.permute.xlu1 %342 }
 0x138   :  { %4742 = vmatpush3.bf16.msra.mxu1 %v4739_v42 }
 0x139   :  { %4744 = vmatprep.subr.bf16.mxu1 %v4743_v43 }
 0x13c   :  { %4746 = vmatpush3.bf16.msra.mxu1 %v4743_v43 }
 0x13f   :  { %4427 = vmatmul.mubr.msk.f32.vlgmr.msra.gmra.mrb[0].mxu1 %vm365_vm1, %v282_v44 }
 0x140   :  { %4429 = vmatprep.mubr.msk.f32.mxu1 %vm365_vm1, %v283_v45 }
 0x143   :  { %4430 = vmatmul.mubr.msk.f32.gmra.mrb[2].mxu1 %vm365_vm1, %v284_v48 }
 0x144   :  { %4432 = vmatprep.mubr.msk.f32.mxu1 %vm365_vm1, %v285_v49 }
 0x147   :  { %4433 = vmatmul.mubr.msk.f32.gmra.mrb[4].mxu1 %vm365_vm1, %v286_v50 }
 0x148   :  { %4435 = vmatprep.mubr.msk.f32.mxu1 %vm365_vm1, %v287_v51 }
 0x14b   :  { %4436 = vmatmul.mubr.msk.f32.gmra.mrb[6].mxu1 %vm365_vm1, %v288_v52 }
 0x14c   :  { %4438 = vmatprep.mubr.msk.f32.mxu1 %vm365_vm1, %v289_v9 }
 0x14f   :  { %4439 = vmatmul.mubr.msk.f32.gmra.mrb[8].mxu1 %vm365_vm1, %v290_v10 }
 0x150   :  { %4441 = vmatprep.mubr.msk.f32.mxu1 %vm365_vm1, %v291_v23 }
 0x153   :  { %4442 = vmatmul.mubr.msk.f32.gmra.mrb[10].mxu1 %vm365_vm1, %v292_v24 }
 0x212   :  { %v4428_v55 = vpop.f32.mrb[0].mxu1 }
 0x213   :  { %v474_v56 = vadd.f32 %v4428_v55, %v313_v54  ;;  %v468_v57 = vpop.f32.mrb[1].mxu1  ;;  %v302_v55 = vld [vmem:[%s6171_s4 + $0x48] sm:$0xff] }
 0x214   :  { %v469_v58 = vadd.f32 %v468_v57, %v308_v53 }
 0x215   :  { %641 = vxpose.xlu1.b32.start.end [1/1] (short) (narrow) %v474_v56, 16 }
 0x216   :  { %v4431_v60 = vpop.f32.mrb[2].mxu1  ;;  %527 = vxpose.xlu0.b32.start.end [1/1] (short) (narrow) %v469_v58, 16  ;;  %v301_v58 = vld [vmem:[%s6171_s4 + $0x40] sm:$0xff] }
 0x217   :  { %v478_v62 = vpop.f32.mrb[3].mxu1  ;;  %v484_v5 = vadd.f32 %v4431_v60, %v323_v61 }
 0x218   :  { %v479_v63 = vadd.f32 %v478_v62, %v318_v59 }
 0x21a   :  { %v4434_v0 = vpop.f32.mrb[4].mxu1 }
 0x21b   :  { %v488_v2 = vpop.f32.mrb[5].mxu1  ;;  %754 = vxpose.xlu0.b32.start.end [1/1] (short) (narrow) %v479_v63, 16  ;;  %v494_v6 = vadd.f32 %v4434_v0, %v333_v4 }
 0x21c   :  { %v489_v3 = vadd.f32 %v488_v2, %v328_v1 }
 0x21e   :  { %v4437_v7 = vpop.f32.mrb[6].mxu1  ;;  %4444 = vmatprep.subr.mxu0 %v489_v3 }
 0x21f   :  { %v498_v8 = vpop.f32.mrb[7].mxu1  ;;  %4445 = vmatpush3.msra.mxu0 %v489_v3  ;;  %v504_v19 = vadd.f32 %v4437_v7, %v343_v11 }
 0x220   :  { %4449 = vmatprep.subr.mxu0 %v494_v6  ;;  %867 = vxpose.xlu0.b32.start.end [1/1] (short) (narrow) %v484_v5, 16  ;;  %v499_v16 = vadd.f32 %v498_v8, %v338_v12 }
 0x222   :  { %v5277_v56 = vpop.f32.mrb[8].mxu1 }
 0x223   :  { %v5279_v57 = vpop.f32.mrb[9].mxu1 }
 0x295   :  { %v657_v14 = vpop.trf.xlu1 }
 0x296   :  { %v543_v13 = vpop.trf.xlu0 }
 0x297   :  { %4446 = vmatprep.mubr.msk.f32.mxu0 %vm559_vm3, %v543_v13 }
 0x299   :  { %v658_v17 = vpop.trf.xlu1 }
 0x29a   :  { %v544_v15 = vpop.trf.xlu0 }
 0x29b   :  { %4447 = vmatmul.mubr.msk.f32.vlgmr.msra.gmra.mrb[4].mxu0 %vm559_vm3, %v544_v15 }
 0x29c   :  { %4450 = vmatpush3.msra.mxu0 %v494_v6  ;;  %4451 = vmatprep.mubr.msk.f32.mxu0 %vm559_vm3, %v657_v14 }
 0x29d   :  { %4454 = vmatprep.subr.mxu0 %v499_v16 }
 0x29e   :  { %v770_v18 = vpop.trf.xlu0 }
 0x29f   :  { %4452 = vmatmul.mubr.msk.f32.vlgmr.msra.gmra.mrb[6].mxu0 %vm559_vm3, %v658_v17 }
 0x2a0   :  { %4455 = vmatpush3.msra.mxu0 %v499_v16  ;;  %4456 = vmatprep.mubr.msk.f32.mxu0 %vm559_vm3, %v770_v18 }
 0x2a1   :  { %4459 = vmatprep.subr.mxu0 %v504_v19 }
 0x2a2   :  { %v771_v20 = vpop.trf.xlu0 }
 0x2a3   :  { %4457 = vmatmul.mubr.msk.f32.vlgmr.msra.gmra.mrb[8].mxu0 %vm559_vm3, %v771_v20 }
 0x2a4   :  { %4460 = vmatpush3.msra.mxu0 %v504_v19 }
 0x2a6   :  { %v883_v21 = vpop.trf.xlu0 }
 0x2a7   :  { %4461 = vmatprep.mubr.msk.f32.mxu0 %vm559_vm3, %v883_v21 }
 0x2aa   :  { %v884_v22 = vpop.trf.xlu0 }
 0x2ab   :  { %4462 = vmatmul.mubr.msk.f32.vlgmr.msra.gmra.mrb[10].mxu0 %vm559_vm3, %v884_v22 }
 0x36e   :  { %v4448_v27 = vpop.f32.mrb[4].mxu0 }
 0x36f   :  { %v638_v28 = vadd.f32 %v4448_v27, %v66_v25  ;;  %v632_v29 = vpop.f32.mrb[5].mxu0 }
 0x370   :  { %v633_v30 = vadd.f32 %v632_v29, %v65_v26 }
 0x371   :  { %v983_v31 = vsel %vm189_vm2, %v638_v28, -inf }
 0x372   :  { %984 = vmax.xlane.f32.xlu1 %v983_v31  ;;  %v4453_v32 = vpop.f32.mrb[6].mxu0  ;;  %v980_v33 = vsel %vm189_vm2, %v633_v30, -inf }
 0x373   :  { %v751_v34 = vadd.f32 %v4453_v32, %v66_v25  ;;  %v745_v35 = vpop.f32.mrb[7].mxu0  ;;  %981 = vmax.xlane.f32.xlu0 %v980_v33 }
 0x374   :  { %v746_v36 = vadd.f32 %v745_v35, %v65_v26  ;;  %v303_v35 = vld [vmem:[%s6171_s4 + $0x50] sm:$0xff] }
 0x375   :  { %v989_v38 = vsel %vm189_vm2, %v751_v34, -inf }
 0x376   :  { %990 = vmax.xlane.f32.xlu1 %v989_v38  ;;  %v4458_v40 = vpop.f32.mrb[8].mxu0  ;;  %v986_v44 = vsel %vm189_vm2, %v746_v36, -inf  ;;  %v5321_v38 = vpop.f32.mrb[10].mxu1 }
 0x377   :  { %v858_v41 = vpop.f32.mrb[9].mxu0  ;;  %v864_v43 = vadd.f32 %v4458_v40, %v66_v25  ;;  %v1388_v40 = vld [vmem:[%s6144_s9] sm:$0xff] }
 0x378   :  { %v859_v42 = vadd.f32 %v858_v41, %v65_v26  ;;  %v5326_v41 = vpop.f32.mrb[11].mxu1 }
 0x379   :  { %v995_v48 = vsel %vm189_vm2, %v864_v43, -inf }
 0x37a   :  { %987 = vmax.xlane.f32.xlu1 %v986_v44  ;;  %v992_v45 = vsel %vm189_vm2, %v859_v42, -inf  ;;  %v1390_v44 = vld [vmem:[%s6144_s9 + $0x10] sm:$0xff] }
 0x37b   :  { %993 = vmax.xlane.f32.xlu0 %v992_v45  ;;  %v1389_v45 = vld [vmem:[%s6144_s9 + $0x8] sm:$0xff] }
 0x37e   :  { %996 = vmax.xlane.f32.xlu1 %v995_v48  ;;  %v4463_v49 = vpop.f32.mrb[10].mxu0  ;;  %v1513_v48 = vld [vmem:[%s6145_s10] sm:$0xff] }
 0x37f   :  { %v977_v50 = vadd.f32 %v4463_v49, %v66_v25  ;;  %v971_v51 = vpop.f32.mrb[11].mxu0  ;;  %v1391_v49 = vld [vmem:[%s6144_s9 + $0x18] sm:$0xff] }
 0x380   :  { %v972_v52 = vadd.f32 %v971_v51, %v65_v26  ;;  %v1514_v51 = vld [vmem:[%s6145_s10 + $0x8] sm:$0xff] }
 0x381   :  { %v1001_v53 = vsel %vm189_vm2, %v977_v50, -inf }
 0x382   :  { %1002 = vmax.xlane.f32.xlu1 %v1001_v53  ;;  %v998_v54 = vsel %vm189_vm2, %v972_v52, -inf  ;;  %v1518_v53 = vld [vmem:[%s6146_s11 + $0x8] sm:$0xff] }
 0x383   :  { %999 = vmax.xlane.f32.xlu0 %v998_v54  ;;  %v1519_v54 = vld [vmem:[%s6146_s11 + $0x10] sm:$0xff] }
 0x393   :  { %352 = vperm.xlu1 %4858, %v302_v55   ;;  %v1516_v55 = vld [vmem:[%s6145_s10 + $0x18] sm:$0xff] }
 0x399   :  { %347 = vperm.xlu0 %4857, %v301_v58   ;;  %v1620_v58 = vld [vmem:[%s6147_s13] sm:$0xff] }
 0x3ff   :  { %v985_v59 = vpop.xlane.xlu1 %984 }
 0x400   :  { %v1005_v60 = vsub.f32 %v638_v28, %v985_v59  ;;  %v982_v61 = vpop.xlane.xlu0 %981  ;;  %v1520_v59 = vld [vmem:[%s6146_s11 + $0x18] sm:$0xff] }
 0x401   :  { %v1004_v62 = vsub.f32 %v633_v30, %v982_v61  ;;  %v1621_v61 = vld [vmem:[%s6147_s13 + $0x8] sm:$0xff] }
 0x402   :  { %v1014_v63 = vmul.f32 1.442695, %v1005_v60  ;;  %v1622_v60 = vld [vmem:[%s6147_s13 + $0x10] sm:$0xff] }
 0x403   :  { %v1012_v0 = vmul.f32 1.442695, %v1004_v62  ;;  %v991_v1 = vpop.xlane.xlu1 %990  ;;  %v1624_v62 = vld [vmem:[%s6147_s13 + $0x20] sm:$0xff] }
 0x404   :  { %4861 = vpow2.f32 %v1014_v63  ;;  %v1007_v2 = vsub.f32 %v751_v34, %v991_v1  ;;  %v1623_v63 = vld [vmem:[%s6147_s13 + $0x18] sm:$0xff]  ;;  %v1625_v1 = vld [vmem:[%s6147_s13 + $0x28] sm:$0xff] }
 0x405   :  { %4863 = vpow2.f32 %v1012_v0  ;;  %v1626_v0 = vld [vmem:[%s6147_s13 + $0x30] sm:$0xff] }
 0x406   :  { %v1018_v3 = vmul.f32 1.442695, %v1007_v2  ;;  %v1628_v2 = vld [vmem:[%s6147_s13 + $0x40] sm:$0xff] }
 0x407   :  { %v988_v4 = vpop.xlane.xlu1 %987 }
 0x408   :  { %4865 = vpow2.f32 %v1018_v3  ;;  %v1006_v5 = vsub.f32 %v746_v36, %v988_v4  ;;  %v994_v6 = vpop.xlane.xlu0 %993  ;;  %v4972_v36 = vmov 0.0|0.0   ;;  %v1627_v3 = vld [vmem:[%s6147_s13 + $0x38] sm:$0xff]  ;;  %v1897_v4 = vld [vmem:[%s6148_s15 + $0x8] sm:$0xff] }
 0x409   :  { %v1008_v7 = vsub.f32 %v859_v42, %v994_v6  ;;  %4747 = vmatprep.subr.bf16.mxu0 %v4972_v36  ;;  %4751 = vmatprep.subr.bf16.mxu1 %v4972_v36  ;;  %v304_v42 = vld [vmem:[%s6171_s4 + $0x58] sm:$0xff] }
 0x40a   :  { %v1016_v8 = vmul.f32 1.442695, %v1006_v5  ;;  %v1896_v5 = vld [vmem:[%s6148_s15] sm:$0xff]  ;;  %v1899_v6 = vld [vmem:[%s6148_s15 + $0x18] sm:$0xff] }
 0x40b   :  { %v1020_v9 = vmul.f32 1.442695, %v1008_v7  ;;  %v997_v10 = vpop.xlane.xlu1 %996  ;;  %v1898_v7 = vld [vmem:[%s6148_s15 + $0x10] sm:$0xff] }
 0x40c   :  { %4867 = vpow2.f32 %v1016_v8  ;;  %v1009_v11 = vsub.f32 %v864_v43, %v997_v10  ;;  %v4974_v43 = vmov 0.0   ;;  %v4108_v8 = vld [vmem:[%s6170_s26 + $0x28] sm:$0xff] }
 0x40d   :  { %4869 = vpow2.f32 %v1020_v9  ;;  %4468 = vmatprep.mubr.msk.f32.mxu0 %vm4973_vm4, %v4974_v43  ;;  %4475 = vmatprep.mubr.msk.f32.mxu1 %vm4973_vm4, %v4974_v43  ;;  %v4107_v9 = vld [vmem:[%s6170_s26 + $0x20] sm:$0xff]  ;;  %v4112_v10 = vld [vmem:[%s6169_s5 + $0x28] sm:$0xff] }
 0x40e   :  { %v5284_v12 = vpop.eup %4861  ;;  %v1022_v13 = vmul.f32 1.442695, %v1009_v11  ;;  %v4111_v11 = vld [vmem:[%s6169_s5 + $0x20] sm:$0xff] }
 0x40f   :  { %v5286_v14 = vpop.eup %4863  ;;  %v1003_v15 = vpop.xlane.xlu1 %1002  ;;  %v1031_v16 = vsel %vm189_vm2, %v5284_v12, 0.0 }
 0x410   :  { %4871 = vpow2.f32 %v1022_v13  ;;  %v1011_v17 = vsub.f32 %v977_v50, %v1003_v15  ;;  %1032 = vadd.xlane.f32.xlu1 %v1031_v16  ;;  %v1000_v18 = vpop.xlane.xlu0 %999  ;;  %v1028_v19 = vsel %vm189_vm2, %v5286_v14, 0.0  ;;  %v1517_v50 = vld [vmem:[%s6146_s11] sm:$0xff]  ;;  %v4110_v13 = vld [vmem:[%s6170_s26 + $0x38] sm:$0xff]  ;;  %v4109_v15 = vld [vmem:[%s6170_s26 + $0x30] sm:$0xff] }
 0x411   :  { %v1010_v20 = vsub.f32 %v972_v52, %v1000_v18  ;;  %1029 = vadd.xlane.f32.xlu0 %v1028_v19  ;;  %v1515_v52 = vld [vmem:[%s6145_s10 + $0x10] sm:$0xff]  ;;  %v4114_v16 = vld [vmem:[%s6169_s5 + $0x38] sm:$0xff]  ;;  %v4128_v18 = vld [vmem:[%s6171_s4 + $0x68] sm:$0xff] }
 0x412   :  { %v5292_v21 = vpop.eup %4865  ;;  %v1026_v22 = vmul.f32 1.442695, %v1011_v17  ;;  %v4113_v17 = vld [vmem:[%s6169_s5 + $0x30] sm:$0xff]  ;;  %v4127_v19 = vld [vmem:[%s6171_s4 + $0x60] sm:$0xff] }
 0x413   :  { %v1024_v23 = vmul.f32 1.442695, %v1010_v20  ;;  %v1037_v24 = vsel %vm189_vm2, %v5292_v21, 0.0  ;;  %v4130_v20 = vld [vmem:[%s6171_s4 + $0x78] sm:$0xff] }
 0x414   :  { %4873 = vpow2.f32 %v1026_v22  ;;  %1038 = vadd.xlane.f32.xlu1 %v1037_v24  ;;  %v4129_v22 = vld [vmem:[%s6171_s4 + $0x70] sm:$0xff]  ;;  %v4131_v24 = vld [vmem:[%s6171_s4 + $0x80] sm:$0xff] }
 0x415   :  { %4875 = vpow2.f32 %v1024_v23  ;;  %v4132_v23 = vld [vmem:[%s6171_s4 + $0x88] sm:$0xff] }
 0x416   :  { %v5296_v25 = vpop.eup %4867 }
 0x417   :  { %v1034_v26 = vsel %vm189_vm2, %v5296_v25, 0.0  ;;  %v5300_v27 = vpop.eup %4869 }
 0x418   :  { %1035 = vadd.xlane.f32.xlu0 %v1034_v26  ;;  %v1040_v30 = vsel %vm189_vm2, %v5300_v27, 0.0  ;;  %v4134_v26 = vld [vmem:[%s6171_s4 + $0x98] sm:$0xff] }
 0x41a   :  { %v5302_v28 = vpop.eup %4871 }
 0x41b   :  { %v1043_v29 = vsel %vm189_vm2, %v5302_v28, 0.0 }
 0x41c   :  { %1044 = vadd.xlane.f32.xlu1 %v1043_v29  ;;  %1041 = vadd.xlane.f32.xlu0 %v1040_v30  ;;  %v4133_v29 = vld [vmem:[%s6171_s4 + $0x90] sm:$0xff]  ;;  %v353_v30 = vpop.permute.xlu1 %352 }
 0x41e   :  { %v5308_v31 = vpop.eup %4873 }
 0x41f   :  { %v5310_v32 = vpop.eup %4875  ;;  %v1049_v33 = vsel %vm189_vm2, %v5308_v31, 0.0 }
 0x420   :  { %1050 = vadd.xlane.f32.xlu1 %v1049_v33  ;;  %v1046_v34 = vsel %vm189_vm2, %v5310_v32, 0.0  ;;  %v348_v33 = vpop.permute.xlu0 %347 }
 0x421   :  { %1047 = vadd.xlane.f32.xlu0 %v1046_v34 }
 0x431   :  { %357 = vperm.xlu1 %4858, %v303_v35  }
 0x435   :  { %1394 = vperm.xlu1 %4858, %v1388_v40  }
 0x437   :  { %362 = vperm.xlu0 %4857, %v304_v42  }
 0x439   :  { %1404 = vperm.xlu1 %4858, %v1390_v44  }
 0x43b   :  { %1399 = vperm.xlu0 %4857, %v1389_v45  }
 0x43d   :  { %1565 = vperm.xlu1 %4858, %v1513_v48  }
 0x43f   :  { %1409 = vperm.xlu0 %4857, %v1391_v49  }
 0x441   :  { %1589 = vperm.xlu1 %4858, %v1517_v50  }
 0x443   :  { %1570 = vperm.xlu0 %4857, %v1514_v51  }
 0x445   :  { %1575 = vperm.xlu1 %4858, %v1515_v52  }
 0x447   :  { %1594 = vperm.xlu0 %4857, %v1518_v53  }
 0x449   :  { %1599 = vperm.xlu1 %4858, %v1519_v54  }
 0x44b   :  { %1580 = vperm.xlu0 %4857, %v1516_v55  }
 0x44d   :  { %1631 = vperm.xlu1 %4858, %v1620_v58  }
 0x44f   :  { %1604 = vperm.xlu0 %4857, %v1520_v59  }
 0x451   :  { %1641 = vperm.xlu1 %4858, %v1622_v60   ;;  %v509_v60 = vadd.f32 %v5279_v57, %v348_v33 }
 0x453   :  { %1636 = vperm.xlu0 %4857, %v1621_v61  }
 0x455   :  { %1651 = vperm.xlu1 %4858, %v1624_v62  }
 0x457   :  { %1646 = vperm.xlu0 %4857, %v1623_v63  }
 0x459   :  { %1661 = vperm.xlu1 %4858, %v1626_v0  }
 0x45b   :  { %1656 = vperm.xlu0 %4857, %v1625_v1  }
 0x45d   :  { %1671 = vperm.xlu1 %4858, %v1628_v2  }
 0x45f   :  { %1666 = vperm.xlu0 %4857, %v1627_v3   ;;  %v514_v3 = vadd.f32 %v5277_v56, %v353_v30 }
 0x461   :  { %1907 = vperm.xlu1 %4858, %v1897_v4  }
 0x463   :  { %1902 = vperm.xlu0 %4857, %v1896_v5  }
 0x465   :  { %1917 = vperm.xlu1 %4858, %v1899_v6  }
 0x467   :  { %1912 = vperm.xlu0 %4857, %v1898_v7  }
 0x469   :  { %2081 = vperm.xlu1 %4858, %v4108_v8  }
 0x46b   :  { %2076 = vperm.xlu0 %4857, %v4107_v9  }
 0x46d   :  { %2105 = vperm.xlu1 %4858, %v4112_v10  }
 0x46f   :  { %2100 = vperm.xlu0 %4857, %v4111_v11  }
 0x471   :  { %2091 = vperm.xlu1 %4858, %v4110_v13  }
 0x473   :  { %2086 = vperm.xlu0 %4857, %v4109_v15  }
 0x475   :  { %2115 = vperm.xlu1 %4858, %v4114_v16   ;;  %v1385_v16 = vld [vmem:[%s6149_s8 + $0x8] sm:$0xff] }
 0x477   :  { %2110 = vperm.xlu0 %4857, %v4113_v17   ;;  %v1386_v17 = vld [vmem:[%s6149_s8 + $0x10] sm:$0xff] }
 0x479   :  { %2155 = vperm.xlu1 %4858, %v4128_v18   ;;  %v1387_v18 = vld [vmem:[%s6149_s8 + $0x18] sm:$0xff] }
 0x47b   :  { %2150 = vperm.xlu0 %4857, %v4127_v19  }
 0x47d   :  { %2165 = vperm.xlu1 %4858, %v4130_v20  }
 0x47f   :  { %2160 = vperm.xlu0 %4857, %v4129_v22  }
 0x481   :  { %2175 = vperm.xlu1 %4858, %v4132_v23  }
 0x483   :  { %2170 = vperm.xlu0 %4857, %v4131_v24  }
 0x485   :  { %2185 = vperm.xlu1 %4858, %v4134_v26  }
 0x487   :  { %2180 = vperm.xlu0 %4857, %v4133_v29  }
 0x49d   :  { %v1033_v34 = vpop.xlane.xlu1 %1032 }
 0x49e   :  { %4877 = vrcp.f32 %v1033_v34  ;;  %v1030_v35 = vpop.xlane.xlu0 %1029 }
 0x49f   :  { %4879 = vrcp.f32 %v1030_v35 }
 0x4a1   :  { %v1039_v40 = vpop.xlane.xlu1 %1038 }
 0x4a2   :  { %4881 = vrcp.f32 %v1039_v40 }
 0x4a5   :  { %v1036_v42 = vpop.xlane.xlu0 %1035 }
 0x4a6   :  { %4883 = vrcp.f32 %v1036_v42 }
 0x4a8   :  { %v4878_v44 = vpop.eup %4877 }
 0x4a9   :  { %v4880_v45 = vpop.eup %4879  ;;  %v1061_v48 = vmul.f32 %v4878_v44, %v5284_v12  ;;  %v1045_v49 = vpop.xlane.xlu1 %1044 }
 0x4aa   :  { %v1042_v50 = vpop.xlane.xlu0 %1041  ;;  %v1060_v51 = vmul.f32 %v4880_v45, %v5286_v14  ;;  %4885 = vrcp.f32 %v1045_v49 }
 0x4ab   :  { %4887 = vrcp.f32 %v1042_v50 }
 0x4ac   :  { %v4748_v53 = vpack.c.bf16 %v1061_v48, %v1060_v51  ;;  %v4882_v55 = vpop.eup %4881 }
 0x4ad   :  { %v1051_v54 = vpop.xlane.xlu1 %1050  ;;  %v1063_v58 = vmul.f32 %v4882_v55, %v5292_v21 }
 0x4ae   :  { %4889 = vrcp.f32 %v1051_v54  ;;  %4750 = vmatpush3.bf16.xpose.msk.msra.mxu0 %vm5459_vm5, %v4748_v53  ;;  %v1048_v12 = vpop.xlane.xlu0 %1047 }
 0x4af   :  { %4891 = vrcp.f32 %v1048_v12  ;;  %4755 = vmatprep.subr.bf16.mxu0 %v4972_v36 }
 0x4b0   :  { %v4884_v14 = vpop.eup %4883 }
 0x4b1   :  { %v1062_v59 = vmul.f32 %v4884_v14, %v5296_v25  ;;  %v358_v4 = vpop.permute.xlu1 %357 }
 0x4b2   :  { %v519_v5 = vadd.f32 %v5326_v41, %v358_v4 }
 0x4b3   :  { %v4752_v61 = vpack.c.bf16 %v1063_v58, %v1062_v59 }
 0x4b4   :  { %v4886_v62 = vpop.eup %4885 }
 0x4b5   :  { %v4888_v63 = vpop.eup %4887  ;;  %v1065_v0 = vmul.f32 %v4886_v62, %v5302_v28  ;;  %4469 = vmatmul.mubr.msk.f32.vlgmr.msra.gmra.mrb[12].mxu0 %vm189_vm2, %v509_v60  ;;  %4754 = vmatpush3.bf16.xpose.msk.msra.mxu1 %vm5459_vm5, %v4752_v61  ;;  %v1395_v20 = vpop.permute.xlu1 %1394 }
 0x4b6   :  { %v1064_v1 = vmul.f32 %v4888_v63, %v5300_v27  ;;  %4759 = vmatprep.subr.bf16.mxu1 %v4972_v36  ;;  %4482 = vmatprep.mubr.msk.f32.mxu0 %vm4973_vm4, %v4974_v43  ;;  %v363_v56 = vpop.permute.xlu0 %362 }
 0x4b8   :  { %v4890_v21 = vpop.eup %4889  ;;  %v4756_v25 = vpack.c.bf16 %v1065_v0, %v1064_v1 }
 0x4b9   :  { %v4892_v57 = vpop.eup %4891  ;;  %v1067_v2 = vmul.f32 %v4890_v21, %v5308_v31  ;;  %v524_v31 = vadd.f32 %v5321_v38, %v363_v56  ;;  %v1405_v35 = vpop.permute.xlu1 %1404 }
 0x4ba   :  { %v1066_v28 = vmul.f32 %v4892_v57, %v5310_v32  ;;  %4758 = vmatpush3.bf16.xpose.msk.msra.mxu0 %vm5459_vm5, %v4756_v25  ;;  %v1384_v32 = vld [vmem:[%s6149_s8] sm:$0xff]  ;;  %v1400_v19 = vpop.permute.xlu0 %1399 }
 0x4bc   :  { %4476 = vmatmul.mubr.msk.f32.vlgmr.msra.gmra.mrb[12].mxu1 %vm189_vm2, %v514_v3  ;;  %v4760_v27 = vpack.c.bf16 %v1067_v2, %v1066_v28 }
 0x4bd   :  { %4489 = vmatprep.mubr.msk.f32.mxu1 %vm4973_vm4, %v4974_v43 }
 0x4be   :  { %4762 = vmatpush3.bf16.xpose.msk.msra.mxu1 %vm5459_vm5, %v4760_v27  ;;  %v1410_v30 = vpop.permute.xlu0 %1409 }
 0x4bf   :  { %4771 = vmatprep.subr.bf16.mxu1 %v4972_v36 }
 0x4c1   :  { %4483 = vmatmul.mubr.msk.f32.vlgmr.msra.gmra.mrb[14].mxu0 %vm189_vm2, %v519_v5 }
 0x4c2   :  { %4500 = vmatprep.mubr.msk.f32.mxu0 %vm365_vm1, %v1384_v32 }
 0x4c5   :  { %4490 = vmatmul.mubr.msk.f32.vlgmr.msra.gmra.mrb[14].mxu1 %vm189_vm2, %v524_v31 }
 0x4c6   :  { %4514 = vmatprep.mubr.msk.f32.mxu1 %vm4973_vm4, %v4974_v43 }
 0x588   :  { %v1143_v6 = vpop.f32.mrb[12].mxu0 }
 0x589   :  { %v4470_v41 = vpop.f32.mrb[13].mxu0 }
 0x58f   :  { %v1222_v7 = vpop.f32.mrb[12].mxu1 }
 0x590   :  { %v4763_v8 = vpack.c.bf16 %v1222_v7, %v1143_v6  ;;  %v4477_v9 = vpop.f32.mrb[13].mxu1 }
 0x591   :  { %v1566_v9 = vpop.permute.xlu1 %1565 }
 0x592   :  { %4764 = vmatprep.subr.bf16.mxu0 %v4763_v8 }
 0x593   :  { %4766 = vmatpush3.bf16.msra.mxu0 %v4763_v8 }
 0x594   :  { %v1301_v10 = vpop.f32.mrb[14].mxu0 }
 0x595   :  { %v4484_v38 = vpop.f32.mrb[15].mxu0 }
 0x598   :  { %v1380_v11 = vpop.f32.mrb[14].mxu1 }
 0x599   :  { %v4767_v13 = vpack.c.bf16 %v1380_v11, %v1301_v10  ;;  %v4491_v15 = vpop.f32.mrb[15].mxu1  ;;  %v1571_v10 = vpop.permute.xlu0 %1570 }
 0x59a   :  { %v1590_v11 = vpop.permute.xlu1 %1589 }
 0x59b   :  { %4768 = vmatprep.subr.bf16.mxu0 %v4767_v13 }
 0x59c   :  { %4770 = vmatpush3.bf16.msra.mxu0 %v4767_v13 }
 0x59d   :  { %v1595_v13 = vpop.permute.xlu0 %1594 }
 0x59f   :  { %4501 = vmatmul.mubr.msk.f32.vlgmr.msra.gmra.mrb[16].mxu0 %vm365_vm1, %v1385_v16  ;;  %v1576_v16 = vpop.permute.xlu1 %1575 }
 0x5a0   :  { %4503 = vmatprep.mubr.msk.f32.mxu0 %vm365_vm1, %v1386_v17 }
 0x5a1   :  { %v1581_v17 = vpop.permute.xlu0 %1580 }
 0x5a3   :  { %4504 = vmatmul.mubr.msk.f32.gmra.mrb[18].mxu0 %vm365_vm1, %v1387_v18 }
 0x672   :  { %v4502_v22 = vpop.f32.mrb[16].mxu0 }
 0x673   :  { %v1496_v23 = vadd.f32 %v4502_v22, %v1400_v19  ;;  %v1490_v24 = vpop.f32.mrb[17].mxu0 }
 0x674   :  { %v1491_v26 = vadd.f32 %v1490_v24, %v1395_v20 }
 0x675   :  { %v5511_v29 = vadd.f32 %v1496_v23, %v5178_v37 }
 0x676   :  { %v5514_v33 = vadd.f32 %v1491_v26, %v5180_v39  ;;  %v4505_v34 = vpop.f32.mrb[18].mxu0 }
 0x677   :  { %v1506_v40 = vadd.f32 %v4505_v34, %v1410_v30  ;;  %v1500_v42 = vpop.f32.mrb[19].mxu0  ;;  %v1522_v44 = vsel %vm189_vm2, %v5511_v29, 0.0 }
 0x678   :  { %v1521_v45 = vsel %vm189_vm2, %v5514_v33, 0.0  ;;  %v1501_v48 = vadd.f32 %v1500_v42, %v1405_v35  ;;  %v1605_v42 = vpop.permute.xlu0 %1604 }
 0x679   :  { %v5521_v49 = vadd.f32 %v1506_v40, %v5192_v46  ;;  %v1523_v50 = vadd.f32 %v1522_v44, %v1521_v45  ;;  %v1600_v40 = vpop.permute.xlu1 %1599 }
 0x67a   :  { %v5524_v37 = vadd.f32 %v1501_v48, %v5194_v47 }
 0x67b   :  { %v1526_v53 = vsel %vm189_vm2, %v5521_v49, 0.0 }
 0x67c   :  { %v1524_v39 = vsel %vm189_vm2, %v5524_v37, 0.0 }
 0x67d   :  { %v1525_v51 = vadd.f32 %v1524_v39, %v1523_v50  ;;  %v1611_v39 = vld [vmem:[%s6150_s12] sm:$0xff] }
 0x67f   :  { %v1527_v54 = vadd.f32 %v1526_v53, %v1525_v51  ;;  %v1612_v51 = vld [vmem:[%s6150_s12 + $0x8] sm:$0xff]  ;;  %v1613_v53 = vld [vmem:[%s6150_s12 + $0x10] sm:$0xff] }
 0x681   :  { %v1528_v55 = vrot.slane %v1527_v54, 4 }
 0x683   :  { %v1529_v12 = vadd.f32 %v1528_v55, %v1527_v54  ;;  %v1614_v54 = vld [vmem:[%s6150_s12 + $0x18] sm:$0xff]  ;;  %v1615_v55 = vld [vmem:[%s6150_s12 + $0x20] sm:$0xff] }
 0x685   :  { %v1530_v14 = vrot.slane %v1529_v12, 2 }
 0x687   :  { %v1531_v58 = vadd.f32 %v1530_v14, %v1529_v12  ;;  %v1616_v12 = vld [vmem:[%s6150_s12 + $0x28] sm:$0xff]  ;;  %v1617_v14 = vld [vmem:[%s6150_s12 + $0x30] sm:$0xff] }
 0x689   :  { %v1532_v59 = vrot.slane %v1531_v58, 1 }
 0x68b   :  { %v1533_v60 = vadd.f32 %v1532_v59, %v1531_v58  ;;  %v1618_v58 = vld [vmem:[%s6150_s12 + $0x38] sm:$0xff]  ;;  %v1619_v59 = vld [vmem:[%s6150_s12 + $0x40] sm:$0xff] }
 0x68d   :  { %v1534_v46 = vmul.f32 0.03125, %v1533_v60  ;;  %v1892_v60 = vld [vmem:[%s6151_s14] sm:$0xff] }
 0x68e   :  { %4559 = vmatprep.mubr.msk.f32.mxu0 %vm1920_vm6, %v1892_v60 }
 0x68f   :  { %v1535_v61 = vsub.f32 %v5514_v33, %v1534_v46  ;;  %v1536_v47 = vsub.f32 %v5511_v29, %v1534_v46  ;;  %v1537_v62 = vsub.f32 %v5524_v37, %v1534_v46  ;;  %v1538_v63 = vsub.f32 %v5521_v49, %v1534_v46  ;;  %v1632_v46 = vpop.permute.xlu1 %1631 }
 0x691   :  { %v1539_v0 = vmul.f32 %v1535_v61, %v1535_v61  ;;  %v1540_v1 = vmul.f32 %v1536_v47, %v1536_v47  ;;  %v1541_v21 = vmul.f32 %v1537_v62, %v1537_v62  ;;  %v1542_v25 = vmul.f32 %v1538_v63, %v1538_v63 }
 0x693   :  { %v1543_v57 = vsel %vm189_vm2, %v1539_v0, 0.0  ;;  %v1544_v2 = vsel %vm189_vm2, %v1540_v1, 0.0  ;;  %v1546_v28 = vsel %vm189_vm2, %v1541_v21, 0.0  ;;  %v1548_v27 = vsel %vm189_vm2, %v1542_v25, 0.0  ;;  %v1637_v0 = vpop.permute.xlu0 %1636 }
 0x694   :  { %v1545_v3 = vadd.f32 %v1544_v2, %v1543_v57 }
 0x696   :  { %v1547_v4 = vadd.f32 %v1546_v28, %v1545_v3  ;;  %v1642_v28 = vpop.permute.xlu1 %1641 }
 0x698   :  { %v1549_v5 = vadd.f32 %v1548_v27, %v1547_v4 }
 0x69a   :  { %v1550_v56 = vrot.slane %v1549_v5, 4 }
 0x69c   :  { %v1551_v31 = vadd.f32 %v1550_v56, %v1549_v5 }
 0x69e   :  { %v1552_v32 = vrot.slane %v1551_v31, 2 }
 0x6a0   :  { %v1553_v6 = vadd.f32 %v1552_v32, %v1551_v31 }
 0x6a2   :  { %v1554_v41 = vrot.slane %v1553_v6, 1 }
 0x6a4   :  { %v1555_v7 = vadd.f32 %v1554_v41, %v1553_v6 }
 0x6a6   :  { %v1556_v8 = vmul.f32 0.03125, %v1555_v7  ;;  %v1647_v7 = vpop.permute.xlu0 %1646 }
 0x6a8   :  { %v1557_v38 = vadd.f32 1e-12, %v1556_v8 }
 0x6aa   :  { %4893 = vrsqrt.f32 %v1557_v38 }
 0x6b4   :  { %v4894_v15 = vpop.eup %4893 }
 0x6b5   :  { %v1561_v18 = vmul.f32 %v4894_v15, %v1537_v62  ;;  %v1559_v19 = vmul.f32 %v4894_v15, %v1535_v61  ;;  %v1560_v20 = vmul.f32 %v4894_v15, %v1536_v47  ;;  %v1562_v22 = vmul.f32 %v4894_v15, %v1538_v63 }
 0x6b7   :  { %v1585_v23 = vmul.f32 %v1576_v16, %v1561_v18  ;;  %v1583_v24 = vmul.f32 %v1566_v9, %v1559_v19  ;;  %v1584_v26 = vmul.f32 %v1571_v10, %v1560_v20  ;;  %v1586_v30 = vmul.f32 %v1581_v17, %v1562_v22  ;;  %v1652_v17 = vpop.permute.xlu1 %1651 }
 0x6b9   :  { %v1607_v34 = vadd.f32 %v1590_v11, %v1583_v24  ;;  %v1608_v35 = vadd.f32 %v1595_v13, %v1584_v26  ;;  %v1609_v45 = vadd.f32 %v1600_v40, %v1585_v23  ;;  %v1610_v48 = vadd.f32 %v1605_v42, %v1586_v30 }
 0x6bb   :  { %v4772_v44 = vpack.c.bf16 %v1608_v35, %v1607_v34  ;;  %v4775_v50 = vpack.c.bf16 %v1610_v48, %v1609_v45  ;;  %v1657_v34 = vpop.permute.xlu0 %1656 }
 0x6bd   :  { %4773 = vmatpush3.bf16.msra.mxu1 %v4772_v44 }
 0x6be   :  { %4774 = vmatprep.subr.bf16.mxu1 %v4972_v36 }
 0x6c1   :  { %4776 = vmatpush3.bf16.msra.mxu1 %v4775_v50 }
 0x6c4   :  { %4515 = vmatmul.mubr.msk.f32.vlgmr.msra.gmra.mrb[16].mxu1 %vm365_vm1, %v1611_v39 }
 0x6c5   :  { %4517 = vmatprep.mubr.msk.f32.mxu1 %vm4973_vm4, %v4974_v43 }
 0x6c8   :  { %4518 = vmatmul.mubr.msk.f32.gmra.mrb[18].mxu1 %vm365_vm1, %v1612_v51 }
 0x6c9   :  { %4520 = vmatprep.mubr.msk.f32.mxu1 %vm4973_vm4, %v4974_v43 }
 0x6cc   :  { %4521 = vmatmul.mubr.msk.f32.gmra.mrb[20].mxu1 %vm365_vm1, %v1613_v53  ;;  %v1662_v53 = vpop.permute.xlu1 %1661 }
 0x6cd   :  { %4523 = vmatprep.mubr.msk.f32.mxu1 %vm4973_vm4, %v4974_v43 }
 0x6d0   :  { %4524 = vmatmul.mubr.msk.f32.gmra.mrb[22].mxu1 %vm365_vm1, %v1614_v54 }
 0x6d1   :  { %4526 = vmatprep.mubr.msk.f32.mxu1 %vm4973_vm4, %v4974_v43 }
 0x6d4   :  { %4527 = vmatmul.mubr.msk.f32.gmra.mrb[24].mxu1 %vm365_vm1, %v1615_v55 }
 0x6d5   :  { %4529 = vmatprep.mubr.msk.f32.mxu1 %vm4973_vm4, %v4974_v43 }
 0x6d8   :  { %4530 = vmatmul.mubr.msk.f32.gmra.mrb[26].mxu1 %vm365_vm1, %v1616_v12 }
 0x6d9   :  { %4532 = vmatprep.mubr.msk.f32.mxu1 %vm4973_vm4, %v4974_v43 }
 0x6dc   :  { %4533 = vmatmul.mubr.msk.f32.gmra.mrb[28].mxu1 %vm365_vm1, %v1617_v14 }
 0x6dd   :  { %4535 = vmatprep.mubr.msk.f32.mxu1 %vm4973_vm4, %v4974_v43 }
 0x6e0   :  { %4536 = vmatmul.mubr.msk.f32.gmra.mrb[30].mxu1 %vm365_vm1, %v1618_v58 }
 0x6e1   :  { %4538 = vmatprep.mubr.msk.f32.mxu1 %vm4973_vm4, %v4974_v43 }
 0x6e4   :  { %4539 = vmatmul.mubr.msk.f32.gmra.mrb[32].mxu1 %vm365_vm1, %v1619_v59 }
 0x797   :  { %v1767_v61 = vpop.f32.mrb[16].mxu1 }
 0x798   :  { %v5595_v47 = vadd.f32 %v1767_v61, %v1632_v46  ;;  %v4516_v62 = vpop.f32.mrb[17].mxu1 }
 0x79a   :  { %v1811_v63 = vmul.f32 %v5595_v47, %v5595_v47 }
 0x79b   :  { %v1772_v1 = vpop.f32.mrb[18].mxu1 }
 0x79c   :  { %v1820_v21 = vmul.f32 %v1811_v63, %v5595_v47  ;;  %v5600_v25 = vadd.f32 %v1772_v1, %v1637_v0  ;;  %v4519_v57 = vpop.f32.mrb[19].mxu1  ;;  %v1667_v63 = vpop.permute.xlu0 %1666 }
 0x79e   :  { %v1829_v2 = vmul.f32 0.044715, %v1820_v21  ;;  %v1812_v3 = vmul.f32 %v5600_v25, %v5600_v25 }
 0x79f   :  { %v1777_v4 = vpop.f32.mrb[20].mxu1 }
 0x7a0   :  { %v1838_v27 = vadd.f32 %v1829_v2, %v5595_v47  ;;  %v1821_v5 = vmul.f32 %v1812_v3, %v5600_v25  ;;  %v5606_v56 = vadd.f32 %v1777_v4, %v1642_v28  ;;  %v4522_v31 = vpop.f32.mrb[21].mxu1 }
 0x7a2   :  { %v1847_v32 = vmul.f32 0.7978846, %v1838_v27  ;;  %v1830_v6 = vmul.f32 0.044715, %v1821_v5  ;;  %v1813_v41 = vmul.f32 %v5606_v56, %v5606_v56 }
 0x7a3   :  { %v1782_v8 = vpop.f32.mrb[22].mxu1 }
 0x7a4   :  { %4895 = vtanh.f32 %v1847_v32  ;;  %v1839_v9 = vadd.f32 %v1830_v6, %v5600_v25  ;;  %v1822_v10 = vmul.f32 %v1813_v41, %v5606_v56  ;;  %v5612_v38 = vadd.f32 %v1782_v8, %v1647_v7  ;;  %v4525_v11 = vpop.f32.mrb[23].mxu1  ;;  %v1672_v6 = vpop.permute.xlu1 %1671 }
 0x7a6   :  { %v1848_v13 = vmul.f32 0.7978846, %v1839_v9  ;;  %v1831_v15 = vmul.f32 0.044715, %v1822_v10  ;;  %v1814_v16 = vmul.f32 %v5612_v38, %v5612_v38 }
 0x7a7   :  { %v1787_v18 = vpop.f32.mrb[24].mxu1 }
 0x7a8   :  { %4897 = vtanh.f32 %v1848_v13  ;;  %v1840_v19 = vadd.f32 %v1831_v15, %v5606_v56  ;;  %v1823_v20 = vmul.f32 %v1814_v16, %v5612_v38  ;;  %v5618_v22 = vadd.f32 %v1787_v18, %v1652_v17  ;;  %v4528_v23 = vpop.f32.mrb[25].mxu1 }
 0x7aa   :  { %v1849_v24 = vmul.f32 0.7978846, %v1840_v19  ;;  %v1832_v26 = vmul.f32 0.044715, %v1823_v20  ;;  %v1815_v30 = vmul.f32 %v5618_v22, %v5618_v22 }
 0x7ab   :  { %v1792_v35 = vpop.f32.mrb[26].mxu1 }
 0x7ac   :  { %4899 = vtanh.f32 %v1849_v24  ;;  %v1841_v40 = vadd.f32 %v1832_v26, %v5612_v38  ;;  %v1824_v42 = vmul.f32 %v1815_v30, %v5618_v22  ;;  %v5624_v44 = vadd.f32 %v1792_v35, %v1657_v34  ;;  %v4531_v45 = vpop.f32.mrb[27].mxu1 }
 0x7ae   :  { %v4896_v48 = vpop.eup %4895  ;;  %v1850_v50 = vmul.f32 0.7978846, %v1841_v40  ;;  %v1833_v39 = vmul.f32 0.044715, %v1824_v42  ;;  %v1816_v51 = vmul.f32 %v5624_v44, %v5624_v44 }
 0x7af   :  { %v1797_v54 = vpop.f32.mrb[28].mxu1  ;;  %v1865_v55 = vadd.f32 1.0, %v4896_v48 }
 0x7b0   :  { %4901 = vtanh.f32 %v1850_v50  ;;  %v1842_v12 = vadd.f32 %v1833_v39, %v5618_v22  ;;  %v1825_v14 = vmul.f32 %v1816_v51, %v5624_v44  ;;  %v5630_v58 = vadd.f32 %v1797_v54, %v1662_v53  ;;  %v4534_v59 = vpop.f32.mrb[29].mxu1 }
 0x7b1   :  { %v1874_v21 = vmul.f32 0.5, %v1865_v55 }
 0x7b2   :  { %v4898_v60 = vpop.eup %4897  ;;  %v1851_v46 = vmul.f32 0.7978846, %v1842_v12  ;;  %v1834_v61 = vmul.f32 0.044715, %v1825_v14  ;;  %v1817_v62 = vmul.f32 %v5630_v58, %v5630_v58 }
 0x7b3   :  { %v1802_v0 = vpop.f32.mrb[30].mxu1  ;;  %v1866_v1 = vadd.f32 1.0, %v4898_v60  ;;  %v1883_v7 = vmul.f32 %v1874_v21, %v5595_v47 }
 0x7b4   :  { %4903 = vtanh.f32 %v1851_v46  ;;  %v1843_v57 = vadd.f32 %v1834_v61, %v5624_v44  ;;  %v1826_v2 = vmul.f32 %v1817_v62, %v5630_v58  ;;  %v1803_v3 = vadd.f32 %v1802_v0, %v1667_v63  ;;  %v4537_v28 = vpop.f32.mrb[31].mxu1 }
 0x7b5   :  { %v1875_v4 = vmul.f32 0.5, %v1866_v1 }
 0x7b6   :  { %v4900_v27 = vpop.eup %4899  ;;  %v1852_v5 = vmul.f32 0.7978846, %v1843_v57  ;;  %v1835_v31 = vmul.f32 0.044715, %v1826_v2  ;;  %v1818_v32 = vmul.f32 %v1803_v3, %v1803_v3 }
 0x7b7   :  { %v1807_v41 = vpop.f32.mrb[32].mxu1  ;;  %v1884_v8 = vmul.f32 %v1875_v4, %v5600_v25  ;;  %v1867_v9 = vadd.f32 1.0, %v4900_v27  ;;  %v1908_v4 = vpop.permute.xlu1 %1907 }
 0x7b8   :  { %4905 = vtanh.f32 %v1852_v5  ;;  %v1844_v10 = vadd.f32 %v1835_v31, %v5630_v58  ;;  %v1827_v11 = vmul.f32 %v1818_v32, %v1803_v3  ;;  %v1808_v13 = vadd.f32 %v1807_v41, %v1672_v6  ;;  %v4540_v15 = vpop.f32.mrb[33].mxu1  ;;  %v1903_v27 = vpop.permute.xlu0 %1902 }
 0x7b9   :  { %v4777_v16 = vpack.c.bf16 %v1884_v8, %v1883_v7  ;;  %v1876_v24 = vmul.f32 0.5, %v1867_v9 }
 0x7ba   :  { %v4902_v17 = vpop.eup %4901  ;;  %v1853_v18 = vmul.f32 0.7978846, %v1844_v10  ;;  %v1836_v19 = vmul.f32 0.044715, %v1827_v11  ;;  %v1819_v20 = vmul.f32 %v1808_v13, %v1808_v13 }
 0x7bb   :  { %4778 = vmatprep.subr.bf16.mxu0 %v4777_v16  ;;  %v1868_v23 = vadd.f32 1.0, %v4902_v17  ;;  %v1885_v40 = vmul.f32 %v1876_v24, %v5606_v56  ;;  %v1918_v7 = vpop.permute.xlu1 %1917 }
 0x7bc   :  { %4907 = vtanh.f32 %v1853_v18  ;;  %v1845_v26 = vadd.f32 %v1836_v19, %v1803_v3  ;;  %v1828_v47 = vmul.f32 %v1819_v20, %v1808_v13  ;;  %4780 = vmatpush3.bf16.msra.mxu0 %v4777_v16  ;;  %v1913_v10 = vpop.permute.xlu0 %1912 }
 0x7bd   :  { %v1877_v25 = vmul.f32 0.5, %v1868_v23 }
 0x7be   :  { %v4904_v30 = vpop.eup %4903  ;;  %v1854_v34 = vmul.f32 0.7978846, %v1845_v26  ;;  %v1837_v35 = vmul.f32 0.044715, %v1828_v47 }
 0x7bf   :  { %v1886_v42 = vmul.f32 %v1877_v25, %v5612_v38  ;;  %v1869_v45 = vadd.f32 1.0, %v4904_v30 }
 0x7c0   :  { %4909 = vtanh.f32 %v1854_v34  ;;  %v1846_v48 = vadd.f32 %v1837_v35, %v1808_v13 }
 0x7c1   :  { %v4781_v50 = vpack.c.bf16 %v1886_v42, %v1885_v40  ;;  %v1878_v54 = vmul.f32 0.5, %v1869_v45 }
 0x7c2   :  { %v4906_v39 = vpop.eup %4905  ;;  %v1855_v51 = vmul.f32 0.7978846, %v1846_v48 }
 0x7c3   :  { %4782 = vmatprep.subr.bf16.mxu0 %v4781_v50  ;;  %v1870_v53 = vadd.f32 1.0, %v4906_v39  ;;  %v1887_v14 = vmul.f32 %v1878_v54, %v5618_v22  ;;  %v1893_v22 = vld [vmem:[%s6151_s14 + $0x8] sm:$0xff] }
 0x7c4   :  { %4784 = vmatpush3.bf16.msra.mxu0 %v4781_v50  ;;  %4911 = vtanh.f32 %v1855_v51 }
 0x7c5   :  { %v1879_v55 = vmul.f32 0.5, %v1870_v53 }
 0x7c6   :  { %v4908_v12 = vpop.eup %4907 }
 0x7c7   :  { %v1888_v59 = vmul.f32 %v1879_v55, %v5624_v44  ;;  %v1871_v56 = vadd.f32 1.0, %v4908_v12  ;;  %v1894_v44 = vld [vmem:[%s6151_s14 + $0x10] sm:$0xff] }
 0x7c9   :  { %v4785_v60 = vpack.c.bf16 %v1888_v59, %v1887_v14  ;;  %v1880_v61 = vmul.f32 0.5, %v1871_v56 }
 0x7ca   :  { %v4910_v38 = vpop.eup %4909 }
 0x7cb   :  { %4786 = vmatprep.subr.bf16.mxu0 %v4785_v60  ;;  %v1872_v46 = vadd.f32 1.0, %v4910_v38  ;;  %v1889_v0 = vmul.f32 %v1880_v61, %v5630_v58  ;;  %v1895_v58 = vld [vmem:[%s6151_s14 + $0x18] sm:$0xff] }
 0x7cc   :  { %4788 = vmatpush3.bf16.msra.mxu0 %v4785_v60 }
 0x7cd   :  { %v1881_v62 = vmul.f32 0.5, %v1872_v46 }
 0x7ce   :  { %v4912_v63 = vpop.eup %4911 }
 0x7cf   :  { %v1890_v1 = vmul.f32 %v1881_v62, %v1803_v3  ;;  %v1873_v21 = vadd.f32 1.0, %v4912_v63  ;;  %v4115_v3 = vld [vmem:[%s6141_s6 + $0x60] sm:$0xff] }
 0x7d1   :  { %v4789_v57 = vpack.c.bf16 %v1890_v1, %v1889_v0  ;;  %v1882_v2 = vmul.f32 0.5, %v1873_v21  ;;  %v2082_v0 = vpop.permute.xlu1 %2081  ;;  %v2077_v1 = vpop.permute.xlu0 %2076 }
 0x7d3   :  { %4790 = vmatprep.subr.bf16.mxu0 %v4789_v57  ;;  %v1891_v28 = vmul.f32 %v1882_v2, %v1808_v13 }
 0x7d4   :  { %4792 = vmatpush3.bf16.msra.mxu0 %v4789_v57 }
 0x7d5   :  { %4557 = vmatprep.subr.mxu0 %v1891_v28  ;;  %v2106_v2 = vpop.permute.xlu1 %2105 }
 0x7d8   :  { %4558 = vmatpush3.msra.mxu0 %v1891_v28  ;;  %v2101_v28 = vpop.permute.xlu0 %2100 }
 0x7d9   :  { %4560 = vmatmul.mubr.msk.f32.vlgmr.msra.gmra.mrb[20].mxu0 %vm1920_vm6, %v1893_v22  ;;  %v2092_v22 = vpop.permute.xlu1 %2091 }
 0x7da   :  { %4562 = vmatprep.mubr.msk.f32.mxu0 %vm1920_vm6, %v1894_v44 }
 0x7dc   :  { %v2087_v44 = vpop.permute.xlu0 %2086 }
 0x7dd   :  { %4563 = vmatmul.mubr.msk.f32.gmra.mrb[22].mxu0 %vm1920_vm6, %v1895_v58 }
 0x7de   :  { %4573 = vmatprep.mubr.msk.f32.mxu0 %vm365_vm1, %v4115_v3 }
 0x8ac   :  { %v4561_v5 = vpop.f32.mrb[20].mxu0 }
 0x8ad   :  { %v2005_v31 = vadd.f32 %v4561_v5, %v1908_v4  ;;  %v1999_v32 = vpop.f32.mrb[21].mxu0 }
 0x8ae   :  { %v2000_v6 = vadd.f32 %v1999_v32, %v1903_v27 }
 0x8af   :  { %v5661_v41 = vadd.f32 %v2005_v31, %v5511_v29 }
 0x8b0   :  { %v5664_v8 = vadd.f32 %v2000_v6, %v5514_v33  ;;  %v4564_v9 = vpop.f32.mrb[22].mxu0 }
 0x8b1   :  { %v2015_v11 = vadd.f32 %v4564_v9, %v1918_v7  ;;  %v2009_v13 = vpop.f32.mrb[23].mxu0  ;;  %v2033_v15 = vsel %vm189_vm2, %v5661_v41, 0.0  ;;  %v2116_v9 = vpop.permute.xlu1 %2115 }
 0x8b2   :  { %v2032_v16 = vsel %vm189_vm2, %v5664_v8, 0.0  ;;  %v2010_v17 = vadd.f32 %v2009_v13, %v1913_v10  ;;  %v2111_v10 = vpop.permute.xlu0 %2110 }
 0x8b3   :  { %v5671_v18 = vadd.f32 %v2015_v11, %v5521_v49  ;;  %v2034_v19 = vadd.f32 %v2033_v15, %v2032_v16 }
 0x8b4   :  { %v5674_v29 = vadd.f32 %v2010_v17, %v5524_v37 }
 0x8b5   :  { %v2037_v23 = vsel %vm189_vm2, %v5671_v18, 0.0 }
 0x8b6   :  { %v2035_v33 = vsel %vm189_vm2, %v5674_v29, 0.0 }
 0x8b7   :  { %v2036_v20 = vadd.f32 %v2035_v33, %v2034_v19  ;;  %v4116_v33 = vld [vmem:[%s6141_s6 + $0x68] sm:$0xff] }
 0x8b9   :  { %v2038_v24 = vadd.f32 %v2037_v23, %v2036_v20  ;;  %v4117_v20 = vld [vmem:[%s6141_s6 + $0x70] sm:$0xff]  ;;  %v4118_v23 = vld [vmem:[%s6141_s6 + $0x78] sm:$0xff] }
 0x8bb   :  { %v2039_v26 = vrot.slane %v2038_v24, 4 }
 0x8bd   :  { %v2040_v47 = vadd.f32 %v2039_v26, %v2038_v24  ;;  %v4119_v24 = vld [vmem:[%s6141_s6 + $0x80] sm:$0xff]  ;;  %v4120_v26 = vld [vmem:[%s6141_s6 + $0x88] sm:$0xff] }
 0x8bf   :  { %v2041_v25 = vrot.slane %v2040_v47, 2 }
 0x8c1   :  { %v2042_v30 = vadd.f32 %v2041_v25, %v2040_v47  ;;  %v4121_v47 = vld [vmem:[%s6141_s6 + $0x90] sm:$0xff]  ;;  %v4122_v25 = vld [vmem:[%s6141_s6 + $0x98] sm:$0xff] }
 0x8c3   :  { %v2043_v34 = vrot.slane %v2042_v30, 1 }
 0x8c5   :  { %v2044_v35 = vadd.f32 %v2043_v34, %v2042_v30  ;;  %v2151_v30 = vpop.permute.xlu0 %2150  ;;  %v2156_v34 = vpop.permute.xlu1 %2155 }
 0x8c7   :  { %v2045_v49 = vmul.f32 0.03125, %v2044_v35 }
 0x8c9   :  { %v2046_v40 = vsub.f32 %v5664_v8, %v2045_v49  ;;  %v2047_v37 = vsub.f32 %v5661_v41, %v2045_v49  ;;  %v2048_v42 = vsub.f32 %v5674_v29, %v2045_v49  ;;  %v2049_v45 = vsub.f32 %v5671_v18, %v2045_v49 }
 0x8cb   :  { %v2050_v48 = vmul.f32 %v2046_v40, %v2046_v40  ;;  %v2051_v50 = vmul.f32 %v2047_v37, %v2047_v37  ;;  %v2052_v39 = vmul.f32 %v2048_v42, %v2048_v42  ;;  %v2053_v51 = vmul.f32 %v2049_v45, %v2049_v45 }
 0x8cd   :  { %v2054_v53 = vsel %vm189_vm2, %v2050_v48, 0.0  ;;  %v2055_v54 = vsel %vm189_vm2, %v2051_v50, 0.0  ;;  %v2057_v12 = vsel %vm189_vm2, %v2052_v39, 0.0  ;;  %v2059_v59 = vsel %vm189_vm2, %v2053_v51, 0.0  ;;  %v2166_v48 = vpop.permute.xlu1 %2165 }
 0x8ce   :  { %v2056_v55 = vadd.f32 %v2055_v54, %v2054_v53 }
 0x8d0   :  { %v2058_v14 = vadd.f32 %v2057_v12, %v2056_v55 }
 0x8d1   :  { %v2176_v12 = vpop.permute.xlu1 %2175 }
 0x8d2   :  { %v2060_v56 = vadd.f32 %v2059_v59, %v2058_v14 }
 0x8d4   :  { %v2061_v60 = vrot.slane %v2060_v56, 4 }
 0x8d6   :  { %v2062_v38 = vadd.f32 %v2061_v60, %v2060_v56 }
 0x8d8   :  { %v2063_v46 = vrot.slane %v2062_v38, 2 }
 0x8da   :  { %v2064_v61 = vadd.f32 %v2063_v46, %v2062_v38  ;;  %v4123_v38 = vld [vmem:[%s6141_s6 + $0xa0] sm:$0xff]  ;;  %v4124_v46 = vld [vmem:[%s6141_s6 + $0xa8] sm:$0xff] }
 0x8dc   :  { %v2065_v62 = vrot.slane %v2064_v61, 1 }
 0x8de   :  { %v2066_v63 = vadd.f32 %v2065_v62, %v2064_v61  ;;  %v2186_v61 = vpop.permute.xlu1 %2185 }
 0x8e0   :  { %v2067_v21 = vmul.f32 0.03125, %v2066_v63 }
 0x8e2   :  { %v2068_v57 = vadd.f32 1e-12, %v2067_v21 }
 0x8e4   :  { %4913 = vrsqrt.f32 %v2068_v57 }
 0x8ee   :  { %v4914_v58 = vpop.eup %4913 }
 0x8ef   :  { %v2072_v3 = vmul.f32 %v4914_v58, %v2048_v42  ;;  %v2070_v4 = vmul.f32 %v4914_v58, %v2046_v40  ;;  %v2071_v27 = vmul.f32 %v4914_v58, %v2047_v37  ;;  %v2073_v5 = vmul.f32 %v4914_v58, %v2049_v45  ;;  %v2161_v42 = vpop.permute.xlu0 %2160 }
 0x8f1   :  { %v2094_v31 = vmul.f32 %v2077_v1, %v2070_v4  ;;  %v2095_v32 = vmul.f32 %v2082_v0, %v2071_v27  ;;  %v2096_v6 = vmul.f32 %v2087_v44, %v2072_v3  ;;  %v2097_v7 = vmul.f32 %v2092_v22, %v2073_v5  ;;  %v4125_v3 = vld [vmem:[%s6141_s6 + $0xb0] sm:$0xff]  ;;  %v4126_v4 = vld [vmem:[%s6141_s6 + $0xb8] sm:$0xff]  ;;  %v4969_v5 = vld [vmem:[%s6143_s3 + $0x8] sm:$0xff] }
 0x8f3   :  { %v2118_v11 = vadd.f32 %v2101_v28, %v2094_v31  ;;  %v2119_v13 = vadd.f32 %v2106_v2, %v2095_v32  ;;  %v2120_v15 = vadd.f32 %v2111_v10, %v2096_v6  ;;  %v2121_v16 = vadd.f32 %v2116_v9, %v2097_v7  ;;  %v2171_v53 = vpop.permute.xlu0 %2170  ;;  %v4970_v6 = vld [vmem:[%s6143_s3] sm:$0xff] }
 0x8f5   :  { %v4793_v17 = vpack.c.bf16 %v2119_v13, %v2118_v11  ;;  %v4797_v19 = vpack.c.bf16 %v2121_v16, %v2120_v15 }
 0x8f7   :  { %4794 = vmatprep.subr.bf16.mxu0 %v4793_v17  ;;  %v2181_v62 = vpop.permute.xlu0 %2180 }
 0x8f8   :  { %4796 = vmatpush3.bf16.msra.mxu0 %v4793_v17 }
 0x8f9   :  { %4798 = vmatprep.subr.bf16.mxu0 %v4797_v19 }
 0x8fc   :  { %4800 = vmatpush3.bf16.msra.mxu0 %v4797_v19 }
 0x8fd   :  { %4801 = vmatprep.subr.bf16.mxu0 %v4972_v36 }
 0x8ff   :  { %4574 = vmatmul.mubr.msk.f32.vlgmr.msra.gmra.mrb[24].mxu0 %vm365_vm1, %v4116_v33 }
 0x900   :  { %4576 = vmatprep.mubr.msk.f32.mxu0 %vm365_vm1, %v4117_v20 }
 0x903   :  { %4577 = vmatmul.mubr.msk.f32.gmra.mrb[26].mxu0 %vm365_vm1, %v4118_v23 }
 0x904   :  { %4579 = vmatprep.mubr.msk.f32.mxu0 %vm365_vm1, %v4119_v24 }
 0x907   :  { %4580 = vmatmul.mubr.msk.f32.gmra.mrb[28].mxu0 %vm365_vm1, %v4120_v26 }
 0x908   :  { %4582 = vmatprep.mubr.msk.f32.mxu0 %vm365_vm1, %v4121_v47 }
 0x90b   :  { %4583 = vmatmul.mubr.msk.f32.gmra.mrb[30].mxu0 %vm365_vm1, %v4122_v25 }
 0x90c   :  { %4585 = vmatprep.mubr.msk.f32.mxu0 %vm365_vm1, %v4123_v38 }
 0x90f   :  { %4586 = vmatmul.mubr.msk.f32.gmra.mrb[32].mxu0 %vm365_vm1, %v4124_v46 }
 0x910   :  { %4588 = vmatprep.mubr.msk.f32.mxu0 %vm365_vm1, %v4125_v3 }
 0x913   :  { %4589 = vmatmul.mubr.msk.f32.gmra.mrb[34].mxu0 %vm365_vm1, %v4126_v4 }
 0x914   :  { %4615 = vmatprep.mubr.msk.f32.mxu0 %vm4973_vm4, %v4974_v43 }
 0x9d2   :  { %v4575_v35 = vpop.f32.mrb[24].mxu0 }
 0x9d3   :  { %v2316_v49 = vadd.f32 %v4575_v35, %v2156_v34  ;;  %v2310_v40 = vpop.f32.mrb[25].mxu0 }
 0x9d4   :  { %v2311_v37 = vadd.f32 %v2310_v40, %v2151_v30 }
 0x9d5   :  { %2482 = vxpose.xlu1.b32.start.end [1/1] (short) (narrow) %v2316_v49, 16 }
 0x9d6   :  { %v4578_v45 = vpop.f32.mrb[26].mxu0  ;;  %2369 = vxpose.xlu0.b32.start.end [1/1] (short) (narrow) %v2311_v37, 16  ;;  %v4135_v37 = vld [vmem:[%s6171_s4 + $0xa0] sm:$0xff] }
 0x9d7   :  { %v2320_v50 = vpop.f32.mrb[27].mxu0  ;;  %v2326_v14 = vadd.f32 %v4578_v45, %v2166_v48 }
 0x9d8   :  { %v2321_v39 = vadd.f32 %v2320_v50, %v2161_v42 }
 0x9da   :  { %v4581_v51 = vpop.f32.mrb[28].mxu0 }
 0x9db   :  { %v2330_v54 = vpop.f32.mrb[29].mxu0  ;;  %2595 = vxpose.xlu0.b32.start.end [1/1] (short) (narrow) %v2321_v39, 16  ;;  %v2336_v59 = vadd.f32 %v4581_v51, %v2176_v12 }
 0x9dc   :  { %v2331_v55 = vadd.f32 %v2330_v54, %v2171_v53 }
 0x9de   :  { %v4584_v56 = vpop.f32.mrb[30].mxu0  ;;  %4591 = vmatprep.subr.mxu1 %v2331_v55 }
 0x9df   :  { %v2340_v60 = vpop.f32.mrb[31].mxu0  ;;  %4592 = vmatpush3.msra.mxu1 %v2331_v55  ;;  %v2346_v28 = vadd.f32 %v4584_v56, %v2186_v61 }
 0x9e0   :  { %2708 = vxpose.xlu0.b32.start.end [1/1] (short) (narrow) %v2326_v14, 16  ;;  %4596 = vmatprep.subr.mxu1 %v2336_v59  ;;  %v2341_v21 = vadd.f32 %v2340_v60, %v2181_v62 }
 0x9e2   :  { %v5766_v42 = vpop.f32.mrb[32].mxu0 }
 0x9e3   :  { %v5768_v45 = vpop.f32.mrb[33].mxu0 }
 0xa55   :  { %v2498_v0 = vpop.trf.xlu1 }
 0xa56   :  { %v2385_v63 = vpop.trf.xlu0 }
 0xa57   :  { %4593 = vmatprep.mubr.msk.f32.mxu1 %vm559_vm3, %v2385_v63 }
 0xa59   :  { %v2499_v57 = vpop.trf.xlu1 }
 0xa5a   :  { %v2386_v1 = vpop.trf.xlu0 }
 0xa5b   :  { %4594 = vmatmul.mubr.msk.f32.vlgmr.msra.gmra.mrb[34].mxu1 %vm559_vm3, %v2386_v1 }
 0xa5c   :  { %4597 = vmatpush3.msra.mxu1 %v2336_v59  ;;  %4598 = vmatprep.mubr.msk.f32.mxu1 %vm559_vm3, %v2498_v0 }
 0xa5d   :  { %4601 = vmatprep.subr.mxu1 %v2341_v21 }
 0xa5e   :  { %v2611_v2 = vpop.trf.xlu0 }
 0xa5f   :  { %4599 = vmatmul.mubr.msk.f32.vlgmr.msra.gmra.mrb[36].mxu1 %vm559_vm3, %v2499_v57 }
 0xa60   :  { %4602 = vmatpush3.msra.mxu1 %v2341_v21  ;;  %4603 = vmatprep.mubr.msk.f32.mxu1 %vm559_vm3, %v2611_v2 }
 0xa61   :  { %4606 = vmatprep.subr.mxu1 %v2346_v28 }
 0xa62   :  { %v2612_v22 = vpop.trf.xlu0 }
 0xa63   :  { %4604 = vmatmul.mubr.msk.f32.vlgmr.msra.gmra.mrb[38].mxu1 %vm559_vm3, %v2612_v22 }
 0xa64   :  { %4607 = vmatpush3.msra.mxu1 %v2346_v28 }
 0xa65   :  { %4805 = vmatprep.subr.bf16.mxu1 %v4972_v36 }
 0xa66   :  { %v2724_v44 = vpop.trf.xlu0 }
 0xa67   :  { %4608 = vmatprep.mubr.msk.f32.mxu1 %vm559_vm3, %v2724_v44 }
 0xa6a   :  { %v2725_v58 = vpop.trf.xlu0 }
 0xa6b   :  { %4609 = vmatmul.mubr.msk.f32.vlgmr.msra.gmra.mrb[40].mxu1 %vm559_vm3, %v2725_v58 }
 0xa6c   :  { %4622 = vmatprep.mubr.msk.f32.mxu1 %vm4973_vm4, %v4974_v43 }
 0xb2e   :  { %v4595_v27 = vpop.f32.mrb[34].mxu1 }
 0xb2f   :  { %v2479_v31 = vadd.f32 %v4969_v5, %v4595_v27  ;;  %v2473_v32 = vpop.f32.mrb[35].mxu1 }
 0xb30   :  { %v2474_v7 = vadd.f32 %v4970_v6, %v2473_v32 }
 0xb31   :  { %v2824_v9 = vsel %vm189_vm2, %v2479_v31, -inf }
 0xb32   :  { %2825 = vmax.xlane.f32.xlu1 %v2824_v9  ;;  %v4600_v10 = vpop.f32.mrb[36].mxu1  ;;  %v2821_v11 = vsel %vm189_vm2, %v2474_v7, -inf }
 0xb33   :  { %v2592_v13 = vadd.f32 %v4969_v5, %v4600_v10  ;;  %v2586_v15 = vpop.f32.mrb[37].mxu1  ;;  %2822 = vmax.xlane.f32.xlu0 %v2821_v11  ;;  %v4137_v10 = vld [vmem:[%s6171_s4 + $0xb0] sm:$0xff]  ;;  %v5801_v11 = vpop.f32.mrb[34].mxu0 }
 0xb34   :  { %v2587_v16 = vadd.f32 %v4970_v6, %v2586_v15  ;;  %v4136_v15 = vld [vmem:[%s6171_s4 + $0xa8] sm:$0xff] }
 0xb35   :  { %v2830_v17 = vsel %vm189_vm2, %v2592_v13, -inf }
 0xb36   :  { %v4605_v19 = vpop.f32.mrb[38].mxu1  ;;  %v2827_v33 = vsel %vm189_vm2, %v2587_v16, -inf }
 0xb37   :  { %v2705_v20 = vadd.f32 %v4969_v5, %v4605_v19  ;;  %2828 = vmax.xlane.f32.xlu1 %v2827_v33  ;;  %2831 = vmax.xlane.f32.xlu0 %v2830_v17  ;;  %v2699_v23 = vpop.f32.mrb[39].mxu1  ;;  %v4175_v17 = vld [vmem:[%s6144_s9 + $0x20] sm:$0xff]  ;;  %v4177_v33 = vld [vmem:[%s6144_s9 + $0x30] sm:$0xff] }
 0xb38   :  { %v2700_v24 = vadd.f32 %v4970_v6, %v2699_v23  ;;  %v4183_v23 = vld [vmem:[%s6145_s10 + $0x20] sm:$0xff] }
 0xb39   :  { %v2836_v26 = vsel %vm189_vm2, %v2705_v20, -inf }
 0xb3a   :  { %v2833_v47 = vsel %vm189_vm2, %v2700_v24, -inf }
 0xb3b   :  { %2837 = vmax.xlane.f32.xlu0 %v2836_v26  ;;  %2834 = vmax.xlane.f32.xlu1 %v2833_v47  ;;  %v4185_v26 = vld [vmem:[%s6145_s10 + $0x30] sm:$0xff] }
 0xb3e   :  { %v4610_v25 = vpop.f32.mrb[40].mxu1 }
 0xb3f   :  { %v2818_v30 = vadd.f32 %v4969_v5, %v4610_v25  ;;  %v2812_v34 = vpop.f32.mrb[41].mxu1  ;;  %v4189_v25 = vld [vmem:[%s6146_s11 + $0x30] sm:$0xff] }
 0xb40   :  { %v5758_v35 = vadd.f32 %v4970_v6, %v2812_v34  ;;  %v4200_v34 = vld [vmem:[%s6147_s13 + $0x48] sm:$0xff] }
 0xb41   :  { %v2842_v49 = vsel %vm189_vm2, %v2818_v30, -inf }
 0xb42   :  { %2843 = vmax.xlane.f32.xlu0 %v2842_v49  ;;  %v2839_v40 = vsel %vm189_vm2, %v5758_v35, -inf  ;;  %v4204_v49 = vld [vmem:[%s6147_s13 + $0x68] sm:$0xff] }
 0xb43   :  { %2840 = vmax.xlane.f32.xlu1 %v2839_v40  ;;  %v4206_v40 = vld [vmem:[%s6147_s13 + $0x78] sm:$0xff] }
 0xb54   :  { %2190 = vperm.xlu1 %4858, %v4135_v37   ;;  %v4138_v37 = vld [vmem:[%s6171_s4 + $0xb8] sm:$0xff] }
 0xbbf   :  { %v2826_v48 = vpop.xlane.xlu1 %2825 }
 0xbc0   :  { %v2846_v50 = vsub.f32 %v2479_v31, %v2826_v48  ;;  %v2823_v39 = vpop.xlane.xlu0 %2822  ;;  %v4208_v48 = vld [vmem:[%s6147_s13 + $0x88] sm:$0xff] }
 0xbc1   :  { %v2845_v51 = vsub.f32 %v2474_v7, %v2823_v39  ;;  %v4223_v39 = vld [vmem:[%s6148_s15 + $0x28] sm:$0xff] }
 0xbc2   :  { %v2855_v53 = vmul.f32 1.442695, %v2846_v50  ;;  %v4176_v50 = vld [vmem:[%s6144_s9 + $0x28] sm:$0xff] }
 0xbc3   :  { %v2853_v54 = vmul.f32 1.442695, %v2845_v51  ;;  %v4178_v51 = vld [vmem:[%s6144_s9 + $0x38] sm:$0xff] }
 0xbc4   :  { %4915 = vpow2.f32 %v2855_v53  ;;  %v2829_v55 = vpop.xlane.xlu1 %2828  ;;  %v2832_v12 = vpop.xlane.xlu0 %2831  ;;  %v4225_v53 = vld [vmem:[%s6148_s15 + $0x38] sm:$0xff] }
 0xbc5   :  { %4917 = vpow2.f32 %v2853_v54  ;;  %v2847_v14 = vsub.f32 %v2587_v16, %v2829_v55  ;;  %v2848_v59 = vsub.f32 %v2592_v13, %v2832_v12  ;;  %v5803_v13 = vpop.f32.mrb[35].mxu0  ;;  %v4184_v54 = vld [vmem:[%s6145_s10 + $0x28] sm:$0xff] }
 0xbc6   :  { %v3871_v55 = vld [vmem:[%s6152_s16 + $0x8] sm:$0xff] }
 0xbc7   :  { %v2857_v56 = vmul.f32 1.442695, %v2847_v14  ;;  %v2859_v60 = vmul.f32 1.442695, %v2848_v59  ;;  %v4188_v12 = vld [vmem:[%s6146_s11 + $0x28] sm:$0xff]  ;;  %v4186_v59 = vld [vmem:[%s6145_s10 + $0x38] sm:$0xff] }
 0xbc8   :  { %v2835_v38 = vpop.xlane.xlu1 %2834  ;;  %v2838_v46 = vpop.xlane.xlu0 %2837  ;;  %v3875_v14 = vld [vmem:[%s6153_s17 + $0x8] sm:$0xff] }
 0xbc9   :  { %4919 = vpow2.f32 %v2857_v56  ;;  %v2849_v61 = vsub.f32 %v2700_v24, %v2835_v38  ;;  %v2850_v62 = vsub.f32 %v2705_v20, %v2838_v46  ;;  %v4187_v24 = vld [vmem:[%s6146_s11 + $0x20] sm:$0xff]  ;;  %v3873_v56 = vld [vmem:[%s6152_s16 + $0x18] sm:$0xff]  ;;  %v4201_v46 = vld [vmem:[%s6147_s13 + $0x50] sm:$0xff] }
 0xbca   :  { %4921 = vpow2.f32 %v2859_v60  ;;  %v4190_v60 = vld [vmem:[%s6146_s11 + $0x38] sm:$0xff] }
 0xbcb   :  { %v2861_v63 = vmul.f32 1.442695, %v2849_v61  ;;  %v2863_v0 = vmul.f32 1.442695, %v2850_v62  ;;  %v3877_v38 = vld [vmem:[%s6153_s17 + $0x18] sm:$0xff]  ;;  %v4203_v61 = vld [vmem:[%s6147_s13 + $0x60] sm:$0xff] }
 0xbcc   :  { %v4205_v62 = vld [vmem:[%s6147_s13 + $0x70] sm:$0xff] }
 0xbcd   :  { %4923 = vpow2.f32 %v2861_v63  ;;  %v4207_v63 = vld [vmem:[%s6147_s13 + $0x80] sm:$0xff] }
 0xbce   :  { %v5770_v1 = vpop.eup %4915  ;;  %4925 = vpow2.f32 %v2863_v0  ;;  %v4222_v0 = vld [vmem:[%s6148_s15 + $0x20] sm:$0xff] }
 0xbcf   :  { %v5772_v21 = vpop.eup %4917  ;;  %v2844_v57 = vpop.xlane.xlu0 %2843  ;;  %v2872_v2 = vsel %vm189_vm2, %v5770_v1, 0.0 }
 0xbd0   :  { %v2852_v28 = vsub.f32 %v2818_v30, %v2844_v57  ;;  %2873 = vadd.xlane.f32.xlu0 %v2872_v2  ;;  %v2869_v22 = vsel %vm189_vm2, %v5772_v21, 0.0  ;;  %v2841_v16 = vpop.xlane.xlu1 %2840  ;;  %v4224_v57 = vld [vmem:[%s6148_s15 + $0x30] sm:$0xff]  ;;  %v3870_v2 = vld [vmem:[%s6152_s16] sm:$0xff] }
 0xbd1   :  { %2870 = vadd.xlane.f32.xlu1 %v2869_v22  ;;  %v2851_v19 = vsub.f32 %v5758_v35, %v2841_v16  ;;  %v4202_v35 = vld [vmem:[%s6147_s13 + $0x58] sm:$0xff]  ;;  %v3872_v22 = vld [vmem:[%s6152_s16 + $0x10] sm:$0xff] }
 0xbd2   :  { %v2867_v44 = vmul.f32 1.442695, %v2852_v28  ;;  %v3874_v28 = vld [vmem:[%s6153_s17] sm:$0xff] }
 0xbd3   :  { %v5778_v58 = vpop.eup %4919  ;;  %v2865_v20 = vmul.f32 1.442695, %v2851_v19 }
 0xbd4   :  { %v5780_v3 = vpop.eup %4921  ;;  %4927 = vpow2.f32 %v2867_v44  ;;  %v2875_v4 = vsel %vm189_vm2, %v5778_v58, 0.0  ;;  %v2191_v44 = vpop.permute.xlu1 %2190 }
 0xbd5   :  { %2876 = vadd.xlane.f32.xlu1 %v2875_v4  ;;  %v2878_v27 = vsel %vm189_vm2, %v5780_v3, 0.0  ;;  %4929 = vpow2.f32 %v2865_v20  ;;  %v3876_v4 = vld [vmem:[%s6153_s17 + $0x10] sm:$0xff] }
 0xbd6   :  { %2879 = vadd.xlane.f32.xlu0 %v2878_v27 }
 0xbd7   :  { %v5786_v5 = vpop.eup %4923 }
 0xbd8   :  { %v5788_v31 = vpop.eup %4925  ;;  %v2881_v32 = vsel %vm189_vm2, %v5786_v5, 0.0 }
 0xbd9   :  { %2882 = vadd.xlane.f32.xlu1 %v2881_v32  ;;  %v2884_v6 = vsel %vm189_vm2, %v5788_v31, 0.0 }
 0xbda   :  { %2885 = vadd.xlane.f32.xlu0 %v2884_v6  ;;  %v3969_v6 = vld [vmem:[%s6154_s19] sm:$0x1f] }
 0xbde   :  { %v5794_v7 = vpop.eup %4927 }
 0xbdf   :  { %v2890_v9 = vsel %vm189_vm2, %v5794_v7, 0.0  ;;  %v5824_v47 = vpop.eup %4929 }
 0xbe0   :  { %2891 = vadd.xlane.f32.xlu0 %v2890_v9  ;;  %v2887_v30 = vsel %vm189_vm2, %v5824_v47, 0.0 }
 0xbea   :  { %2200 = vperm.xlu1 %4858, %v4137_v10  }
 0xbf6   :  { %2195 = vperm.xlu0 %4857, %v4136_v15  }
 0xbfa   :  { %3237 = vperm.xlu0 %4857, %v4175_v17  }
 0xbfe   :  { %3247 = vperm.xlu0 %4857, %v4177_v33  }
 0xc02   :  { %3410 = vperm.xlu0 %4857, %v4183_v23  }
 0xc06   :  { %3434 = vperm.xlu0 %4857, %v4187_v24  }
 0xc0a   :  { %3420 = vperm.xlu0 %4857, %v4185_v26  }
 0xc0e   :  { %2888 = vadd.xlane.f32.xlu1 %v2887_v30  ;;  %3444 = vperm.xlu0 %4857, %v4189_v25  }
 0xc12   :  { %3478 = vperm.xlu0 %4857, %v4200_v34  }
 0xc16   :  { %3488 = vperm.xlu0 %4857, %v4202_v35  }
 0xc1a   :  { %3498 = vperm.xlu0 %4857, %v4204_v49  }
 0xc1e   :  { %3508 = vperm.xlu0 %4857, %v4206_v40  }
 0xc1f   :  { %2205 = vperm.xlu1 %4858, %v4138_v37  }
 0xc22   :  { %3518 = vperm.xlu0 %4857, %v4208_v48  }
 0xc23   :  { %3242 = vperm.xlu1 %4858, %v4176_v50  }
 0xc26   :  { %3756 = vperm.xlu0 %4857, %v4223_v39  }
 0xc27   :  { %3252 = vperm.xlu1 %4858, %v4178_v51  }
 0xc2a   :  { %3766 = vperm.xlu0 %4857, %v4225_v53  }
 0xc2b   :  { %3415 = vperm.xlu1 %4858, %v4184_v54  }
 0xc2e   :  { %3927 = vperm.xlu0 %4857, %v3871_v55  }
 0xc2f   :  { %3439 = vperm.xlu1 %4858, %v4188_v12  }
 0xc32   :  { %3951 = vperm.xlu0 %4857, %v3875_v14  }
 0xc33   :  { %3425 = vperm.xlu1 %4858, %v4186_v59  }
 0xc36   :  { %3937 = vperm.xlu0 %4857, %v3873_v56  }
 0xc37   :  { %3449 = vperm.xlu1 %4858, %v4190_v60  }
 0xc3a   :  { %3961 = vperm.xlu0 %4857, %v3877_v38  }
 0xc3b   :  { %3483 = vperm.xlu1 %4858, %v4201_v46   ;;  %v4172_v46 = vld [vmem:[%s6149_s8 + $0x28] sm:$0xff] }
 0xc3f   :  { %3493 = vperm.xlu1 %4858, %v4203_v61   ;;  %v4173_v61 = vld [vmem:[%s6149_s8 + $0x30] sm:$0xff] }
 0xc43   :  { %3503 = vperm.xlu1 %4858, %v4205_v62   ;;  %v4174_v62 = vld [vmem:[%s6149_s8 + $0x38] sm:$0xff] }
 0xc47   :  { %3513 = vperm.xlu1 %4858, %v4207_v63  }
 0xc4b   :  { %3751 = vperm.xlu1 %4858, %v4222_v0  }
 0xc4f   :  { %3761 = vperm.xlu1 %4858, %v4224_v57  }
 0xc53   :  { %3922 = vperm.xlu1 %4858, %v3870_v2  }
 0xc57   :  { %3946 = vperm.xlu1 %4858, %v3874_v28  }
 0xc5b   :  { %3932 = vperm.xlu1 %4858, %v3872_v22  }
 0xc5d   :  { %v2874_v27 = vpop.xlane.xlu0 %2873 }
 0xc5e   :  { %4931 = vrcp.f32 %v2874_v27  ;;  %v2871_v32 = vpop.xlane.xlu1 %2870 }
 0xc5f   :  { %4933 = vrcp.f32 %v2871_v32  ;;  %3956 = vperm.xlu1 %4858, %v3876_v4  }
 0xc62   :  { %v2877_v9 = vpop.xlane.xlu1 %2876 }
 0xc63   :  { %4935 = vrcp.f32 %v2877_v9  ;;  %v2880_v10 = vpop.xlane.xlu0 %2879  ;;  %3972 = vperm.xlu1 %4858, %v3969_v6  }
 0xc64   :  { %4937 = vrcp.f32 %v2880_v10 }
 0xc66   :  { %v2883_v15 = vpop.xlane.xlu1 %2882 }
 0xc67   :  { %4939 = vrcp.f32 %v2883_v15  ;;  %v2886_v16 = vpop.xlane.xlu0 %2885 }
 0xc68   :  { %v4932_v17 = vpop.eup %4931  ;;  %4941 = vrcp.f32 %v2886_v16 }
 0xc69   :  { %v4934_v19 = vpop.eup %4933  ;;  %v2902_v33 = vmul.f32 %v4932_v17, %v5770_v1 }
 0xc6a   :  { %v2901_v20 = vmul.f32 %v4934_v19, %v5772_v21  ;;  %v2351_v21 = vadd.f32 %v5768_v45, %v2191_v44  ;;  %v2201_v45 = vpop.permute.xlu1 %2200 }
 0xc6c   :  { %v4802_v23 = vpack.c.bf16 %v2902_v33, %v2901_v20 }
 0xc6d   :  { %v4936_v24 = vpop.eup %4935  ;;  %v2892_v35 = vpop.xlane.xlu0 %2891 }
 0xc6e   :  { %v4938_v26 = vpop.eup %4937  ;;  %v2903_v25 = vmul.f32 %v4936_v24, %v5778_v58  ;;  %4804 = vmatpush3.bf16.xpose.msk.msra.mxu0 %vm5459_vm5, %v4802_v23  ;;  %4943 = vrcp.f32 %v2892_v35 }
 0xc6f   :  { %v2904_v30 = vmul.f32 %v4938_v26, %v5780_v3  ;;  %4809 = vmatprep.subr.bf16.mxu0 %v4972_v36 }
 0xc71   :  { %v4940_v34 = vpop.eup %4939  ;;  %v4806_v49 = vpack.c.bf16 %v2904_v30, %v2903_v25 }
 0xc72   :  { %v4942_v40 = vpop.eup %4941  ;;  %v2905_v1 = vmul.f32 %v4940_v34, %v5786_v5  ;;  %v2361_v5 = vadd.f32 %v5803_v13, %v2201_v45 }
 0xc73   :  { %v2906_v37 = vmul.f32 %v4942_v40, %v5788_v31  ;;  %4808 = vmatpush3.bf16.xpose.msk.msra.mxu1 %vm5459_vm5, %v4806_v49 }
 0xc74   :  { %4813 = vmatprep.subr.bf16.mxu1 %v4972_v36 }
 0xc75   :  { %4616 = vmatmul.mubr.msk.f32.vlgmr.msra.gmra.mrb[36].mxu0 %vm189_vm2, %v2351_v21  ;;  %v2196_v58 = vpop.permute.xlu0 %2195  ;;  %v4810_v3 = vpack.c.bf16 %v2906_v37, %v2905_v1 }
 0xc76   :  { %v2356_v48 = vadd.f32 %v5766_v42, %v2196_v58  ;;  %4629 = vmatprep.mubr.msk.f32.mxu0 %vm4973_vm4, %v4974_v43 }
 0xc77   :  { %4812 = vmatpush3.bf16.xpose.msk.msra.mxu0 %vm5459_vm5, %v4810_v3 }
 0xc78   :  { %v4944_v42 = vpop.eup %4943 }
 0xc79   :  { %v2908_v39 = vmul.f32 %v4944_v42, %v5794_v7  ;;  %v4171_v7 = vld [vmem:[%s6149_s8 + $0x20] sm:$0xff]  ;;  %v3238_v0 = vpop.permute.xlu0 %3237 }
 0xc7a   :  { %4623 = vmatmul.mubr.msk.f32.vlgmr.msra.gmra.mrb[42].mxu1 %vm189_vm2, %v2356_v48 }
 0xc7b   :  { %4636 = vmatprep.mubr.msk.f32.mxu1 %vm4973_vm4, %v4974_v43 }
 0xc7d   :  { %v3248_v6 = vpop.permute.xlu0 %3247 }
 0xc7e   :  { %4630 = vmatmul.mubr.msk.f32.vlgmr.msra.gmra.mrb[38].mxu0 %vm189_vm2, %v2361_v5 }
 0xc7f   :  { %4647 = vmatprep.mubr.msk.f32.mxu0 %vm365_vm1, %v4171_v7 }
 0xc9b   :  { %v2889_v31 = vpop.xlane.xlu1 %2888 }
 0xc9c   :  { %4945 = vrcp.f32 %v2889_v31 }
 0xc9f   :  { %v2206_v54 = vpop.permute.xlu1 %2205 }
 0xca0   :  { %v2366_v13 = vadd.f32 %v5801_v11, %v2206_v54 }
 0xca3   :  { %v3243_v63 = vpop.permute.xlu1 %3242 }
 0xca6   :  { %v4946_v50 = vpop.eup %4945 }
 0xca7   :  { %v2907_v51 = vmul.f32 %v4946_v50, %v5824_v47  ;;  %v3253_v4 = vpop.permute.xlu1 %3252 }
 0xca9   :  { %v4814_v53 = vpack.c.bf16 %v2908_v39, %v2907_v51 }
 0xcab   :  { %4816 = vmatpush3.bf16.xpose.msk.msra.mxu1 %vm5459_vm5, %v4814_v53 }
 0xcac   :  { %4825 = vmatprep.subr.bf16.mxu1 %v4972_v36 }
 0xcb2   :  { %4637 = vmatmul.mubr.msk.f32.vlgmr.msra.gmra.mrb[44].mxu1 %vm189_vm2, %v2366_v13 }
 0xcb3   :  { %4661 = vmatprep.mubr.msk.f32.mxu1 %vm4973_vm4, %v4974_v43 }
 0xd48   :  { %v2984_v47 = vpop.f32.mrb[36].mxu0 }
 0xd49   :  { %v4617_v55 = vpop.f32.mrb[37].mxu0 }
 0xd4d   :  { %v3063_v52 = vpop.f32.mrb[42].mxu1 }
 0xd4e   :  { %v4817_v12 = vpack.c.bf16 %v3063_v52, %v2984_v47  ;;  %v4624_v14 = vpop.f32.mrb[43].mxu1 }
 0xd4f   :  { %v3416_v14 = vpop.permute.xlu1 %3415 }
 0xd50   :  { %4818 = vmatprep.subr.bf16.mxu0 %v4817_v12 }
 0xd51   :  { %v3142_v59 = vpop.f32.mrb[38].mxu0  ;;  %4820 = vmatpush3.bf16.msra.mxu0 %v4817_v12  ;;  %v3411_v12 = vpop.permute.xlu0 %3410 }
 0xd52   :  { %v4631_v11 = vpop.f32.mrb[39].mxu0 }
 0xd55   :  { %v3435_v11 = vpop.permute.xlu0 %3434 }
 0xd85   :  { %v3221_v56 = vpop.f32.mrb[44].mxu1 }
 0xd86   :  { %v4821_v60 = vpack.c.bf16 %v3221_v56, %v3142_v59  ;;  %v4638_v38 = vpop.f32.mrb[45].mxu1  ;;  %v3440_v56 = vpop.permute.xlu1 %3439 }
 0xd87   :  { %v3421_v38 = vpop.permute.xlu0 %3420 }
 0xd88   :  { %4822 = vmatprep.subr.bf16.mxu0 %v4821_v60 }
 0xd89   :  { %4824 = vmatpush3.bf16.msra.mxu0 %v4821_v60 }
 0xd8c   :  { %4648 = vmatmul.mubr.msk.f32.vlgmr.msra.gmra.mrb[40].mxu0 %vm365_vm1, %v4172_v46  ;;  %v3426_v46 = vpop.permute.xlu1 %3425 }
 0xd8d   :  { %4650 = vmatprep.mubr.msk.f32.mxu0 %vm365_vm1, %v4173_v61 }
 0xd90   :  { %4651 = vmatmul.mubr.msk.f32.gmra.mrb[42].mxu0 %vm365_vm1, %v4174_v62 }
 0xe5f   :  { %v4649_v57 = vpop.f32.mrb[40].mxu0 }
 0xe60   :  { %v3339_v2 = vadd.f32 %v4649_v57, %v3243_v63  ;;  %v3333_v28 = vpop.f32.mrb[41].mxu0 }
 0xe61   :  { %v3334_v22 = vadd.f32 %v3333_v28, %v3238_v0 }
 0xe62   :  { %v5968_v44 = vadd.f32 %v3339_v2, %v5661_v41 }
 0xe63   :  { %v5971_v27 = vadd.f32 %v3334_v22, %v5664_v8  ;;  %v4652_v32 = vpop.f32.mrb[42].mxu0 }
 0xe64   :  { %v3349_v9 = vadd.f32 %v4652_v32, %v3253_v4  ;;  %v3343_v10 = vpop.f32.mrb[43].mxu0  ;;  %v3367_v15 = vsel %vm189_vm2, %v5968_v44, 0.0 }
 0xe65   :  { %v3366_v16 = vsel %vm189_vm2, %v5971_v27, 0.0  ;;  %v3344_v17 = vadd.f32 %v3343_v10, %v3248_v6  ;;  %v3445_v6 = vpop.permute.xlu0 %3444 }
 0xe66   :  { %v5978_v19 = vadd.f32 %v3349_v9, %v5671_v18  ;;  %v3368_v33 = vadd.f32 %v3367_v15, %v3366_v16  ;;  %v3450_v9 = vpop.permute.xlu1 %3449 }
 0xe67   :  { %v5981_v41 = vadd.f32 %v3344_v17, %v5674_v29 }
 0xe68   :  { %v3371_v23 = vsel %vm189_vm2, %v5978_v19, 0.0 }
 0xe69   :  { %v3369_v8 = vsel %vm189_vm2, %v5981_v41, 0.0 }
 0xe6a   :  { %v3370_v20 = vadd.f32 %v3369_v8, %v3368_v33  ;;  %v4191_v33 = vld [vmem:[%s6150_s12 + $0x48] sm:$0xff]  ;;  %v4192_v8 = vld [vmem:[%s6150_s12 + $0x50] sm:$0xff] }
 0xe6c   :  { %v3372_v24 = vadd.f32 %v3371_v23, %v3370_v20  ;;  %v4193_v20 = vld [vmem:[%s6150_s12 + $0x58] sm:$0xff]  ;;  %v4194_v23 = vld [vmem:[%s6150_s12 + $0x60] sm:$0xff] }
 0xe6e   :  { %v3373_v26 = vrot.slane %v3372_v24, 4 }
 0xe70   :  { %v3374_v25 = vadd.f32 %v3373_v26, %v3372_v24  ;;  %v4195_v24 = vld [vmem:[%s6150_s12 + $0x68] sm:$0xff]  ;;  %v4196_v26 = vld [vmem:[%s6150_s12 + $0x70] sm:$0xff] }
 0xe72   :  { %v3375_v30 = vrot.slane %v3374_v25, 2 }
 0xe74   :  { %v3376_v34 = vadd.f32 %v3375_v30, %v3374_v25  ;;  %v4197_v25 = vld [vmem:[%s6150_s12 + $0x78] sm:$0xff]  ;;  %v4198_v30 = vld [vmem:[%s6150_s12 + $0x80] sm:$0xff] }
 0xe76   :  { %v3377_v35 = vrot.slane %v3376_v34, 1 }
 0xe78   :  { %v3378_v49 = vadd.f32 %v3377_v35, %v3376_v34  ;;  %v4199_v34 = vld [vmem:[%s6150_s12 + $0x88] sm:$0xff]  ;;  %v4218_v35 = vld [vmem:[%s6151_s14 + $0x20] sm:$0xff] }
 0xe79   :  { %4706 = vmatprep.mubr.msk.f32.mxu0 %vm1920_vm6, %v4218_v35 }
 0xe7a   :  { %v3379_v18 = vmul.f32 0.03125, %v3378_v49  ;;  %v3479_v49 = vpop.permute.xlu0 %3478 }
 0xe7c   :  { %v3380_v40 = vsub.f32 %v5971_v27, %v3379_v18  ;;  %v3381_v29 = vsub.f32 %v5968_v44, %v3379_v18  ;;  %v3382_v1 = vsub.f32 %v5981_v41, %v3379_v18  ;;  %v3383_v21 = vsub.f32 %v5978_v19, %v3379_v18 }
 0xe7e   :  { %v3384_v37 = vmul.f32 %v3380_v40, %v3380_v40  ;;  %v3385_v58 = vmul.f32 %v3381_v29, %v3381_v29  ;;  %v3386_v3 = vmul.f32 %v3382_v1, %v3382_v1  ;;  %v3387_v48 = vmul.f32 %v3383_v21, %v3383_v21 }
 0xe80   :  { %v3388_v45 = vsel %vm189_vm2, %v3384_v37, 0.0  ;;  %v3389_v5 = vsel %vm189_vm2, %v3385_v58, 0.0  ;;  %v3391_v42 = vsel %vm189_vm2, %v3386_v3, 0.0  ;;  %v3393_v39 = vsel %vm189_vm2, %v3387_v48, 0.0 }
 0xe81   :  { %v3390_v31 = vadd.f32 %v3389_v5, %v3388_v45 }
 0xe83   :  { %v3392_v50 = vadd.f32 %v3391_v42, %v3390_v31  ;;  %v3489_v31 = vpop.permute.xlu0 %3488 }
 0xe85   :  { %v3394_v51 = vadd.f32 %v3393_v39, %v3392_v50 }
 0xe87   :  { %v3395_v53 = vrot.slane %v3394_v51, 4 }
 0xe89   :  { %v3396_v54 = vadd.f32 %v3395_v53, %v3394_v51 }
 0xe8b   :  { %v3397_v13 = vrot.slane %v3396_v54, 2 }
 0xe8d   :  { %v3398_v7 = vadd.f32 %v3397_v13, %v3396_v54 }
 0xe8f   :  { %v3399_v47 = vrot.slane %v3398_v7, 1 }
 0xe91   :  { %v3400_v55 = vadd.f32 %v3399_v47, %v3398_v7 }
 0xe93   :  { %v3401_v52 = vmul.f32 0.03125, %v3400_v55 }
 0xe95   :  { %v3402_v59 = vadd.f32 1e-12, %v3401_v52 }
 0xe97   :  { %4947 = vrsqrt.f32 %v3402_v59 }
 0xea1   :  { %v4948_v60 = vpop.eup %4947 }
 0xea2   :  { %v3406_v61 = vmul.f32 %v4948_v60, %v3382_v1  ;;  %v3404_v62 = vmul.f32 %v4948_v60, %v3380_v40  ;;  %v3405_v63 = vmul.f32 %v4948_v60, %v3381_v29  ;;  %v3407_v0 = vmul.f32 %v4948_v60, %v3383_v21  ;;  %v3484_v21 = vpop.permute.xlu1 %3483 }
 0xea4   :  { %v3430_v57 = vmul.f32 %v3421_v38, %v3406_v61  ;;  %v3428_v2 = vmul.f32 %v3411_v12, %v3404_v62  ;;  %v3429_v28 = vmul.f32 %v3416_v14, %v3405_v63  ;;  %v3431_v22 = vmul.f32 %v3426_v46, %v3407_v0  ;;  %v3499_v38 = vpop.permute.xlu0 %3498 }
 0xea6   :  { %v3452_v4 = vadd.f32 %v3435_v11, %v3428_v2  ;;  %v3453_v32 = vadd.f32 %v3440_v56, %v3429_v28  ;;  %v3454_v15 = vadd.f32 %v3445_v6, %v3430_v57  ;;  %v3455_v16 = vadd.f32 %v3450_v9, %v3431_v22  ;;  %v3494_v47 = vpop.permute.xlu1 %3493 }
 0xea8   :  { %v4826_v10 = vpack.c.bf16 %v3453_v32, %v3452_v4  ;;  %v4829_v17 = vpack.c.bf16 %v3455_v16, %v3454_v15 }
 0xeaa   :  { %4827 = vmatpush3.bf16.msra.mxu1 %v4826_v10  ;;  %v3504_v22 = vpop.permute.xlu1 %3503 }
 0xeab   :  { %4828 = vmatprep.subr.bf16.mxu1 %v4972_v36 }
 0xeae   :  { %4830 = vmatpush3.bf16.msra.mxu1 %v4829_v17 }
 0xeb1   :  { %4662 = vmatmul.mubr.msk.f32.vlgmr.msra.gmra.mrb[46].mxu1 %vm365_vm1, %v4191_v33 }
 0xeb2   :  { %4664 = vmatprep.mubr.msk.f32.mxu1 %vm4973_vm4, %v4974_v43 }
 0xeb5   :  { %4665 = vmatmul.mubr.msk.f32.gmra.mrb[48].mxu1 %vm365_vm1, %v4192_v8  ;;  %v3509_v8 = vpop.permute.xlu0 %3508 }
 0xeb6   :  { %4667 = vmatprep.mubr.msk.f32.mxu1 %vm4973_vm4, %v4974_v43 }
 0xeb9   :  { %4668 = vmatmul.mubr.msk.f32.gmra.mrb[50].mxu1 %vm365_vm1, %v4193_v20 }
 0xeba   :  { %4670 = vmatprep.mubr.msk.f32.mxu1 %vm4973_vm4, %v4974_v43 }
 0xebd   :  { %4671 = vmatmul.mubr.msk.f32.gmra.mrb[52].mxu1 %vm365_vm1, %v4194_v23 }
 0xebe   :  { %4673 = vmatprep.mubr.msk.f32.mxu1 %vm4973_vm4, %v4974_v43 }
 0xec1   :  { %4674 = vmatmul.mubr.msk.f32.gmra.mrb[54].mxu1 %vm365_vm1, %v4195_v24 }
 0xec2   :  { %4676 = vmatprep.mubr.msk.f32.mxu1 %vm4973_vm4, %v4974_v43 }
 0xec5   :  { %4677 = vmatmul.mubr.msk.f32.gmra.mrb[56].mxu1 %vm365_vm1, %v4196_v26 }
 0xec6   :  { %4679 = vmatprep.mubr.msk.f32.mxu1 %vm4973_vm4, %v4974_v43 }
 0xec9   :  { %4680 = vmatmul.mubr.msk.f32.gmra.mrb[58].mxu1 %vm365_vm1, %v4197_v25 }
 0xeca   :  { %4682 = vmatprep.mubr.msk.f32.mxu1 %vm4973_vm4, %v4974_v43 }
 0xecd   :  { %4683 = vmatmul.mubr.msk.f32.gmra.mrb[60].mxu1 %vm365_vm1, %v4198_v30 }
 0xece   :  { %4685 = vmatprep.mubr.msk.f32.mxu1 %vm4973_vm4, %v4974_v43 }
 0xed1   :  { %4686 = vmatmul.mubr.msk.f32.gmra.mrb[62].mxu1 %vm365_vm1, %v4199_v34 }
 0xf84   :  { %v3614_v18 = vpop.f32.mrb[46].mxu1 }
 0xf85   :  { %v6052_v40 = vadd.f32 %v3614_v18, %v3479_v49  ;;  %v4663_v29 = vpop.f32.mrb[47].mxu1 }
 0xf86   :  { %v3514_v29 = vpop.permute.xlu1 %3513 }
 0xf87   :  { %v3658_v1 = vmul.f32 %v6052_v40, %v6052_v40 }
 0xf88   :  { %v3619_v37 = vpop.f32.mrb[48].mxu1 }
 0xf89   :  { %v3667_v58 = vmul.f32 %v3658_v1, %v6052_v40  ;;  %v6057_v3 = vadd.f32 %v3619_v37, %v3484_v21  ;;  %v4666_v48 = vpop.f32.mrb[49].mxu1 }
 0xf8b   :  { %v3676_v45 = vmul.f32 0.044715, %v3667_v58  ;;  %v3659_v5 = vmul.f32 %v6057_v3, %v6057_v3 }
 0xf8c   :  { %v3624_v42 = vpop.f32.mrb[50].mxu1 }
 0xf8d   :  { %v3685_v50 = vadd.f32 %v3676_v45, %v6052_v40  ;;  %v3668_v39 = vmul.f32 %v3659_v5, %v6057_v3  ;;  %v6063_v51 = vadd.f32 %v3624_v42, %v3489_v31  ;;  %v4669_v53 = vpop.f32.mrb[51].mxu1 }
 0xf8f   :  { %v3694_v54 = vmul.f32 0.7978846, %v3685_v50  ;;  %v3677_v13 = vmul.f32 0.044715, %v3668_v39  ;;  %v3660_v7 = vmul.f32 %v6063_v51, %v6063_v51 }
 0xf90   :  { %v3629_v55 = vpop.f32.mrb[52].mxu1 }
 0xf91   :  { %4949 = vtanh.f32 %v3694_v54  ;;  %v3686_v52 = vadd.f32 %v3677_v13, %v6057_v3  ;;  %v3669_v12 = vmul.f32 %v3660_v7, %v6063_v51  ;;  %v6069_v14 = vadd.f32 %v3629_v55, %v3494_v47  ;;  %v4672_v59 = vpop.f32.mrb[53].mxu1  ;;  %v3519_v54 = vpop.permute.xlu0 %3518 }
 0xf93   :  { %v3695_v11 = vmul.f32 0.7978846, %v3686_v52  ;;  %v3678_v56 = vmul.f32 0.044715, %v3669_v12  ;;  %v3661_v60 = vmul.f32 %v6069_v14, %v6069_v14 }
 0xf94   :  { %v3634_v46 = vpop.f32.mrb[54].mxu1 }
 0xf95   :  { %4951 = vtanh.f32 %v3695_v11  ;;  %v3687_v61 = vadd.f32 %v3678_v56, %v6063_v51  ;;  %v3670_v62 = vmul.f32 %v3661_v60, %v6069_v14  ;;  %v6075_v63 = vadd.f32 %v3634_v46, %v3499_v38  ;;  %v4675_v0 = vpop.f32.mrb[55].mxu1 }
 0xf97   :  { %v3696_v57 = vmul.f32 0.7978846, %v3687_v61  ;;  %v3679_v2 = vmul.f32 0.044715, %v3670_v62  ;;  %v3662_v28 = vmul.f32 %v6075_v63, %v6075_v63 }
 0xf98   :  { %v3639_v4 = vpop.f32.mrb[56].mxu1 }
 0xf99   :  { %4953 = vtanh.f32 %v3696_v57  ;;  %v3688_v32 = vadd.f32 %v3679_v2, %v6069_v14  ;;  %v3671_v6 = vmul.f32 %v3662_v28, %v6075_v63  ;;  %v6081_v9 = vadd.f32 %v3639_v4, %v3504_v22  ;;  %v4678_v10 = vpop.f32.mrb[57].mxu1 }
 0xf9b   :  { %v4950_v15 = vpop.eup %4949  ;;  %v3697_v16 = vmul.f32 0.7978846, %v3688_v32  ;;  %v3680_v17 = vmul.f32 0.044715, %v3671_v6  ;;  %v3663_v33 = vmul.f32 %v6081_v9, %v6081_v9 }
 0xf9c   :  { %v3644_v20 = vpop.f32.mrb[58].mxu1  ;;  %v3712_v23 = vadd.f32 1.0, %v4950_v15 }
 0xf9d   :  { %4955 = vtanh.f32 %v3697_v16  ;;  %v3689_v24 = vadd.f32 %v3680_v17, %v6075_v63  ;;  %v3672_v26 = vmul.f32 %v3663_v33, %v6081_v9  ;;  %v6087_v25 = vadd.f32 %v3644_v20, %v3509_v8  ;;  %v4681_v30 = vpop.f32.mrb[59].mxu1 }
 0xf9e   :  { %v3721_v37 = vmul.f32 0.5, %v3712_v23 }
 0xf9f   :  { %v4952_v34 = vpop.eup %4951  ;;  %v3698_v35 = vmul.f32 0.7978846, %v3689_v24  ;;  %v3681_v49 = vmul.f32 0.044715, %v3672_v26  ;;  %v3664_v18 = vmul.f32 %v6087_v25, %v6087_v25 }
 0xfa0   :  { %v3649_v1 = vpop.f32.mrb[60].mxu1  ;;  %v3713_v21 = vadd.f32 1.0, %v4952_v34  ;;  %v3730_v7 = vmul.f32 %v3721_v37, %v6052_v40 }
 0xfa1   :  { %4957 = vtanh.f32 %v3698_v35  ;;  %v3690_v58 = vadd.f32 %v3681_v49, %v6081_v9  ;;  %v3673_v48 = vmul.f32 %v3664_v18, %v6087_v25  ;;  %v3650_v45 = vadd.f32 %v3649_v1, %v3514_v29  ;;  %v4684_v5 = vpop.f32.mrb[61].mxu1 }
 0xfa2   :  { %v3722_v31 = vmul.f32 0.5, %v3713_v21  ;;  %v3752_v5 = vpop.permute.xlu1 %3751 }
 0xfa3   :  { %v4954_v42 = vpop.eup %4953  ;;  %v3699_v50 = vmul.f32 0.7978846, %v3690_v58  ;;  %v3682_v39 = vmul.f32 0.044715, %v3673_v48  ;;  %v3665_v53 = vmul.f32 %v3650_v45, %v3650_v45 }
 0xfa4   :  { %v3654_v13 = vpop.f32.mrb[62].mxu1  ;;  %v3731_v47 = vmul.f32 %v3722_v31, %v6057_v3  ;;  %v3714_v55 = vadd.f32 1.0, %v4954_v42 }
 0xfa5   :  { %4959 = vtanh.f32 %v3699_v50  ;;  %v3691_v52 = vadd.f32 %v3682_v39, %v6087_v25  ;;  %v3674_v12 = vmul.f32 %v3665_v53, %v3650_v45  ;;  %v3655_v59 = vadd.f32 %v3654_v13, %v3519_v54  ;;  %v4687_v11 = vpop.f32.mrb[63].mxu1 }
 0xfa6   :  { %v4831_v56 = vpack.c.bf16 %v3731_v47, %v3730_v7  ;;  %v3723_v0 = vmul.f32 0.5, %v3714_v55  ;;  %v3762_v47 = vpop.permute.xlu1 %3761 }
 0xfa7   :  { %v4956_v60 = vpop.eup %4955  ;;  %v3700_v38 = vmul.f32 0.7978846, %v3691_v52  ;;  %v3683_v46 = vmul.f32 0.044715, %v3674_v12  ;;  %v3666_v61 = vmul.f32 %v3655_v59, %v3655_v59 }
 0xfa8   :  { %4832 = vmatprep.subr.bf16.mxu0 %v4831_v56  ;;  %v3715_v62 = vadd.f32 1.0, %v4956_v60  ;;  %v3732_v4 = vmul.f32 %v3723_v0, %v6063_v51 }
 0xfa9   :  { %4961 = vtanh.f32 %v3700_v38  ;;  %v3692_v57 = vadd.f32 %v3683_v46, %v3650_v45  ;;  %v3675_v40 = vmul.f32 %v3666_v61, %v3655_v59  ;;  %4834 = vmatpush3.bf16.msra.mxu0 %v4831_v56 }
 0xfaa   :  { %v3724_v3 = vmul.f32 0.5, %v3715_v62 }
 0xfab   :  { %v4958_v2 = vpop.eup %4957  ;;  %v3701_v28 = vmul.f32 0.7978846, %v3692_v57  ;;  %v3684_v22 = vmul.f32 0.044715, %v3675_v40 }
 0xfac   :  { %v3733_v32 = vmul.f32 %v3724_v3, %v6069_v14  ;;  %v3716_v6 = vadd.f32 1.0, %v4958_v2 }
 0xfad   :  { %4963 = vtanh.f32 %v3701_v28  ;;  %v3693_v10 = vadd.f32 %v3684_v22, %v3655_v59 }
 0xfae   :  { %v4835_v15 = vpack.c.bf16 %v3733_v32, %v3732_v4  ;;  %v3725_v8 = vmul.f32 0.5, %v3716_v6 }
 0xfaf   :  { %v4960_v16 = vpop.eup %4959  ;;  %v3702_v17 = vmul.f32 0.7978846, %v3693_v10 }
 0xfb0   :  { %4836 = vmatprep.subr.bf16.mxu0 %v4835_v15  ;;  %v3717_v33 = vadd.f32 1.0, %v4960_v16  ;;  %v3734_v24 = vmul.f32 %v3725_v8, %v6075_v63  ;;  %v4219_v63 = vld [vmem:[%s6151_s14 + $0x28] sm:$0xff] }
 0xfb1   :  { %4838 = vmatpush3.bf16.msra.mxu0 %v4835_v15  ;;  %4965 = vtanh.f32 %v3702_v17 }
 0xfb2   :  { %v3726_v20 = vmul.f32 0.5, %v3717_v33 }
 0xfb3   :  { %v4962_v23 = vpop.eup %4961 }
 0xfb4   :  { %v3735_v26 = vmul.f32 %v3726_v20, %v6081_v9  ;;  %v3718_v51 = vadd.f32 1.0, %v4962_v23  ;;  %v4220_v9 = vld [vmem:[%s6151_s14 + $0x30] sm:$0xff] }
 0xfb6   :  { %v4839_v30 = vpack.c.bf16 %v3735_v26, %v3734_v24  ;;  %v3727_v35 = vmul.f32 0.5, %v3718_v51 }
 0xfb7   :  { %v4964_v14 = vpop.eup %4963 }
 0xfb8   :  { %4840 = vmatprep.subr.bf16.mxu0 %v4839_v30  ;;  %v3719_v34 = vadd.f32 1.0, %v4964_v14  ;;  %v3736_v29 = vmul.f32 %v3727_v35, %v6087_v25  ;;  %v4221_v25 = vld [vmem:[%s6151_s14 + $0x38] sm:$0xff] }
 0xfb9   :  { %4842 = vmatpush3.bf16.msra.mxu0 %v4839_v30 }
 0xfba   :  { %v3728_v49 = vmul.f32 0.5, %v3719_v34 }
 0xfbb   :  { %v4966_v18 = vpop.eup %4965 }
 0xfbc   :  { %v3737_v1 = vmul.f32 %v3728_v49, %v3650_v45  ;;  %v3720_v21 = vadd.f32 1.0, %v4966_v18  ;;  %v3757_v45 = vpop.permute.xlu0 %3756  ;;  %v3923_v49 = vpop.permute.xlu1 %3922 }
 0xfbe   :  { %v4843_v37 = vpack.c.bf16 %v3737_v1, %v3736_v29  ;;  %v3729_v58 = vmul.f32 0.5, %v3720_v21 }
 0xfc0   :  { %4844 = vmatprep.subr.bf16.mxu0 %v4843_v37  ;;  %v3738_v48 = vmul.f32 %v3729_v58, %v3655_v59  ;;  %v3767_v54 = vpop.permute.xlu0 %3766  ;;  %v3947_v21 = vpop.permute.xlu1 %3946 }
 0xfc1   :  { %4846 = vmatpush3.bf16.msra.mxu0 %v4843_v37 }
 0xfc2   :  { %4704 = vmatprep.subr.mxu0 %v3738_v48 }
 0xfc4   :  { %v3928_v35 = vpop.permute.xlu0 %3927  ;;  %v3933_v58 = vpop.permute.xlu1 %3932 }
 0xfc5   :  { %4705 = vmatpush3.msra.mxu0 %v3738_v48 }
 0xfc6   :  { %4707 = vmatmul.mubr.msk.f32.vlgmr.msra.gmra.mrb[44].mxu0 %vm1920_vm6, %v4219_v63  ;;  %4847 = vmatprep.subr.bf16.mxu0 %v4972_v36 }
 0xfc7   :  { %4709 = vmatprep.mubr.msk.f32.mxu0 %vm1920_vm6, %v4220_v9 }
 0xfc8   :  { %v3952_v1 = vpop.permute.xlu0 %3951 }
 0xfca   :  { %4710 = vmatmul.mubr.msk.f32.gmra.mrb[46].mxu0 %vm1920_vm6, %v4221_v25 }
 0xfcb   :  { %4720 = vmatprep.mubr.msk.f32.mxu0 %vm4973_vm4, %v4974_v43 }
 0xfcc   :  { %v3938_v37 = vpop.permute.xlu0 %3937 }
0x1099   :  { %v4708_v31 = vpop.f32.mrb[44].mxu0 }
0x109a   :  { %v3853_v42 = vadd.f32 %v4708_v31, %v3757_v45  ;;  %v3847_v50 = vpop.f32.mrb[45].mxu0 }
0x109b   :  { %v3848_v39 = vadd.f32 %v3847_v50, %v3752_v5 }
0x109c   :  { %v3867_v53 = vadd.f32 %v3853_v42, %v5968_v44 }
0x109d   :  { %v3866_v13 = vadd.f32 %v3848_v39, %v5971_v27  ;;  %v4711_v7 = vpop.f32.mrb[46].mxu0  ;;  %v3962_v39 = vpop.permute.xlu0 %3961 }
0x109e   :  { %v3879_v55 = vsel %vm189_vm2, %v3867_v53, 0.0  ;;  %v3863_v52 = vadd.f32 %v4711_v7, %v3767_v54  ;;  %v3857_v12 = vpop.f32.mrb[47].mxu0 }
0x109f   :  { %v3878_v59 = vsel %vm189_vm2, %v3866_v13, 0.0  ;;  %v3858_v43 = vadd.f32 %v3857_v12, %v3762_v47  ;;  %v3968_v12 = vld [vmem:[%s6155_s18] sm:$0x1f] }
0x10a0   :  { %v3880_v11 = vadd.f32 %v3879_v55, %v3878_v59  ;;  %v3869_v56 = vadd.f32 %v3863_v52, %v5978_v19 }
0x10a1   :  { %v3868_v60 = vadd.f32 %v3858_v43, %v5981_v41 }
0x10a2   :  { %v3883_v46 = vsel %vm189_vm2, %v3869_v56, 0.0 }
0x10a3   :  { %v3881_v38 = vsel %vm189_vm2, %v3868_v60, 0.0 }
0x10a4   :  { %v3882_v44 = vadd.f32 %v3881_v38, %v3880_v11 }
0x10a6   :  { %v3884_v27 = vadd.f32 %v3883_v46, %v3882_v44 }
0x10a8   :  { %v3885_v61 = vrot.slane %v3884_v27, 4 }
0x10aa   :  { %v3886_v62 = vadd.f32 %v3885_v61, %v3884_v27 }
0x10ac   :  { %v3887_v0 = vrot.slane %v3886_v62, 2 }
0x10ae   :  { %v3888_v57 = vadd.f32 %v3887_v0, %v3886_v62 }
0x10b0   :  { %v3889_v40 = vrot.slane %v3888_v57, 1 }
0x10b2   :  { %v3890_v3 = vadd.f32 %v3889_v40, %v3888_v57 }
0x10b4   :  { %v3891_v2 = vmul.f32 0.03125, %v3890_v3 }
0x10b6   :  { %v3892_v28 = vsub.f32 %v3866_v13, %v3891_v2  ;;  %v3893_v22 = vsub.f32 %v3867_v53, %v3891_v2  ;;  %v3894_v4 = vsub.f32 %v3868_v60, %v3891_v2  ;;  %v3895_v32 = vsub.f32 %v3869_v56, %v3891_v2  ;;  %v3957_v53 = vpop.permute.xlu1 %3956 }
0x10b8   :  { %v3896_v19 = vmul.f32 %v3892_v28, %v3892_v28  ;;  %v3897_v6 = vmul.f32 %v3893_v22, %v3893_v22  ;;  %v3898_v41 = vmul.f32 %v3894_v4, %v3894_v4  ;;  %v3899_v10 = vmul.f32 %v3895_v32, %v3895_v32 }
0x10ba   :  { %v3900_v15 = vsel %vm189_vm2, %v3896_v19, 0.0  ;;  %v3901_v16 = vsel %vm189_vm2, %v3897_v6, 0.0  ;;  %v3903_v33 = vsel %vm189_vm2, %v3898_v41, 0.0  ;;  %v3905_v20 = vsel %vm189_vm2, %v3899_v10, 0.0  ;;  %v3973_v59 = vpop.permute.xlu1 %3972 }
0x10bb   :  { %v3902_v17 = vadd.f32 %v3901_v16, %v3900_v15 }
0x10bd   :  { %v3904_v8 = vadd.f32 %v3903_v33, %v3902_v17 }
0x10bf   :  { %v3906_v23 = vadd.f32 %v3905_v20, %v3904_v8 }
0x10c1   :  { %v3907_v24 = vrot.slane %v3906_v23, 4 }
0x10c3   :  { %v3908_v26 = vadd.f32 %v3907_v24, %v3906_v23 }
0x10c5   :  { %v3909_v51 = vrot.slane %v3908_v26, 2 }
0x10c7   :  { %v3910_v30 = vadd.f32 %v3909_v51, %v3908_v26 }
0x10c9   :  { %v3911_v14 = vrot.slane %v3910_v30, 1 }
0x10cb   :  { %v3912_v34 = vadd.f32 %v3911_v14, %v3910_v30 }
0x10cd   :  { %v3913_v18 = vmul.f32 0.03125, %v3912_v34 }
0x10cf   :  { %v3914_v29 = vadd.f32 1e-12, %v3913_v18 }
0x10d1   :  { %4967 = vrsqrt.f32 %v3914_v29 }
0x10db   :  { %v4968_v48 = vpop.eup %4967 }
0x10dc   :  { %v3918_v63 = vmul.f32 %v4968_v48, %v3894_v4  ;;  %v3916_v9 = vmul.f32 %v4968_v48, %v3892_v28  ;;  %v3917_v25 = vmul.f32 %v4968_v48, %v3893_v22  ;;  %v3919_v45 = vmul.f32 %v4968_v48, %v3895_v32 }
0x10de   :  { %v3942_v5 = vmul.f32 %v3933_v58, %v3918_v63  ;;  %v3940_v31 = vmul.f32 %v3923_v49, %v3916_v9  ;;  %v3941_v42 = vmul.f32 %v3928_v35, %v3917_v25  ;;  %v3943_v50 = vmul.f32 %v3938_v37, %v3919_v45 }
0x10e0   :  { %v3964_v54 = vadd.f32 %v3947_v21, %v3940_v31  ;;  %v3965_v13 = vadd.f32 %v3952_v1, %v3941_v42  ;;  %v3966_v7 = vadd.f32 %v3957_v53, %v3942_v5  ;;  %v3967_v47 = vadd.f32 %v3962_v39, %v3943_v50 }
0x10e2   :  { %v4848_v55 = vpack.c.bf16 %v3965_v13, %v3964_v54  ;;  %v4851_v52 = vpack.c.bf16 %v3967_v47, %v3966_v7 }
0x10e4   :  { %4849 = vmatpush3.bf16.msra.mxu0 %v4848_v55 }
0x10e5   :  { %4850 = vmatprep.subr.bf16.mxu0 %v4972_v36 }
0x10e8   :  { %4852 = vmatpush3.bf16.msra.mxu0 %v4851_v52 }
0x10eb   :  { %4721 = vmatmul.mubr.msk.f32.vlgmr.msra.gmra.mrb[48].mxu0 %vm365_vm1, %v3968_v12 }
0x11be   :  { %v4044_v43 = vpop.f32.mrb[48].mxu0 }
0x11bf   :  { %v4045_v11 = vadd.f32 %v4044_v43, %v3973_v59  ;;  %v4722_v56 = vpop.f32.mrb[49].mxu0 }
0x11c1   :  { %4049 = vst.msk [vmem:[%s6156_s20] sm:$0x1f] %vm4048_vm7, %v4045_v11 }

</bundles_post_ra>
